<compile_context>
chip_gen: v7x
topology: tpu7x:2x2x1
jax: 0.10.0
libtpu: 0.0.40
codegen_flags: <defaults>
</compile_context>

<pallas_src>
import functools

import jax
import jax.numpy as jnp
from jax import lax
from jax.experimental import pallas as pl
from jax.experimental.pallas import tpu as pltpu


LANE = 128      # TPU lane width: channel-like dims are padded to this
ROW_PAD = 16    # pad conv output widths to this (bf16 sublane packing)
TILE_ROWS = 8   # feature-map rows processed per grid step


def _round_up(x, m):
    return (x + m - 1) // m * m


# ----------------------------- Pallas kernels -------------------------------

def _gather_taps(h3_ref, w_out):
    """Build the im2col matrix for a 3x3 valid conv from a row-replicated
    input block.

    h3_ref: (TR, 3, Win, C) ref -- for each of TR output rows, its 3 source
            rows (Win >= w_out + 2, C a multiple of 128).
    Returns (TR * w_out, 9 * C); tap (ky, kx) occupies lane block
            [(ky*3 + kx) * C, (ky*3 + kx + 1) * C).
    """
    tr = h3_ref.shape[0]
    c = h3_ref.shape[3]
    taps = []
    for ky in range(3):
        for kx in range(3):
            taps.append(h3_ref[:, ky, kx:kx + w_out, :])      # (TR, w_out, C)
    p = jnp.concatenate(taps, axis=-1)                        # (TR, w_out, 9C)
    return p.reshape(tr * w_out, 9 * c)


def conv_bn_relu_kernel(h3_ref, w_ref, shift_ref, o_ref, *, w_out):
    """relu(im2col(h3) @ W + shift); conv bias + BN folded into W / shift."""
    p = _gather_taps(h3_ref, w_out)                           # bf16
    acc = jnp.dot(p, w_ref[...], preferred_element_type=jnp.float32)
    o_ref[...] = jnp.maximum(acc + shift_ref[...], 0.0).astype(o_ref.dtype)


def conv_bn_relu_deconv_kernel(h3_ref, w_ref, shift_ref, wt_ref, bt_ref,
                               o_ref, *, w_out):
    """Second conv+BN+ReLU fused with the ConvTranspose2d(k=2, s=2) matmul."""
    p = _gather_taps(h3_ref, w_out)
    acc = jnp.dot(p, w_ref[...], preferred_element_type=jnp.float32)
    h = jnp.maximum(acc + shift_ref[...], 0.0).astype(jnp.bfloat16)
    # TODO(synk): nn.Dropout() is identity in eval mode; training-mode
    # stochastic dropout is not implemented here.
    o_ref[...] = jnp.dot(h, wt_ref[...],
                         preferred_element_type=jnp.float32) + bt_ref[...]


# ----------------------------- wrapper glue ---------------------------------

def _replicate_rows(x_nhwc, h_out, w_need, tile_rows):
    """(N,H,W,C) -> (R_pad, 3, w_need, C): for each of N*h_out output rows,
    stack the 3 source rows a 3x3 valid conv needs; adjust width to w_need
    and zero-pad the row count to a multiple of tile_rows."""
    n, h, w, c = x_nhwc.shape
    if w < w_need:
        x_nhwc = jnp.pad(x_nhwc, ((0, 0), (0, 0), (0, w_need - w), (0, 0)))
    else:
        x_nhwc = x_nhwc[:, :, :w_need, :]
    x3 = jnp.stack([x_nhwc[:, j:j + h_out] for j in range(3)], axis=2)
    x3 = x3.reshape(n * h_out, 3, w_need, c)
    r = n * h_out
    r_pad = _round_up(r, tile_rows)
    if r_pad > r:
        x3 = jnp.pad(x3, ((0, r_pad - r), (0, 0), (0, 0), (0, 0)))
    return x3


def _fold_conv_bn(w, b, gamma, beta, mean, var, c_in_p, c_out_p, eps=1e-5):
    """Fold inference BN + conv bias into a (9*c_in_p, c_out_p) bf16 matmul
    weight (tap-major, channel-minor) and a (1, c_out_p) f32 shift."""
    scale = gamma / jnp.sqrt(var + eps)                       # (Cout,)
    shift = b * scale + (beta - mean * scale)                 # (Cout,)
    c_out, c_in = w.shape[0], w.shape[1]
    wf = w * scale[:, None, None, None]                       # OIHW, scale O
    wk = jnp.transpose(wf, (2, 3, 1, 0))                      # (3,3,Cin,Cout)
    wk = jnp.pad(wk, ((0, 0), (0, 0),
                      (0, c_in_p - c_in), (0, c_out_p - c_out)))
    wk = wk.reshape(9 * c_in_p, c_out_p).astype(jnp.bfloat16)
    shift = jnp.pad(shift, (0, c_out_p - c_out)).reshape(1, c_out_p)
    return wk, shift.astype(jnp.float32)


def _fold_deconv(wt, bt, c_in_p, c_out_p):
    """ConvTranspose2d(k=2,s=2) weight as a (c_in_p, 4*c_out_p) bf16 matmul;
    column block (ky*2+kx) holds the weights for output sub-pixel (ky,kx)."""
    c_in, c_out = wt.shape[0], wt.shape[1]
    wk = jnp.transpose(wt, (0, 2, 3, 1))                      # (Cin,2,2,Cout)
    wk = jnp.pad(wk, ((0, c_in_p - c_in), (0, 0), (0, 0),
                      (0, c_out_p - c_out)))
    wk = wk.reshape(c_in_p, 4 * c_out_p).astype(jnp.bfloat16)
    btm = jnp.pad(bt, (0, c_out_p - c_out))
    btm = jnp.tile(btm, 4).reshape(1, 4 * c_out_p).astype(jnp.float32)
    return wk, btm


def decoder_block(x_nchw, params, *, tile_rows=TILE_ROWS):
    """Forward pass of _DecoderBlock (eval mode).  Input/output NCHW f32."""
    (w1, b1, g1, be1, m1, v1,
     w2, b2, g2, be2, m2, v2,
     wt, bt) = params

    n, c_in, h, w = x_nchw.shape
    c_mid = w1.shape[0]
    c_out = wt.shape[1]

    c_in_p = _round_up(c_in, LANE)
    c_mid_p = _round_up(c_mid, LANE)
    c_out_p = _round_up(c_out, LANE // 4)     # 4*c_out_p is a lane multiple

    h1_rows, w1_cols = h - 2, w - 2           # conv1 output H, W
    h2_rows, w2_cols = h1_rows - 2, w1_cols - 2
    w1_cols_p = _round_up(w1_cols, ROW_PAD)
    w2_cols_p = _round_up(w2_cols, ROW_PAD)

    compiler_params = pltpu.CompilerParams(
        dimension_semantics=("parallel",))    # megacore-shard the row grid

    # NCHW -> NHWC, bf16, pad channels to a lane multiple.
    x = jnp.transpose(x_nchw, (0, 2, 3, 1)).astype(jnp.bfloat16)
    x = jnp.pad(x, ((0, 0), (0, 0), (0, 0), (0, c_in_p - c_in)))

    # ---------------- conv1 + bn1 + relu ------------------------------------
    w1k, shift1 = _fold_conv_bn(w1, b1, g1, be1, m1, v1, c_in_p, c_mid_p)
    x3 = _replicate_rows(x, h1_rows, w1_cols_p + 2, tile_rows)
    r1, r1p = n * h1_rows, x3.shape[0]

    h1_flat = pl.pallas_call(
        functools.partial(conv_bn_relu_kernel, w_out=w1_cols_p),
        grid=(r1p // tile_rows,),
        in_specs=[
            pl.BlockSpec((tile_rows, 3, w1_cols_p + 2, c_in_p),
                         lambda i: (i, 0, 0, 0)),
            pl.BlockSpec((9 * c_in_p, c_mid_p), lambda i: (0, 0)),
            pl.BlockSpec((1, c_mid_p), lambda i: (0, 0)),
        ],
        out_specs=pl.BlockSpec((tile_rows * w1_cols_p, c_mid_p),
                               lambda i: (i, 0)),
        out_shape=jax.ShapeDtypeStruct((r1p * w1_cols_p, c_mid_p),
                                       jnp.bfloat16),
        compiler_params=compiler_params,
    )(x3, w1k, shift1)

    # Columns >= w1_cols of h1 are padding junk; they only ever feed conv2
    # output columns that are sliced away below, so no re-zeroing is needed.
    h1 = h1_flat[:r1 * w1_cols_p].reshape(n, h1_rows, w1_cols_p, c_mid_p)

    # -------- conv2 + bn2 + relu + dropout(id) + convT(k=2, s=2) ------------
    w2k, shift2 = _fold_conv_bn(w2, b2, g2, be2, m2, v2, c_mid_p, c_mid_p)
    wtk, btk = _fold_deconv(wt, bt, c_mid_p, c_out_p)
    h3 = _replicate_rows(h1, h2_rows, w2_cols_p + 2, tile_rows)
    r2, r2p = n * h2_rows, h3.shape[0]

    out_flat = pl.pallas_call(
        functools.partial(conv_bn_relu_deconv_kernel, w_out=w2_cols_p),
        grid=(r2p // tile_rows,),
        in_specs=[
            pl.BlockSpec((tile_rows, 3, w2_cols_p + 2, c_mid_p),
                         lambda i: (i, 0, 0, 0)),
            pl.BlockSpec((9 * c_mid_p, c_mid_p), lambda i: (0, 0)),
            pl.BlockSpec((1, c_mid_p), lambda i: (0, 0)),
            pl.BlockSpec((c_mid_p, 4 * c_out_p), lambda i: (0, 0)),
            pl.BlockSpec((1, 4 * c_out_p), lambda i: (0, 0)),
        ],
        out_specs=pl.BlockSpec((tile_rows * w2_cols_p, 4 * c_out_p),
                               lambda i: (i, 0)),
        out_shape=jax.ShapeDtypeStruct((r2p * w2_cols_p, 4 * c_out_p),
                                       jnp.float32),
        compiler_params=compiler_params,
    )(h3, w2k, shift2, wtk, btk)

    # De-interleave the 2x2 sub-pixel blocks, drop the lane / width padding.
    out = out_flat[:r2 * w2_cols_p].reshape(n, h2_rows, w2_cols_p,
                                            2, 2, c_out_p)
    out = out[:, :, :w2_cols, :, :, :c_out]
    out = jnp.transpose(out, (0, 1, 3, 2, 4, 5))
    out = out.reshape(n, 2 * h2_rows, 2 * w2_cols, c_out)
    return jnp.transpose(out, (0, 3, 1, 2))                    # NCHW


# ----------------------------- reference (plain JAX) ------------------------

def decoder_block_ref(x_nchw, params, eps=1e-5):
    (w1, b1, g1, be1, m1, v1,
     w2, b2, g2, be2, m2, v2,
     wt, bt) = params

    def conv(x, w, b):
        y = lax.conv_general_dilated(x, w, (1, 1), 'VALID',
                                     dimension_numbers=('NCHW', 'OIHW', 'NCHW'))
        return y + b[None, :, None, None]

    def bn(x, g, be, m, v):
        s = g / jnp.sqrt(v + eps)
        return x * s[None, :, None, None] + (be - m * s)[None, :, None, None]

    h = jax.nn.relu(bn(conv(x_nchw, w1, b1), g1, be1, m1, v1))
    h = jax.nn.relu(bn(conv(h, w2, b2), g2, be2, m2, v2))
    N, _, H2, W2 = h.shape
    Cout = wt.shape[1]
    blocks = jnp.einsum('nchw,cokl->nohkwl', h, wt)
    return blocks.reshape(N, Cout, 2 * H2, 2 * W2) + bt[None, :, None, None]


# ----------------------------- main ------------------------------------------

if __name__ == "__main__":
    N, Cin, Cm, Cout, H, W = 2, 4, 8, 4, 16, 16

    key = jax.random.PRNGKey(0)
    ks = jax.random.split(key, 16)

    w1 = jax.random.normal(ks[0], (Cm, Cin, 3, 3), jnp.float32) * 0.1
    b1 = jax.random.normal(ks[1], (Cm,), jnp.float32) * 0.1
    g1 = 0.5 + jax.random.uniform(ks[2], (Cm,), jnp.float32)
    be1 = jax.random.normal(ks[3], (Cm,), jnp.float32) * 0.1
    m1 = jax.random.normal(ks[4], (Cm,), jnp.float32) * 0.1
    v1 = 0.5 + jax.random.uniform(ks[5], (Cm,), jnp.float32)

    w2 = jax.random.normal(ks[6], (Cm, Cm, 3, 3), jnp.float32) * 0.1
    b2 = jax.random.normal(ks[7], (Cm,), jnp.float32) * 0.1
    g2 = 0.5 + jax.random.uniform(ks[8], (Cm,), jnp.float32)
    be2 = jax.random.normal(ks[9], (Cm,), jnp.float32) * 0.1
    m2 = jax.random.normal(ks[10], (Cm,), jnp.float32) * 0.1
    v2 = 0.5 + jax.random.uniform(ks[11], (Cm,), jnp.float32)

    wt = jax.random.normal(ks[12], (Cm, Cout, 2, 2), jnp.float32) * 0.1
    bt = jax.random.normal(ks[13], (Cout,), jnp.float32) * 0.1

    params = (w1, b1, g1, be1, m1, v1,
              w2, b2, g2, be2, m2, v2,
              wt, bt)

    x = jax.random.normal(ks[14], (N, Cin, H, W), jnp.float32)

    out = jax.block_until_ready(jax.jit(decoder_block)(x, params))
    ref = decoder_block_ref(x, params)

    assert out.shape == (N, Cout, 2 * (H - 4), 2 * (W - 4)), out.shape
    err = float(jnp.max(jnp.abs(out - ref)))
    # bf16 operands (f32 accumulation) -> loose tolerance vs the f32 reference.
    assert err < 5e-2, err

    print("KERNEL_OK")
</pallas_src>

<mosaic_0001>
module attributes {stable_mosaic.version = 11 : i64} {
  func.func @conv_bn_relu_kernel(%arg0: i32, %arg1: memref<8x3x18x128xbf16, #tpu.memory_space<vmem>>, %arg2: memref<1152x128xbf16, #tpu.memory_space<vmem>>, %arg3: memref<1x128xf32, #tpu.memory_space<vmem>>, %arg4: memref<128x128xbf16, #tpu.memory_space<vmem>>) attributes {dimension_semantics = [#tpu.dimension_semantics<parallel>], iteration_bounds = array<i64: 4>, scalar_prefetch = 0 : i64, scratch_operands = 0 : i64, tpu.core_type = #tpu.core_type<tc>, window_params = [{transform_indices = @transform_0, window_bounds = array<i64: 8, 3, 18, 128>}, {pipeline_mode = #tpu.pipeline_mode<synchronous>, transform_indices = @transform_1, window_bounds = array<i64: 1152, 128>}, {pipeline_mode = #tpu.pipeline_mode<synchronous>, transform_indices = @transform_2, window_bounds = array<i64: 1, 128>}, {transform_indices = @transform_3, window_bounds = array<i64: 128, 128>}]} {
    %c0 = arith.constant 0 : index
    %c0_0 = arith.constant 0 : index
    %c0_1 = arith.constant 0 : index
    %c0_2 = arith.constant 0 : index
    %0 = vector.load %arg1[%c0, %c0_0, %c0_1, %c0_2] : memref<8x3x18x128xbf16, #tpu.memory_space<vmem>>, vector<8x1x16x128xbf16>
    %1 = vector.shape_cast %0 : vector<8x1x16x128xbf16> to vector<8x16x128xbf16>
    %c0_3 = arith.constant 0 : index
    %c0_4 = arith.constant 0 : index
    %c1 = arith.constant 1 : index
    %c0_5 = arith.constant 0 : index
    %2 = vector.load %arg1[%c0_3, %c0_4, %c1, %c0_5] : memref<8x3x18x128xbf16, #tpu.memory_space<vmem>>, vector<8x1x16x128xbf16>
    %3 = vector.shape_cast %2 : vector<8x1x16x128xbf16> to vector<8x16x128xbf16>
    %c0_6 = arith.constant 0 : index
    %c0_7 = arith.constant 0 : index
    %c2 = arith.constant 2 : index
    %c0_8 = arith.constant 0 : index
    %4 = vector.load %arg1[%c0_6, %c0_7, %c2, %c0_8] : memref<8x3x18x128xbf16, #tpu.memory_space<vmem>>, vector<8x1x16x128xbf16>
    %5 = vector.shape_cast %4 : vector<8x1x16x128xbf16> to vector<8x16x128xbf16>
    %c0_9 = arith.constant 0 : index
    %c1_10 = arith.constant 1 : index
    %c0_11 = arith.constant 0 : index
    %c0_12 = arith.constant 0 : index
    %6 = vector.load %arg1[%c0_9, %c1_10, %c0_11, %c0_12] : memref<8x3x18x128xbf16, #tpu.memory_space<vmem>>, vector<8x1x16x128xbf16>
    %7 = vector.shape_cast %6 : vector<8x1x16x128xbf16> to vector<8x16x128xbf16>
    %c0_13 = arith.constant 0 : index
    %c1_14 = arith.constant 1 : index
    %c1_15 = arith.constant 1 : index
    %c0_16 = arith.constant 0 : index
    %8 = vector.load %arg1[%c0_13, %c1_14, %c1_15, %c0_16] : memref<8x3x18x128xbf16, #tpu.memory_space<vmem>>, vector<8x1x16x128xbf16>
    %9 = vector.shape_cast %8 : vector<8x1x16x128xbf16> to vector<8x16x128xbf16>
    %c0_17 = arith.constant 0 : index
    %c1_18 = arith.constant 1 : index
    %c2_19 = arith.constant 2 : index
    %c0_20 = arith.constant 0 : index
    %10 = vector.load %arg1[%c0_17, %c1_18, %c2_19, %c0_20] : memref<8x3x18x128xbf16, #tpu.memory_space<vmem>>, vector<8x1x16x128xbf16>
    %11 = vector.shape_cast %10 : vector<8x1x16x128xbf16> to vector<8x16x128xbf16>
    %c0_21 = arith.constant 0 : index
    %c2_22 = arith.constant 2 : index
    %c0_23 = arith.constant 0 : index
    %c0_24 = arith.constant 0 : index
    %12 = vector.load %arg1[%c0_21, %c2_22, %c0_23, %c0_24] : memref<8x3x18x128xbf16, #tpu.memory_space<vmem>>, vector<8x1x16x128xbf16>
    %13 = vector.shape_cast %12 : vector<8x1x16x128xbf16> to vector<8x16x128xbf16>
    %c0_25 = arith.constant 0 : index
    %c2_26 = arith.constant 2 : index
    %c1_27 = arith.constant 1 : index
    %c0_28 = arith.constant 0 : index
    %14 = vector.load %arg1[%c0_25, %c2_26, %c1_27, %c0_28] : memref<8x3x18x128xbf16, #tpu.memory_space<vmem>>, vector<8x1x16x128xbf16>
    %15 = vector.shape_cast %14 : vector<8x1x16x128xbf16> to vector<8x16x128xbf16>
    %c0_29 = arith.constant 0 : index
    %c2_30 = arith.constant 2 : index
    %c2_31 = arith.constant 2 : index
    %c0_32 = arith.constant 0 : index
    %16 = vector.load %arg1[%c0_29, %c2_30, %c2_31, %c0_32] : memref<8x3x18x128xbf16, #tpu.memory_space<vmem>>, vector<8x1x16x128xbf16>
    %17 = vector.shape_cast %16 : vector<8x1x16x128xbf16> to vector<8x16x128xbf16>
    %18 = tpu.concatenate %1, %3, %5, %7, %9, %11, %13, %15, %17 in 2 : vector<8x16x128xbf16>, vector<8x16x128xbf16>, vector<8x16x128xbf16>, vector<8x16x128xbf16>, vector<8x16x128xbf16>, vector<8x16x128xbf16>, vector<8x16x128xbf16>, vector<8x16x128xbf16>, vector<8x16x128xbf16> -> vector<8x16x1152xbf16>
    %19 = vector.shape_cast %18 : vector<8x16x1152xbf16> to vector<128x1152xbf16>
    %c0_33 = arith.constant 0 : index
    %c0_34 = arith.constant 0 : index
    %20 = vector.load %arg2[%c0_33, %c0_34] : memref<1152x128xbf16, #tpu.memory_space<vmem>>, vector<1152x128xbf16>
    %cst = arith.constant dense<0.000000e+00> : vector<128x128xf32>
    %21 = tpu.matmul %19, %20, %cst {dimension_numbers = #tpu.dot_dimension_numbers<[1], [0], [0], [1], [0, 0, 1, 1], [], []>} : vector<128x1152xbf16>, vector<1152x128xbf16>, vector<128x128xf32> -> vector<128x128xf32>
    %c0_35 = arith.constant 0 : index
    %c0_36 = arith.constant 0 : index
    %22 = vector.load %arg3[%c0_35, %c0_36] : memref<1x128xf32, #tpu.memory_space<vmem>>, vector<1x128xf32>
    %23 = vector.broadcast %22 : vector<1x128xf32> to vector<128x128xf32>
    %24 = arith.addf %21, %23 : vector<128x128xf32>
    %cst_37 = arith.constant 0.000000e+00 : f32
    %25 = vector.broadcast %cst_37 : f32 to vector<128x128xf32>
    %26 = arith.maximumf %24, %25 : vector<128x128xf32>
    %27 = arith.truncf %26 : vector<128x128xf32> to vector<128x128xbf16>
    %c0_38 = arith.constant 0 : index
    %c0_39 = arith.constant 0 : index
    %28 = vector.load %arg4[%c0_38, %c0_39] : memref<128x128xbf16, #tpu.memory_space<vmem>>, vector<128x128xbf16>
    tpu.vector_store %arg4[%c0_38, %c0_39], %27 {strides = array<i32>} : memref<128x128xbf16, #tpu.memory_space<vmem>>, vector<128x128xbf16>,
    return
  }
  func.func @transform_0(%arg0: i32) -> (i32, i32, i32, i32) {
    %c0_i32 = arith.constant 0 : i32
    %c0_i32_0 = arith.constant 0 : i32
    %c0_i32_1 = arith.constant 0 : i32
    %c0_i32_2 = arith.constant 0 : i32
    return %arg0, %c0_i32, %c0_i32_0, %c0_i32_1 : i32, i32, i32, i32
  }
  func.func @transform_1(%arg0: i32) -> (i32, i32) {
    %c0_i32 = arith.constant 0 : i32
    %c0_i32_0 = arith.constant 0 : i32
    %c0_i32_1 = arith.constant 0 : i32
    return %c0_i32, %c0_i32_0 : i32, i32
  }
  func.func @transform_2(%arg0: i32) -> (i32, i32) {
    %c0_i32 = arith.constant 0 : i32
    %c0_i32_0 = arith.constant 0 : i32
    %c0_i32_1 = arith.constant 0 : i32
    return %c0_i32, %c0_i32_0 : i32, i32
  }
  func.func @transform_3(%arg0: i32) -> (i32, i32) {
    %c0_i32 = arith.constant 0 : i32
    %c0_i32_0 = arith.constant 0 : i32
    return %arg0, %c0_i32 : i32, i32
  }
}

module attributes {stable_mosaic.version = 11 : i64} {
  func.func @conv_bn_relu_deconv_kernel(%arg0: i32, %arg1: memref<8x3x18x128xbf16, #tpu.memory_space<vmem>>, %arg2: memref<1152x128xbf16, #tpu.memory_space<vmem>>, %arg3: memref<1x128xf32, #tpu.memory_space<vmem>>, %arg4: memref<128x128xbf16, #tpu.memory_space<vmem>>, %arg5: memref<1x128xf32, #tpu.memory_space<vmem>>, %arg6: memref<128x128xf32, #tpu.memory_space<vmem>>) attributes {dimension_semantics = [#tpu.dimension_semantics<parallel>], iteration_bounds = array<i64: 3>, scalar_prefetch = 0 : i64, scratch_operands = 0 : i64, tpu.core_type = #tpu.core_type<tc>, window_params = [{transform_indices = @transform_0, window_bounds = array<i64: 8, 3, 18, 128>}, {pipeline_mode = #tpu.pipeline_mode<synchronous>, transform_indices = @transform_1, window_bounds = array<i64: 1152, 128>}, {pipeline_mode = #tpu.pipeline_mode<synchronous>, transform_indices = @transform_2, window_bounds = array<i64: 1, 128>}, {pipeline_mode = #tpu.pipeline_mode<synchronous>, transform_indices = @transform_3, window_bounds = array<i64: 128, 128>}, {pipeline_mode = #tpu.pipeline_mode<synchronous>, transform_indices = @transform_4, window_bounds = array<i64: 1, 128>}, {transform_indices = @transform_5, window_bounds = array<i64: 128, 128>}]} {
    %c0 = arith.constant 0 : index
    %c0_0 = arith.constant 0 : index
    %c0_1 = arith.constant 0 : index
    %c0_2 = arith.constant 0 : index
    %0 = vector.load %arg1[%c0, %c0_0, %c0_1, %c0_2] : memref<8x3x18x128xbf16, #tpu.memory_space<vmem>>, vector<8x1x16x128xbf16>
    %1 = vector.shape_cast %0 : vector<8x1x16x128xbf16> to vector<8x16x128xbf16>
    %c0_3 = arith.constant 0 : index
    %c0_4 = arith.constant 0 : index
    %c1 = arith.constant 1 : index
    %c0_5 = arith.constant 0 : index
    %2 = vector.load %arg1[%c0_3, %c0_4, %c1, %c0_5] : memref<8x3x18x128xbf16, #tpu.memory_space<vmem>>, vector<8x1x16x128xbf16>
    %3 = vector.shape_cast %2 : vector<8x1x16x128xbf16> to vector<8x16x128xbf16>
    %c0_6 = arith.constant 0 : index
    %c0_7 = arith.constant 0 : index
    %c2 = arith.constant 2 : index
    %c0_8 = arith.constant 0 : index
    %4 = vector.load %arg1[%c0_6, %c0_7, %c2, %c0_8] : memref<8x3x18x128xbf16, #tpu.memory_space<vmem>>, vector<8x1x16x128xbf16>
    %5 = vector.shape_cast %4 : vector<8x1x16x128xbf16> to vector<8x16x128xbf16>
    %c0_9 = arith.constant 0 : index
    %c1_10 = arith.constant 1 : index
    %c0_11 = arith.constant 0 : index
    %c0_12 = arith.constant 0 : index
    %6 = vector.load %arg1[%c0_9, %c1_10, %c0_11, %c0_12] : memref<8x3x18x128xbf16, #tpu.memory_space<vmem>>, vector<8x1x16x128xbf16>
    %7 = vector.shape_cast %6 : vector<8x1x16x128xbf16> to vector<8x16x128xbf16>
    %c0_13 = arith.constant 0 : index
    %c1_14 = arith.constant 1 : index
    %c1_15 = arith.constant 1 : index
    %c0_16 = arith.constant 0 : index
    %8 = vector.load %arg1[%c0_13, %c1_14, %c1_15, %c0_16] : memref<8x3x18x128xbf16, #tpu.memory_space<vmem>>, vector<8x1x16x128xbf16>
    %9 = vector.shape_cast %8 : vector<8x1x16x128xbf16> to vector<8x16x128xbf16>
    %c0_17 = arith.constant 0 : index
    %c1_18 = arith.constant 1 : index
    %c2_19 = arith.constant 2 : index
    %c0_20 = arith.constant 0 : index
    %10 = vector.load %arg1[%c0_17, %c1_18, %c2_19, %c0_20] : memref<8x3x18x128xbf16, #tpu.memory_space<vmem>>, vector<8x1x16x128xbf16>
    %11 = vector.shape_cast %10 : vector<8x1x16x128xbf16> to vector<8x16x128xbf16>
    %c0_21 = arith.constant 0 : index
    %c2_22 = arith.constant 2 : index
    %c0_23 = arith.constant 0 : index
    %c0_24 = arith.constant 0 : index
    %12 = vector.load %arg1[%c0_21, %c2_22, %c0_23, %c0_24] : memref<8x3x18x128xbf16, #tpu.memory_space<vmem>>, vector<8x1x16x128xbf16>
    %13 = vector.shape_cast %12 : vector<8x1x16x128xbf16> to vector<8x16x128xbf16>
    %c0_25 = arith.constant 0 : index
    %c2_26 = arith.constant 2 : index
    %c1_27 = arith.constant 1 : index
    %c0_28 = arith.constant 0 : index
    %14 = vector.load %arg1[%c0_25, %c2_26, %c1_27, %c0_28] : memref<8x3x18x128xbf16, #tpu.memory_space<vmem>>, vector<8x1x16x128xbf16>
    %15 = vector.shape_cast %14 : vector<8x1x16x128xbf16> to vector<8x16x128xbf16>
    %c0_29 = arith.constant 0 : index
    %c2_30 = arith.constant 2 : index
    %c2_31 = arith.constant 2 : index
    %c0_32 = arith.constant 0 : index
    %16 = vector.load %arg1[%c0_29, %c2_30, %c2_31, %c0_32] : memref<8x3x18x128xbf16, #tpu.memory_space<vmem>>, vector<8x1x16x128xbf16>
    %17 = vector.shape_cast %16 : vector<8x1x16x128xbf16> to vector<8x16x128xbf16>
    %18 = tpu.concatenate %1, %3, %5, %7, %9, %11, %13, %15, %17 in 2 : vector<8x16x128xbf16>, vector<8x16x128xbf16>, vector<8x16x128xbf16>, vector<8x16x128xbf16>, vector<8x16x128xbf16>, vector<8x16x128xbf16>, vector<8x16x128xbf16>, vector<8x16x128xbf16>, vector<8x16x128xbf16> -> vector<8x16x1152xbf16>
    %19 = vector.shape_cast %18 : vector<8x16x1152xbf16> to vector<128x1152xbf16>
    %c0_33 = arith.constant 0 : index
    %c0_34 = arith.constant 0 : index
    %20 = vector.load %arg2[%c0_33, %c0_34] : memref<1152x128xbf16, #tpu.memory_space<vmem>>, vector<1152x128xbf16>
    %cst = arith.constant dense<0.000000e+00> : vector<128x128xf32>
    %21 = tpu.matmul %19, %20, %cst {dimension_numbers = #tpu.dot_dimension_numbers<[1], [0], [0], [1], [0, 0, 1, 1], [], []>} : vector<128x1152xbf16>, vector<1152x128xbf16>, vector<128x128xf32> -> vector<128x128xf32>
    %c0_35 = arith.constant 0 : index
    %c0_36 = arith.constant 0 : index
    %22 = vector.load %arg3[%c0_35, %c0_36] : memref<1x128xf32, #tpu.memory_space<vmem>>, vector<1x128xf32>
    %23 = vector.broadcast %22 : vector<1x128xf32> to vector<128x128xf32>
    %24 = arith.addf %21, %23 : vector<128x128xf32>
    %cst_37 = arith.constant 0.000000e+00 : f32
    %25 = vector.broadcast %cst_37 : f32 to vector<128x128xf32>
    %26 = arith.maximumf %24, %25 : vector<128x128xf32>
    %27 = arith.truncf %26 : vector<128x128xf32> to vector<128x128xbf16>
    %c0_38 = arith.constant 0 : index
    %c0_39 = arith.constant 0 : index
    %28 = vector.load %arg4[%c0_38, %c0_39] : memref<128x128xbf16, #tpu.memory_space<vmem>>, vector<128x128xbf16>
    %cst_40 = arith.constant dense<0.000000e+00> : vector<128x128xf32>
    %29 = tpu.matmul %27, %28, %cst_40 {dimension_numbers = #tpu.dot_dimension_numbers<[1], [0], [0], [1], [0, 0, 1, 1], [], []>} : vector<128x128xbf16>, vector<128x128xbf16>, vector<128x128xf32> -> vector<128x128xf32>
    %c0_41 = arith.constant 0 : index
    %c0_42 = arith.constant 0 : index
    %30 = vector.load %arg5[%c0_41, %c0_42] : memref<1x128xf32, #tpu.memory_space<vmem>>, vector<1x128xf32>
    %31 = vector.broadcast %30 : vector<1x128xf32> to vector<128x128xf32>
    %32 = arith.addf %29, %31 : vector<128x128xf32>
    %c0_43 = arith.constant 0 : index
    %c0_44 = arith.constant 0 : index
    %33 = vector.load %arg6[%c0_43, %c0_44] : memref<128x128xf32, #tpu.memory_space<vmem>>, vector<128x128xf32>
    tpu.vector_store %arg6[%c0_43, %c0_44], %32 {strides = array<i32>} : memref<128x128xf32, #tpu.memory_space<vmem>>, vector<128x128xf32>,
    return
  }
  func.func @transform_0(%arg0: i32) -> (i32, i32, i32, i32) {
    %c0_i32 = arith.constant 0 : i32
    %c0_i32_0 = arith.constant 0 : i32
    %c0_i32_1 = arith.constant 0 : i32
    %c0_i32_2 = arith.constant 0 : i32
    return %arg0, %c0_i32, %c0_i32_0, %c0_i32_1 : i32, i32, i32, i32
  }
  func.func @transform_1(%arg0: i32) -> (i32, i32) {
    %c0_i32 = arith.constant 0 : i32
    %c0_i32_0 = arith.constant 0 : i32
    %c0_i32_1 = arith.constant 0 : i32
    return %c0_i32, %c0_i32_0 : i32, i32
  }
  func.func @transform_2(%arg0: i32) -> (i32, i32) {
    %c0_i32 = arith.constant 0 : i32
    %c0_i32_0 = arith.constant 0 : i32
    %c0_i32_1 = arith.constant 0 : i32
    return %c0_i32, %c0_i32_0 : i32, i32
  }
  func.func @transform_3(%arg0: i32) -> (i32, i32) {
    %c0_i32 = arith.constant 0 : i32
    %c0_i32_0 = arith.constant 0 : i32
    %c0_i32_1 = arith.constant 0 : i32
    return %c0_i32, %c0_i32_0 : i32, i32
  }
  func.func @transform_4(%arg0: i32) -> (i32, i32) {
    %c0_i32 = arith.constant 0 : i32
    %c0_i32_0 = arith.constant 0 : i32
    %c0_i32_1 = arith.constant 0 : i32
    return %c0_i32, %c0_i32_0 : i32, i32
  }
  func.func @transform_5(%arg0: i32) -> (i32, i32) {
    %c0_i32 = arith.constant 0 : i32
    %c0_i32_0 = arith.constant 0 : i32
    return %arg0, %c0_i32 : i32, i32
  }
}

</mosaic_0001>

<bundles_post_ra>
// kernel: tile.8
= control target key start
LH: loop header
LB: loop body
LE: loop exit
PB: predicated region body
PF: predicated region fallthrough
CT: control target
= control target key end

     0   :  { %s22_s0 = inlined_call_operand.vmem [shape: f32[32], index: 0, kind: input, shape index: {}]   ;;  %s23_s1 = inlined_call_operand.vmem [shape: f32[4,32], index: 1, kind: output, shape index: {}]  }
   0x1   :  { %v4_v0 = vld [vmem:[%s22_s0] ss:$0 sm:$0xff] }
   0x2   :  { %5 = vst [vmem:[%s23_s1] sm:$0xf] %v4_v0 }

// kernel: tile.9
= control target key start
LH: loop header
LB: loop body
LE: loop exit
PB: predicated region body
PF: predicated region fallthrough
CT: control target
= control target key end

     0   :  { %vm7_vm0 = vcmask 261120   ;;  %s37_s8 = smov 32   ;;  %s38_s9 = smov 64   ;;  %vm13_vm1 = vcmask 1048320   ;;  %vm19_vm2 = vcmask 785920   ;;  %vm25_vm3 = vcmask 523520   ;;  %s55_s0 = inlined_call_operand.vmem [shape: f32[4,32], index: 0, kind: input, shape index: {}]   ;;  %s56_s1 = inlined_call_operand.vmem [shape: f32[1,128], index: 1, kind: output, shape index: {}]  }
   0x1   :  { %v4_v0 = vld [vmem:[%s55_s0] sm:$0xf]  ;;  %s36_s0 = smov 96  }
   0x2   :  { %5 = vst [vmem:[#allocation1] sm:$0xf] %v4_v0 }
   0x9   :  { %v10_v1 = vld [vmem:[#allocation1 + $0x3] sm:$0x1]   ;;  %v22_v2 = vld [vmem:[#allocation1 + $0x1] sm:$0x1]   ;;  %v6_v3 = vld [vmem:[#allocation1] sm:$0x1]  }
   0xa   :  { %11 = vrot.lane.b32.xlu0 %v10_v1, %s36_s0  ;;  %23 = vrot.lane.b32.xlu1 %v22_v2, %s37_s8  ;;  %v16_v4 = vld [vmem:[#allocation1 + $0x2] sm:$0x1]   ;;  %8 = vst.msk [vmem:[#allocation0] sm:$0x1] %vm7_vm0, %v6_v3  }
   0xe   :  { %17 = vrot.lane.b32.xlu0 %v16_v4, %s38_s9 }
  0x7c   :  { %v12_v5 = vpop.permute.xlu0 %11   ;;  %v24_v6 = vpop.permute.xlu1 %23  }
  0x7d   :  { %14 = vst.msk [vmem:[#allocation0] sm:$0x1] %vm13_vm1, %v12_v5  }
  0x80   :  { %v18_v7 = vpop.permute.xlu0 %17  }
  0x81   :  { %20 = vst.msk [vmem:[#allocation0] sm:$0x1] %vm19_vm2, %v18_v7  }
  0x82   :  { %26 = vst.msk [vmem:[#allocation0] sm:$0x1] %vm25_vm3, %v24_v6  }
  0x89   :  { %v30_v8 = vld [vmem:[#allocation0] sm:$0x1] }
  0x8a   :  { %32 = vst [vmem:[%s56_s1] sm:$0x1] %v30_v8 }

// kernel: decoder_block.2
= control target key start
LH: loop header
LB: loop body
LE: loop exit
PB: predicated region body
PF: predicated region fallthrough
CT: control target
= control target key end

     0   :  { %s2994_s12 = smov 0   ;;  %s3660_s0 = inlined_call_operand.vmem [shape: bf16[32,3,18,128], index: 0, kind: input, shape index: {}]   ;;  %s3661_s1 = inlined_call_operand.vmem [shape: bf16[1152,128], index: 1, kind: input, shape index: {}]   ;;  %s3662_s2 = inlined_call_operand.vmem [shape: f32[1,128], index: 2, kind: input, shape index: {}]   ;;  %s3663_s3 = inlined_call_operand.vmem [shape: bf16[512,128], index: 3, kind: output, shape index: {}]  }
   0x1 LB: > { %s2194_s13 = sadd.s32 4294967295, %s2972_s12   ;;  %p2198_p0 = scmp.ge.s32.totalorder %s2972_s12, 1  ;;  %s2972_s12 = sphi %s2994_s12, %s13_s12  }
   0x2   : > { %p139_p1 = scmp.lt.s32.totalorder %s2972_s12, 5 }
   0x4   : > { %p140_p2 = pnand %p2198_p0, %p139_p1 }
   0x5   : > { %v2822_v0 = vld [vmem:[%s3661_s1 + $0x40] sm:$0xff] (!%p140_p2)   ;;  %v2826_v4 = vld [vmem:[%s3661_s1 + $0x48] sm:$0xff] (!%p140_p2)   ;;  %v2830_v8 = vld [vmem:[%s3661_s1 + $0x50] sm:$0xff] (!%p140_p2)   ;;  %s2199_s19 = sshll.u32 (!%p140_p2), %s2194_s13, 3  ;;  %vm477_vm0 = vcmask (!%p140_p2), 1046528  }
   0x6   : > { %143 = sbr.rel (%p140_p2) target bundleno = 398 (0x18e), region = 32  ;;  %v2823_v1 = vld [vmem:[%s3661_s1 + $0xc0] sm:$0xff] (!%p140_p2)   ;;  %2493 = vmatprep.subr.bf16.mxu0 (!%p140_p2), %v2822_v0  ;;  %v2827_v5 = vld [vmem:[%s3661_s1 + $0xc8] sm:$0xff] (!%p140_p2)   ;;  %v2831_v9 = vld [vmem:[%s3661_s1 + $0xd0] sm:$0xff] (!%p140_p2)   ;;  %p165_p3 = scmp.lt.s32.totalorder (!%p140_p2), %s2199_s19, 31 }
   0x7   : > { %v2824_v2 = vld [vmem:[%s3661_s1] sm:$0xff] (!%p140_p2)   ;;  %2557 = vmatprep.subr.bf16.mxu1 (!%p140_p2), %v2823_v1  ;;  %v2828_v6 = vld [vmem:[%s3661_s1 + $0x8] sm:$0xff] (!%p140_p2)   ;;  %v2832_v10 = vld [vmem:[%s3661_s1 + $0x10] sm:$0xff] (!%p140_p2)   ;;  %vm348_vm1 = vsmask.f32 (!%p140_p2), 7424 }
   0x8   : > { %v2825_v3 = vld [vmem:[%s3661_s1 + $0x80] sm:$0xff] (!%p140_p2)   ;;  %2494 = vmatpush3.bf16.msra.mxu0 (!%p140_p2), %v2824_v2  ;;  %v2829_v7 = vld [vmem:[%s3661_s1 + $0x88] sm:$0xff] (!%p140_p2)   ;;  %v2833_v11 = vld [vmem:[%s3661_s1 + $0x90] sm:$0xff] (!%p140_p2)  }
   0x9   : > { %2558 = vmatpush3.bf16.msra.mxu1 (!%p140_p2), %v2825_v3  ;;  %2495 = vmatprep.subr.bf16.mxu0 (!%p140_p2), %v2826_v4  ;;  %v2834_v12 = vld [vmem:[%s3661_s1 + $0x58] sm:$0xff] (!%p140_p2)   ;;  %v2838_v16 = vld [vmem:[%s3661_s1 + $0x60] sm:$0xff] (!%p140_p2)   ;;  %v2842_v20 = vld [vmem:[%s3661_s1 + $0x68] sm:$0xff] (!%p140_p2)  }
   0xa   : > { %2559 = vmatprep.subr.bf16.mxu1 (!%p140_p2), %v2827_v5  ;;  %v2835_v13 = vld [vmem:[%s3661_s1 + $0xd8] sm:$0xff] (!%p140_p2)   ;;  %v2839_v17 = vld [vmem:[%s3661_s1 + $0xe0] sm:$0xff] (!%p140_p2)   ;;  %v2843_v21 = vld [vmem:[%s3661_s1 + $0xe8] sm:$0xff] (!%p140_p2)  }
   0xb   : > { %v2836_v14 = vld [vmem:[%s3661_s1 + $0x18] sm:$0xff] (!%p140_p2)   ;;  %v2840_v18 = vld [vmem:[%s3661_s1 + $0x20] sm:$0xff] (!%p140_p2)   ;;  %v2844_v22 = vld [vmem:[%s3661_s1 + $0x28] sm:$0xff] (!%p140_p2)  }
   0xc   : > { %2496 = vmatpush3.bf16.msra.mxu0 (!%p140_p2), %v2828_v6  ;;  %v2837_v15 = vld [vmem:[%s3661_s1 + $0x98] sm:$0xff] (!%p140_p2)   ;;  %v2841_v19 = vld [vmem:[%s3661_s1 + $0xa0] sm:$0xff] (!%p140_p2)   ;;  %v2845_v23 = vld [vmem:[%s3661_s1 + $0xa8] sm:$0xff] (!%p140_p2)  }
   0xd   : > { %2560 = vmatpush3.bf16.msra.mxu1 %v2829_v7  ;;  %2497 = vmatprep.subr.bf16.mxu0 %v2830_v8  ;;  %s3665_s19 = smov (!%p165_p3, %s2199_s19), 31  ;;  %v2846_v24 = vld [vmem:[%s3661_s1 + $0x70] sm:$0xff]   ;;  %v2850_v28 = vld [vmem:[%s3661_s1 + $0x78] sm:$0xff]   ;;  %v2859_v36 = vld [vmem:[%s3661_s1 + $0x140] sm:$0xff]  }
   0xe   : > { %2561 = vmatprep.subr.bf16.mxu1 %v2831_v9  ;;  %v2847_v25 = vld [vmem:[%s3661_s1 + $0xf0] sm:$0xff]   ;;  %s2813_s17 = smul.u32 36, %s3665_s19  ;;  %v2851_v29 = vld [vmem:[%s3661_s1 + $0xf8] sm:$0xff]   ;;  %v2860_v44 = vld [vmem:[%s3661_s1 + $0x1c0] sm:$0xff]  }
   0xf   : > { %v2848_v26 = vld [vmem:[%s3661_s1 + $0x30] sm:$0xff]   ;;  %v2852_v30 = vld [vmem:[%s3661_s1 + $0x38] sm:$0xff]   ;;  %v2861_v50 = vld [vmem:[%s3661_s1 + $0x100] sm:$0xff]  }
  0x10   : > { %2498 = vmatpush3.bf16.msra.mxu0 %v2832_v10  ;;  %v2849_v27 = vld [vmem:[%s3661_s1 + $0xb0] sm:$0xff]   ;;  %s3097_s28 = scalar_lea.vmem %s3660_s0, %s2813_s17  ;;  %v2853_v31 = vld [vmem:[%s3661_s1 + $0xb8] sm:$0xff]   ;;  %v2862_v51 = vld [vmem:[%s3661_s1 + $0x180] sm:$0xff]   ;;  %s2201_s17 = sshll.u32 %s2194_s13, 4 }
  0x11   : > { %2562 = vmatpush3.bf16.msra.mxu1 %v2833_v11  ;;  %2499 = vmatprep.subr.bf16.mxu0 %v2834_v12  ;;  %v178_v32 = vld [vmem:[%s3097_s28] sm:$0xf]  ;;  %v179_v33 = vld [vmem:[%s3097_s28 + $0x4] sm:$0xf]  ;;  %v2203_v37 = vld [vmem:[%s3097_s28 + $0xc] sm:$0xf] }
  0x12   : > { %2563 = vmatprep.subr.bf16.mxu1 %v2835_v13  ;;  %v2267_v34 = vcombine.low %v178_v32, %v179_v33  ;;  %v2855_v35 = vld [vmem:[%s3097_s28 + $0x8] ss:$0 sps:$4 sm:$0x11]   ;;  %v3113_v38 = vld [vmem:[%s3097_s28 + $0x10] sm:$0xf]  ;;  %p172_p4 = scmp.lt.s32.totalorder %s2201_s17, 63 }
  0x13   : > { %v357_v41 = vshll.u32 %v2855_v35, 16  ;;  %v3116_v42 = vcombine.low %v2203_v37, %v3113_v38  ;;  %v202_v43 = vld [vmem:[%s3097_s28] sm:$0xe]  ;;  %v479_v46 = vrot.slane %v2855_v35, 1  ;;  %v2868_v53 = vld [vmem:[%s3661_s1 + $0x148] sm:$0xff]   ;;  %v2877_v10 = vld [vmem:[%s3661_s1 + $0x150] sm:$0xff]  }
  0x14   : > { %2500 = vmatpush3.bf16.msra.mxu0 %v2836_v14  ;;  %v350_v39 = vshrl.u32 %v2267_v34, 16  ;;  %v352_v40 = vshll.u32 %v2267_v34, 16  ;;  %v2283_v45 = vcombine.low %v202_v43, %v179_v33  ;;  %v180_v55 = vld [vmem:[%s3097_s28 + $0x24] sm:$0xf]  ;;  %v181_v56 = vld [vmem:[%s3097_s28 + $0x28] sm:$0xf] }
  0x15   : > { %2564 = vmatpush3.bf16.msra.mxu1 %v2837_v15  ;;  %2501 = vmatprep.subr.bf16.mxu0 %v2838_v16  ;;  %v359_v48 = vrot.slane %v357_v41, 1  ;;  %v2268_v58 = vcombine.low %v180_v55, %v181_v56  ;;  %v2864_v59 = vld [vmem:[%s3097_s28 + $0x2c] ss:$0 sps:$4 sm:$0x11]   ;;  %v2205_v61 = vld [vmem:[%s3097_s28 + $0x30] sm:$0xf] }
  0x16   : > { %2565 = vmatprep.subr.bf16.mxu1 %v2839_v17  ;;  %v354_v47 = vrot.slane %v352_v40, 1  ;;  %1686 = vmatprep.mubr.bf16.mxu1 %v3116_v42  ;;  %v478_v49 = vrot.slane %v2283_v45, 1  ;;  %v2869_v60 = vld [vmem:[%s3661_s1 + $0x1c8] sm:$0xff]   ;;  %v3142_v62 = vld [vmem:[%s3097_s28 + $0x34] sm:$0xf]  ;;  %v369_v1 = vshll.u32 %v2864_v59, 16 }
  0x17   : > { %v362_v63 = vshrl.u32 %v2268_v58, 16  ;;  %v364_v0 = vshll.u32 %v2268_v58, 16  ;;  %v3145_v2 = vcombine.low %v2205_v61, %v3142_v62  ;;  %v203_v3 = vld [vmem:[%s3097_s28 + $0x24] sm:$0xe]  ;;  %v2870_v4 = vld [vmem:[%s3661_s1 + $0x108] sm:$0xff]   ;;  %v482_v6 = vrot.slane %v2864_v59, 1 }
  0x18   : > { %2502 = vmatpush3.bf16.msra.mxu0 %v2840_v18  ;;  %v355_v52 = vor.u32 %v354_v47, %v350_v39  ;;  %v480_v54 = vsel %vm477_vm0, %v478_v49, %v479_v46  ;;  %v2284_v5 = vcombine.low %v203_v3, %v181_v56  ;;  %v2871_v7 = vld [vmem:[%s3661_s1 + $0x188] sm:$0xff]   ;;  %v371_v9 = vrot.slane %v369_v1, 1  ;;  %v2878_v12 = vld [vmem:[%s3661_s1 + $0x1d0] sm:$0xff]   ;;  %v2209_v43 = vld [vmem:[%s3097_s28 + $0x78] sm:$0xf]  ;;  %s3667_s17 = smov (!%p172_p4, %s2201_s17), 63 }
  0x19   : > { %2566 = vmatpush3.bf16.msra.mxu1 %v2841_v19  ;;  %2503 = vmatprep.subr.bf16.mxu0 %v2842_v20  ;;  %v366_v8 = vrot.slane %v364_v0, 1  ;;  %v182_v15 = vld [vmem:[%s3097_s28 + $0x48] sm:$0xf]  ;;  %v183_v16 = vld [vmem:[%s3097_s28 + $0x4c] sm:$0xf]  ;;  %s2202_s13 = sshll.u32 %s3667_s17, 2 }
  0x1a   : > { %2567 = vmatprep.subr.bf16.mxu1 %v2843_v21  ;;  %v360_v57 = vsel %vm348_vm1, %v355_v52, %v359_v48  ;;  %v481_v11 = vrot.slane %v2284_v5, 1  ;;  %v2269_v18 = vcombine.low %v182_v15, %v183_v16  ;;  %v2873_v19 = vld [vmem:[%s3097_s28 + $0x50] ss:$0 sps:$4 sm:$0x11]   ;;  %v2207_v20 = vld [vmem:[%s3097_s28 + $0x54] sm:$0xf]  ;;  %s3642_s21 = scalar_lea.vmem %s3663_s3, %s2202_s13 }
  0x1b   : > { %1589 = vmatprep.mubr.bf16.mxu0 %v360_v57  ;;  %v367_v13 = vor.u32 %v366_v8, %v362_v63  ;;  %v2879_v21 = vld [vmem:[%s3661_s1 + $0x110] sm:$0xff]   ;;  %v184_v39 = vld [vmem:[%s3097_s28 + $0x6c] sm:$0xf]  ;;  %v3197_v47 = vld [vmem:[%s3097_s28 + $0x7c] sm:$0xf] }
  0x1c   : > { %2504 = vmatpush3.bf16.msra.mxu0 %v2844_v22  ;;  %v483_v14 = vsel %vm477_vm0, %v481_v11, %v482_v6  ;;  %v3171_v22 = vld [vmem:[%s3097_s28 + $0x58] sm:$0xf]  ;;  %v185_v41 = vld [vmem:[%s3097_s28 + $0x70] sm:$0xf]  ;;  %v3203_v49 = vcombine.low %v2209_v43, %v3197_v47  ;;  %v187_v0 = vld [vmem:[%s3097_s28 + $0x94] sm:$0xf] }
  0x1d   : > { %2568 = vmatpush3.bf16.msra.mxu1 %v2845_v23  ;;  %2505 = vmatprep.subr.bf16.mxu0 %v2846_v24  ;;  %v372_v17 = vsel %vm348_vm1, %v367_v13, %v371_v9  ;;  %v204_v23 = vld [vmem:[%s3097_s28 + $0x48] sm:$0xe]  ;;  %v374_v24 = vshrl.u32 %v2269_v18, 16  ;;  %v2270_v45 = vcombine.low %v184_v39, %v185_v41  ;;  %v2882_v46 = vld [vmem:[%s3097_s28 + $0x74] ss:$0 sps:$4 sm:$0x11]  }
  0x1e   : > { %2569 = vmatprep.subr.bf16.mxu1 %v2847_v25  ;;  %v376_v25 = vshll.u32 %v2269_v18, 16  ;;  %v2889_v48 = vld [vmem:[%s3661_s1 + $0x198] sm:$0xff]   ;;  %v488_v56 = vrot.slane %v2882_v46, 1  ;;  %v186_v63 = vld [vmem:[%s3097_s28 + $0x90] sm:$0xf]  ;;  %v2897_v6 = vld [vmem:[%s3661_s1 + $0x120] sm:$0xff]  }
  0x1f   : > { %v388_v52 = vshll.u32 %v2270_v45, 16  ;;  %v2271_v3 = vcombine.low %v186_v63, %v187_v0  ;;  %v2211_v5 = vld [vmem:[%s3097_s28 + $0x9c] sm:$0xf]  ;;  %v3223_v8 = vld [vmem:[%s3097_s28 + $0xa0] sm:$0xf] }
  0x20   : > { %2506 = vmatpush3.bf16.msra.mxu0 %v2848_v26  ;;  %v381_v26 = vshll.u32 %v2873_v19, 16  ;;  %v378_v32 = vrot.slane %v376_v25, 1  ;;  %v206_v9 = vld [vmem:[%s3097_s28 + $0x90] sm:$0xe]  ;;  %v3227_v13 = vcombine.low %v2211_v5, %v3223_v8  ;;  %v188_v25 = vld [vmem:[%s3097_s28 + $0xb4] sm:$0xf] }
  0x21   : > { %2570 = vmatpush3.bf16.msra.mxu1 %v2849_v27  ;;  %2507 = vmatprep.subr.bf16.mxu0 %v2850_v28  ;;  %v3175_v27 = vcombine.low %v2207_v20, %v3171_v22  ;;  %v2880_v28 = vld [vmem:[%s3661_s1 + $0x190] sm:$0xff]   ;;  %v390_v57 = vrot.slane %v388_v52, 1  ;;  %v400_v11 = vshll.u32 %v2271_v3, 16  ;;  %v2287_v15 = vcombine.low %v206_v9, %v187_v0  ;;  %v2905_v20 = vld [vmem:[%s3661_s1 + $0x1e8] sm:$0xff]   ;;  %v190_v52 = vld [vmem:[%s3097_s28 + $0xd8] sm:$0xf] }
  0x22   : > { %2571 = vmatprep.subr.bf16.mxu1 %v2851_v29  ;;  %v2285_v29 = vcombine.low %v204_v23, %v183_v16  ;;  %v383_v33 = vrot.slane %v381_v26, 1  ;;  %v379_v37 = vor.u32 %v378_v32, %v374_v24  ;;  %v2906_v23 = vld [vmem:[%s3661_s1 + $0x128] sm:$0xff]   ;;  %v2900_v32 = vld [vmem:[%s3097_s28 + $0xbc] ss:$0 sps:$4 sm:$0x11]  }
  0x24   : > { %2508 = vmatpush3.bf16.msra.mxu0 %v2852_v30  ;;  %v485_v30 = vrot.slane %v2873_v19, 1  ;;  %v484_v35 = vrot.slane %v2285_v29, 1  ;;  %v2213_v29 = vld [vmem:[%s3097_s28 + $0xc0] sm:$0xf] }
  0x25   : > { %2572 = vmatpush3.bf16.msra.mxu1 %v2853_v31  ;;  %2621 = vmatprep.subr.bf16.mxu0 %v2859_v36  ;;  %v2886_v31 = vld [vmem:[%s3661_s1 + $0x158] sm:$0xff]  }
  0x26   : > { %2685 = vmatprep.subr.bf16.mxu1 %v2860_v44  ;;  %v2888_v36 = vld [vmem:[%s3661_s1 + $0x118] sm:$0xff]   ;;  %v486_v40 = vsel %vm477_vm0, %v484_v35, %v485_v30  ;;  %v384_v44 = vsel %vm348_vm1, %v379_v37, %v383_v33  ;;  %v3249_v33 = vld [vmem:[%s3097_s28 + $0xc4] sm:$0xf] }
  0x27   : > { %1590 = vmatmul.mubr.bf16.vlgmr.msra.gmra.mrb[0].mxu0 %v2267_v34  ;;  %v2887_v34 = vld [vmem:[%s3661_s1 + $0x1d8] sm:$0xff]   ;;  %v3255_v35 = vcombine.low %v2213_v29, %v3249_v33 }
  0x28   : > { %1687 = vmatmul.mubr.bf16.vlgmr.msra.gmra.mrb[0].mxu1 %v480_v54  ;;  %2622 = vmatpush3.bf16.msra.mxu0 %v2861_v50  ;;  %v205_v50 = vld [vmem:[%s3097_s28 + $0x6c] sm:$0xe]  ;;  %v2895_v54 = vld [vmem:[%s3661_s1 + $0x160] sm:$0xff]  }
  0x29   : > { %2686 = vmatpush3.bf16.msra.mxu1 %v2862_v51  ;;  %1694 = vmatprep.mubr.bf16.mxu1 %v3145_v2  ;;  %v386_v51 = vshrl.u32 %v2270_v45, 16  ;;  %v2286_v55 = vcombine.low %v205_v50, %v185_v41  ;;  %v2913_v41 = vld [vmem:[%s3661_s1 + $0x170] sm:$0xff]  }
  0x2a   : > { %2687 = vmatprep.subr.bf16.mxu1 %v2869_v60  ;;  %2623 = vmatprep.subr.bf16.mxu0 %v2868_v53  ;;  %v393_v53 = vshll.u32 %v2882_v46, 16  ;;  %v2896_v60 = vld [vmem:[%s3661_s1 + $0x1e0] sm:$0xff]   ;;  %v2914_v50 = vld [vmem:[%s3661_s1 + $0x1f0] sm:$0xff]  }
  0x2b   : > { %1597 = vmatprep.mubr.bf16.mxu0 %v372_v17  ;;  %v487_v59 = vrot.slane %v2286_v55, 1  ;;  %v391_v61 = vor.u32 %v390_v57, %v386_v51  ;;  %v2904_v17 = vld [vmem:[%s3661_s1 + $0x168] sm:$0xff]   ;;  %v2215_v57 = vld [vmem:[%s3097_s28 + $0xe4] sm:$0xf] }
  0x2c   : > { %2624 = vmatpush3.bf16.msra.mxu0 %v2870_v4  ;;  %v2891_v4 = vld [vmem:[%s3097_s28 + $0x98] ss:$0 sps:$4 sm:$0x11]  }
  0x2d   : > { %2688 = vmatpush3.bf16.msra.mxu1 %v2871_v7  ;;  %2625 = vmatprep.subr.bf16.mxu0 %v2877_v10  ;;  %v489_v1 = vsel %vm477_vm0, %v487_v59, %v488_v56  ;;  %v398_v10 = vshrl.u32 %v2271_v3, 16  ;;  %v491_v16 = vrot.slane %v2891_v4, 1  ;;  %v2909_v56 = vld [vmem:[%s3097_s28 + $0xe0] ss:$0 sps:$4 sm:$0x11]  }
  0x2e   : > { %2689 = vmatprep.subr.bf16.mxu1 %v2878_v12  ;;  %v405_v12 = vshll.u32 %v2891_v4, 16  ;;  %v2916_v4 = vld [vmem:[%s3661_s1 + $0x1b0] sm:$0xff]  }
  0x2f   : > { %1598 = vmatmul.mubr.bf16.gmra.mrb[4].mxu0 %v2268_v58  ;;  %v395_v58 = vrot.slane %v393_v53, 1  ;;  %v191_v53 = vld [vmem:[%s3097_s28 + $0xdc] sm:$0xf] }
  0x30   : > { %1695 = vmatmul.mubr.bf16.gmra.mrb[4].mxu1 %v483_v14  ;;  %2626 = vmatpush3.bf16.msra.mxu0 %v2879_v21  ;;  %v2898_v14 = vld [vmem:[%s3661_s1 + $0x1a0] sm:$0xff]   ;;  %v407_v19 = vrot.slane %v405_v12, 1  ;;  %v490_v21 = vrot.slane %v2287_v15, 1  ;;  %v2273_v55 = vcombine.low %v190_v52, %v191_v53  ;;  %v2227_v12 = vld [vmem:[%s3097_s28 + $0xc] sm:$0xe]  ;;  %v2924_v15 = vld [vmem:[%s3661_s1 + $0x138] sm:$0xff]  }
  0x31   : > { %1702 = vmatprep.mubr.bf16.mxu1 %v3175_v27  ;;  %2690 = vmatpush3.bf16.msra.mxu1 %v2880_v28  ;;  %v396_v7 = vsel %vm348_vm1, %v391_v61, %v395_v58  ;;  %v189_v28 = vld [vmem:[%s3097_s28 + $0xb8] sm:$0xf]  ;;  %v2915_v58 = vld [vmem:[%s3661_s1 + $0x130] sm:$0xff]  }
  0x32   : > { %2627 = vmatprep.subr.bf16.mxu0 %v2886_v31  ;;  %2691 = vmatprep.subr.bf16.mxu1 %v2887_v34  ;;  %v492_v26 = vsel %vm477_vm0, %v490_v21, %v491_v16  ;;  %v2272_v31 = vcombine.low %v188_v25, %v189_v28  ;;  %v2907_v34 = vld [vmem:[%s3661_s1 + $0x1a8] sm:$0xff]   ;;  %v208_v61 = vld [vmem:[%s3097_s28 + $0xd8] sm:$0xe]  ;;  %v422_v63 = vshrl.u32 %v2273_v55, 16  ;;  %v424_v0 = vshll.u32 %v2273_v55, 16 }
  0x33   : > { %1605 = vmatprep.mubr.bf16.mxu0 %v384_v44  ;;  %v494_v44 = vrot.slane %v2900_v32, 1  ;;  %v2289_v5 = vcombine.low %v208_v61, %v191_v53  ;;  %v3302_v25 = vld [vmem:[%s3097_s28 + $0x10c] sm:$0xf]  ;;  %v2235_v52 = vld [vmem:[%s3097_s28 + $0x18] sm:$0xf] }
  0x34   : > { %2628 = vmatpush3.bf16.msra.mxu0 %v2888_v36  ;;  %v207_v36 = vld [vmem:[%s3097_s28 + $0xb4] sm:$0xe]  ;;  %v410_v37 = vshrl.u32 %v2272_v31, 16  ;;  %v412_v39 = vshll.u32 %v2272_v31, 16  ;;  %v426_v9 = vrot.slane %v424_v0, 1 }
  0x35   : > { %2692 = vmatpush3.bf16.msra.mxu1 %v2889_v48  ;;  %2629 = vmatprep.subr.bf16.mxu0 %v2895_v54  ;;  %v2288_v43 = vcombine.low %v207_v36, %v189_v28  ;;  %v585_v28 = vshll.u32 %v3116_v42, 16  ;;  %v3327_v53 = vld [vmem:[%s3097_s28 + $0x1c] sm:$0xf] }
  0x36   : > { %2693 = vmatprep.subr.bf16.mxu1 %v2896_v60  ;;  %v3275_v60 = vld [vmem:[%s3097_s28 + $0xe8] sm:$0xf]  ;;  %v427_v16 = vor.u32 %v426_v9, %v422_v63  ;;  %v2229_v9 = vld [vmem:[%s3097_s28 + $0x54] sm:$0xe] }
  0x37   : > { %1606 = vmatmul.mubr.bf16.gmra.mrb[8].mxu0 %v2269_v18  ;;  %v402_v18 = vrot.slane %v400_v11, 1  ;;  %v493_v48 = vrot.slane %v2288_v43, 1  ;;  %v2923_v11 = vld [vmem:[%s3661_s1 + $0x1f8] sm:$0xff]  }
  0x38   : > { %1703 = vmatmul.mubr.bf16.gmra.mrb[8].mxu1 %v486_v40  ;;  %1613 = vmatprep.mubr.bf16.mxu0 %v396_v7  ;;  %v417_v40 = vshll.u32 %v2900_v32, 16  ;;  %v2922_v7 = vld [vmem:[%s3661_s1 + $0x178] sm:$0xff]  }
  0x39   : > { %1710 = vmatprep.mubr.bf16.mxu1 %v3203_v49  ;;  %2630 = vmatpush3.bf16.msra.mxu0 %v2897_v6  ;;  %v403_v24 = vor.u32 %v402_v18, %v398_v10  ;;  %v495_v54 = vsel %vm477_vm0, %v493_v48, %v494_v44  ;;  %v497_v6 = vrot.slane %v2909_v56, 1 }
  0x3a   : > { %2694 = vmatpush3.bf16.msra.mxu1 %v2898_v14  ;;  %2631 = vmatprep.subr.bf16.mxu0 %v2904_v17  ;;  %v419_v46 = vrot.slane %v417_v40, 1  ;;  %v496_v14 = vrot.slane %v2289_v5, 1  ;;  %v192_v17 = vld [vmem:[%s3097_s28 + $0xfc] sm:$0xf]  ;;  %v597_v5 = vshll.u32 %v3145_v2, 16 }
  0x3b   : > { %2695 = vmatprep.subr.bf16.mxu1 %v2905_v20  ;;  %v408_v30 = vsel %vm348_vm1, %v403_v24, %v407_v19  ;;  %v193_v19 = vld [vmem:[%s3097_s28 + $0x100] sm:$0xf]  ;;  %v2217_v20 = vld [vmem:[%s3097_s28 + $0x108] sm:$0xf] }
  0x3c   : > { %v498_v18 = vsel %vm477_vm0, %v496_v14, %v497_v6  ;;  %v2918_v24 = vld [vmem:[%s3097_s28 + $0x104] ss:$0 sps:$4 sm:$0x11]   ;;  %v3309_v29 = vcombine.low %v2217_v20, %v3302_v25  ;;  %v2237_v6 = vld [vmem:[%s3097_s28 + $0x3c] sm:$0xf] }
  0x3d   : > { %2632 = vmatpush3.bf16.msra.mxu0 %v2906_v23  ;;  %v2274_v23 = vcombine.low %v192_v17, %v193_v19  ;;  %v441_v36 = vshll.u32 %v2918_v24, 16  ;;  %v3348_v17 = vld [vmem:[%s3097_s28 + $0x44] ss:$0 sps:$4 sm:$0x11]  }
  0x3e   : > { %2696 = vmatpush3.bf16.msra.mxu1 %v2907_v34  ;;  %2633 = vmatprep.subr.bf16.mxu0 %v2913_v41  ;;  %v500_v41 = vrot.slane %v2918_v24, 1  ;;  %v2239_v24 = vld [vmem:[%s3097_s28 + $0x60] sm:$0xf] }
  0x3f   : > { %1614 = vmatmul.mubr.bf16.gmra.mrb[12].mxu0 %v2270_v45  ;;  %v414_v45 = vrot.slane %v412_v39, 1  ;;  %2697 = vmatprep.subr.bf16.mxu1 %v2914_v50  ;;  %v434_v32 = vshrl.u32 %v2274_v23, 16  ;;  %v436_v34 = vshll.u32 %v2274_v23, 16  ;;  %v583_v39 = vshrl.u32 %v3116_v42, 16 }
  0x40   : > { %1711 = vmatmul.mubr.bf16.gmra.mrb[12].mxu1 %v489_v1  ;;  %1621 = vmatprep.mubr.bf16.mxu0 %v408_v30  ;;  %v429_v1 = vshll.u32 %v2909_v56, 16  ;;  %v209_v30 = vld [vmem:[%s3097_s28 + $0xfc] sm:$0xe]  ;;  %v443_v44 = vrot.slane %v441_v36, 1  ;;  %v2309_v36 = vcombine.low %v2229_v9, %v3171_v22 }
  0x41   : > { %1718 = vmatprep.mubr.bf16.mxu1 %v3227_v13  ;;  %v415_v51 = vor.u32 %v414_v45, %v410_v37  ;;  %2634 = vmatpush3.bf16.msra.mxu0 %v2915_v58  ;;  %v3316_v37 = vld [vmem:[%s3661_s1 + $0x200] sm:$0xff]   ;;  %v2290_v40 = vcombine.low %v209_v30, %v193_v19  ;;  %v438_v43 = vrot.slane %v436_v34, 1  ;;  %v587_v45 = vrot.slane %v585_v28, 1  ;;  %v2926_v42 = vld [vmem:[%s3097_s28 + $0x14] ss:$0 sps:$4 sm:$0x11]  }
  0x42   : > { %v431_v10 = vrot.slane %v429_v1, 1  ;;  %2698 = vmatpush3.bf16.msra.mxu1 %v2916_v4  ;;  %2635 = vmatprep.subr.bf16.mxu0 %v2922_v7  ;;  %v711_v56 = vrot.slane %v2926_v42, 1  ;;  %v3332_v58 = vld [vmem:[%s3097_s28 + $0x20] ss:$0 sps:$4 sm:$0x11]   ;;  %v599_v30 = vrot.slane %v597_v5, 1 }
  0x43   : > { %v420_v59 = vsel %vm348_vm1, %v415_v51, %v419_v46  ;;  %2699 = vmatprep.subr.bf16.mxu1 %v2923_v11  ;;  %v499_v46 = vrot.slane %v2290_v40, 1  ;;  %v439_v48 = vor.u32 %v438_v43, %v434_v32  ;;  %v822_v1 = vshll.u32 %v3332_v58, 16  ;;  %v2930_v4 = vld [vmem:[%s3097_s28 + $0x38] ss:$0 sps:$4 sm:$0x11]   ;;  %v2933_v32 = vld [vmem:[%s3661_s1 + $0x208] sm:$0xff]  }
  0x44   : > { %v432_v21 = vsel %vm348_vm1, %v427_v16, %v431_v10  ;;  %v3341_v7 = vld [vmem:[%s3097_s28 + $0x40] sm:$0xf]  ;;  %v714_v16 = vrot.slane %v2930_v4, 1  ;;  %v3360_v34 = vld [vmem:[%s3097_s28 + $0x64] sm:$0xf] }
  0x45   : > { %2636 = vmatpush3.bf16.msra.mxu0 %v2924_v15  ;;  %v501_v51 = vsel %vm477_vm0, %v499_v46, %v500_v41  ;;  %v3345_v11 = vcombine.low %v2237_v6, %v3341_v7  ;;  %v3368_v41 = vld [vmem:[%s3097_s28 + $0x68] ss:$0 sps:$4 sm:$0x11]  }
  0x46   : > { %2765 = vmatprep.subr.bf16.mxu0 %v3316_v37 }
  0x47   : > { %1622 = vmatmul.mubr.bf16.gmra.mrb[16].mxu0 %v2271_v3  ;;  %v3279_v3 = vcombine.low %v2215_v57, %v3275_v60  ;;  %v2315_v57 = vcombine.low %v2235_v52, %v3327_v53  ;;  %v827_v19 = vshrl.u32 %v3345_v11, 16  ;;  %v829_v20 = vshll.u32 %v3345_v11, 16  ;;  %v2937_v52 = vld [vmem:[%s3661_s1 + $0x210] sm:$0xff]  }
  0x48   : > { %1719 = vmatmul.mubr.bf16.gmra.mrb[16].mxu1 %v492_v26  ;;  %1629 = vmatprep.mubr.bf16.mxu0 %v420_v59  ;;  %v2925_v26 = vld [vmem:[%s3661_s1 + $0x1b8] sm:$0xff]  }
  0x49   : > { %1726 = vmatprep.mubr.bf16.mxu1 %v3255_v35  ;;  %2700 = vmatpush3.bf16.msra.mxu1 %v2925_v26  ;;  %v815_v63 = vshrl.u32 %v2315_v57, 16  ;;  %v817_v0 = vshll.u32 %v2315_v57, 16  ;;  %v831_v28 = vrot.slane %v829_v20, 1  ;;  %v3408_v20 = vld [vmem:[%s3097_s28 + $0xac] sm:$0xf] }
  0x4a   : > { %2797 = vmatprep.subr.bf16.mxu1 %v3316_v37 }
  0x4b   : > { %v819_v10 = vrot.slane %v817_v0, 1  ;;  %v832_v43 = vor.u32 %v831_v28, %v827_v19  ;;  %v3386_v0 = vld [vmem:[%s3097_s28 + $0x88] sm:$0xf] }
  0x4c   : > { %v2243_v19 = vld [vmem:[%s3097_s28 + $0xa8] sm:$0xf] }
  0x4f   : > { %1630 = vmatmul.mubr.bf16.gmra.mrb[20].mxu0 %v2272_v31  ;;  %v2307_v31 = vcombine.low %v2227_v12, %v3113_v38  ;;  %v2228_v38 = vld [vmem:[%s3097_s28 + $0x30] sm:$0xe]  ;;  %v588_v12 = vor.u32 %v587_v45, %v583_v39  ;;  %v609_v45 = vshll.u32 %v3175_v27, 16 }
  0x50   : > { %1727 = vmatmul.mubr.bf16.gmra.mrb[20].mxu1 %v495_v54  ;;  %1637 = vmatprep.mubr.bf16.mxu0 %v432_v21  ;;  %v444_v54 = vsel %vm348_vm1, %v439_v48, %v443_v44  ;;  %v2308_v59 = vcombine.low %v2228_v38, %v3142_v62  ;;  %v824_v62 = vrot.slane %v822_v1, 1  ;;  %v834_v21 = vshll.u32 %v3348_v17, 16  ;;  %v2934_v44 = vld [vmem:[%s3097_s28 + $0x5c] ss:$0 sps:$4 sm:$0x11]  }
  0x51   : > { %1734 = vmatprep.mubr.bf16.mxu1 %v3279_v3  ;;  %v710_v50 = vrot.slane %v2307_v31, 1  ;;  %v602_v31 = vshll.u32 %v2930_v4, 16  ;;  %v846_v48 = vshll.u32 %v3368_v41, 16  ;;  %v611_v4 = vrot.slane %v609_v45, 1  ;;  %v3425_v45 = vld [vmem:[%s3097_s28 + $0xd0] sm:$0xf] }
  0x52   : > { %v713_v15 = vrot.slane %v2308_v59, 1  ;;  %v836_v40 = vrot.slane %v834_v21, 1  ;;  %v2241_v59 = vld [vmem:[%s3097_s28 + $0x84] sm:$0xf]  ;;  %v614_v9 = vshll.u32 %v2934_v44, 16  ;;  %v621_v21 = vshll.u32 %v3203_v49, 16 }
  0x53   : > { %v712_v61 = vsel %vm477_vm0, %v710_v50, %v711_v56  ;;  %v3389_v5 = vcombine.low %v2241_v59, %v3386_v0 }
  0x54   : > { %v715_v38 = vsel %vm477_vm0, %v713_v15, %v714_v16 }
  0x57   : > { %1638 = vmatmul.mubr.bf16.gmra.mrb[24].mxu0 %v2273_v55  ;;  %v590_v55 = vshll.u32 %v2926_v42, 16  ;;  %v837_v42 = vsel %vm348_vm1, %v832_v43, %v836_v40 }
  0x58   : > { %1735 = vmatmul.mubr.bf16.gmra.mrb[24].mxu1 %v498_v18  ;;  %1645 = vmatprep.mubr.bf16.mxu0 %v444_v54  ;;  %v820_v18 = vor.u32 %v819_v10, %v815_v63  ;;  %v2230_v54 = vld [vmem:[%s3097_s28 + $0x78] sm:$0xe]  ;;  %v607_v63 = vshrl.u32 %v3175_v27, 16 }
  0x59   : > { %1742 = vmatprep.mubr.bf16.mxu1 %v3309_v29  ;;  %v592_v14 = vrot.slane %v590_v55, 1  ;;  %v716_v55 = vrot.slane %v2309_v36, 1  ;;  %v2941_v27 = vld [vmem:[%s3661_s1 + $0x218] sm:$0xff]   ;;  %v2310_v16 = vcombine.low %v2230_v54, %v3197_v47  ;;  %v3415_v47 = vld [vmem:[%s3097_s28 + $0xb0] ss:$0 sps:$4 sm:$0x11]  }
  0x5a   : > { %v825_v26 = vsel %vm348_vm1, %v820_v18, %v824_v62  ;;  %v2938_v62 = vld [vmem:[%s3097_s28 + $0x80] ss:$0 sps:$4 sm:$0x11]   ;;  %v612_v28 = vor.u32 %v611_v4, %v607_v63  ;;  %v2231_v36 = vld [vmem:[%s3097_s28 + $0x9c] sm:$0xe] }
  0x5b   : > { %v593_v39 = vsel %vm348_vm1, %v588_v12, %v592_v14  ;;  %v851_v12 = vshrl.u32 %v3389_v5, 16  ;;  %v853_v14 = vshll.u32 %v3389_v5, 16  ;;  %v720_v40 = vrot.slane %v2938_v62, 1  ;;  %v2942_v54 = vld [vmem:[%s3097_s28 + $0xa4] ss:$0 sps:$4 sm:$0x11]  }
  0x5f   : > { %1646 = vmatmul.mubr.bf16.gmra.mrb[28].mxu0 %v2274_v23  ;;  %v595_v23 = vshrl.u32 %v3145_v2, 16  ;;  %v3365_v2 = vcombine.low %v2239_v24, %v3360_v34 }
  0x60   : > { %1743 = vmatmul.mubr.bf16.gmra.mrb[28].mxu1 %v501_v51  ;;  %1783 = vmatprep.mubr.bf16.mxu0 %v712_v61  ;;  %v604_v51 = vrot.slane %v602_v31, 1  ;;  %v717_v61 = vrot.slane %v2934_v44, 1  ;;  %v2245_v44 = vld [vmem:[%s3097_s28 + $0xcc] sm:$0xf] }
  0x61   : > { %1880 = vmatprep.mubr.bf16.mxu1 %v825_v26  ;;  %v839_v22 = vshrl.u32 %v3365_v2, 16  ;;  %v841_v46 = vshll.u32 %v3365_v2, 16  ;;  %v600_v50 = vor.u32 %v599_v30, %v595_v23  ;;  %v855_v23 = vrot.slane %v853_v14, 1 }
  0x62   : > { %v718_v18 = vsel %vm477_vm0, %v716_v55, %v717_v61  ;;  %v3412_v26 = vcombine.low %v2243_v19, %v3408_v20  ;;  %v616_v30 = vrot.slane %v614_v9, 1  ;;  %v2949_v55 = vld [vmem:[%s3661_s1 + $0x228] sm:$0xff]   ;;  %v633_v61 = vshll.u32 %v3227_v13, 16  ;;  %v3451_v9 = vld [vmem:[%s3097_s28 + $0xf4] sm:$0xf] }
  0x63   : > { %v843_v56 = vrot.slane %v841_v46, 1  ;;  %v605_v6 = vsel %vm348_vm1, %v600_v50, %v604_v51  ;;  %v856_v31 = vor.u32 %v855_v23, %v851_v12  ;;  %v619_v51 = vshrl.u32 %v3203_v49, 16  ;;  %v3442_v49 = vld [vmem:[%s3097_s28 + $0xd4] ss:$0 sps:$4 sm:$0x11]  }
  0x64   : > { %v863_v43 = vshrl.u32 %v3412_v26, 16  ;;  %v617_v50 = vsel %vm348_vm1, %v612_v28, %v616_v30  ;;  %v638_v12 = vshll.u32 %v2942_v54, 16  ;;  %v2946_v28 = vld [vmem:[%s3097_s28 + $0xc8] ss:$0 sps:$4 sm:$0x11]  }
  0x65   : > { %v844_v1 = vor.u32 %v843_v56, %v839_v22  ;;  %v2311_v56 = vcombine.low %v2231_v36, %v3223_v8  ;;  %v2247_v8 = vld [vmem:[%s3097_s28 + $0xf0] sm:$0xf] }
  0x66   : > { %v3458_v19 = vcombine.low %v2247_v8, %v3451_v9  ;;  %v640_v36 = vrot.slane %v638_v12, 1  ;;  %v2950_v8 = vld [vmem:[%s3097_s28 + $0xec] ss:$0 sps:$4 sm:$0x11]  }
  0x67   : > { %1784 = vmatmul.mubr.bf16.vlgmr.msra.gmra.mrb[32].mxu0 %v593_v39  ;;  %v719_v39 = vrot.slane %v2310_v16, 1  ;;  %v882_v16 = vshll.u32 %v3442_v49, 16 }
  0x68   : > { %1881 = vmatmul.mubr.bf16.vlgmr.msra.gmra.mrb[32].mxu1 %v2315_v57  ;;  %2766 = vmatpush3.bf16.msra.mxu0 %v3316_v37  ;;  %v848_v57 = vrot.slane %v846_v48, 1  ;;  %v870_v48 = vshll.u32 %v3415_v47, 16 }
  0x69   : > { %2805 = vmatpush3.bf16.msra.mxu1 %v3316_v37  ;;  %1791 = vmatprep.mubr.bf16.mxu0 %v715_v38  ;;  %v3392_v37 = vld [vmem:[%s3097_s28 + $0x8c] ss:$0 sps:$4 sm:$0x11]   ;;  %v626_v38 = vshll.u32 %v2938_v62, 16  ;;  %v723_v62 = vrot.slane %v2942_v54, 1 }
  0x6a   : > { %2798 = vmatprep.subr.bf16.mxu1 %v2933_v32  ;;  %1888 = vmatprep.mubr.bf16.mxu1 %v837_v42  ;;  %v849_v10 = vsel %vm348_vm1, %v844_v1, %v848_v57  ;;  %v858_v15 = vshll.u32 %v3392_v37, 16  ;;  %v3430_v42 = vcombine.low %v2245_v44, %v3425_v45  ;;  %v721_v57 = vsel %vm477_vm0, %v719_v39, %v720_v40  ;;  %v3471_v40 = vld [vmem:[%s3097_s28 + $0xf8] ss:$0 sps:$4 sm:$0x11]   ;;  %v2260_v44 = vld [vmem:[%s3097_s28 + $0x3c] sm:$0xe] }
  0x6b   : > { %2767 = vmatprep.subr.bf16.mxu0 %v2933_v32  ;;  %v628_v63 = vrot.slane %v626_v38, 1  ;;  %v872_v4 = vrot.slane %v870_v48, 1  ;;  %v2249_v38 = vld [vmem:[%s3097_s28 + $0x114] sm:$0xf]  ;;  %v2233_v48 = vld [vmem:[%s3097_s28 + $0xe4] sm:$0xe]  ;;  %v2332_v54 = vcombine.low %v2260_v44, %v3341_v7 }
  0x6c   : > { %2768 = vmatpush3.bf16.msra.mxu0 %v2933_v32  ;;  %v860_v24 = vrot.slane %v858_v15, 1  ;;  %v877_v59 = vshll.u32 %v3430_v42, 16  ;;  %v875_v14 = vshrl.u32 %v3430_v42, 16 }
  0x6d   : > { %2806 = vmatpush3.bf16.msra.mxu1 %v2933_v32  ;;  %2769 = vmatprep.subr.bf16.mxu0 %v2937_v52  ;;  %v865_v32 = vshll.u32 %v3412_v26, 16 }
  0x6e   : > { %2799 = vmatprep.subr.bf16.mxu1 %v2937_v52  ;;  %v861_v22 = vsel %vm348_vm1, %v856_v31, %v860_v24  ;;  %v879_v15 = vrot.slane %v877_v59, 1  ;;  %v631_v24 = vshrl.u32 %v3227_v13, 16  ;;  %v884_v13 = vrot.slane %v882_v16, 1 }
  0x6f   : > { %1792 = vmatmul.mubr.bf16.gmra.mrb[36].mxu0 %v605_v6  ;;  %v867_v46 = vrot.slane %v865_v32, 1  ;;  %v645_v32 = vshll.u32 %v3255_v35, 16  ;;  %v946_v59 = vrot.slane %v3348_v17, 1 }
  0x70   : > { %1889 = vmatmul.mubr.bf16.gmra.mrb[36].mxu1 %v3345_v11  ;;  %v2945_v11 = vld [vmem:[%s3661_s1 + $0x220] sm:$0xff]   ;;  %1799 = vmatprep.mubr.bf16.mxu0 %v718_v18  ;;  %v880_v39 = vor.u32 %v879_v15, %v875_v14  ;;  %v729_v14 = vrot.slane %v2950_v8, 1  ;;  %v2234_v15 = vld [vmem:[%s3097_s28 + $0x108] sm:$0xe] }
  0x71   : > { %1896 = vmatprep.mubr.bf16.mxu1 %v849_v10  ;;  %2807 = vmatpush3.bf16.msra.mxu1 %v2937_v52  ;;  %v868_v1 = vor.u32 %v867_v46, %v863_v43  ;;  %v722_v10 = vrot.slane %v2311_v56, 1  ;;  %v3476_v43 = vld [vmem:[%s3097_s28 + $0x118] sm:$0xf]  ;;  %v726_v46 = vrot.slane %v2946_v28, 1  ;;  %v894_v56 = vshll.u32 %v3471_v40, 16 }
  0x72   : > { %2800 = vmatprep.subr.bf16.mxu1 %v2941_v27  ;;  %2770 = vmatpush3.bf16.msra.mxu0 %v2937_v52  ;;  %v623_v52 = vrot.slane %v621_v21, 1  ;;  %v2957_v21 = vld [vmem:[%s3661_s1 + $0x238] sm:$0xff]  }
  0x73   : > { %2771 = vmatprep.subr.bf16.mxu0 %v2941_v27  ;;  %v873_v18 = vsel %vm348_vm1, %v868_v1, %v872_v4  ;;  %v724_v31 = vsel %vm477_vm0, %v722_v10, %v723_v62  ;;  %v650_v1 = vshll.u32 %v2946_v28, 16  ;;  %v2313_v4 = vcombine.low %v2233_v48, %v3275_v60 }
  0x74   : > { %v624_v6 = vor.u32 %v623_v52, %v619_v51  ;;  %v643_v51 = vshrl.u32 %v3255_v35, 16  ;;  %v887_v52 = vshrl.u32 %v3458_v19, 16  ;;  %v945_v35 = vrot.slane %v2332_v54, 1 }
  0x75   : > { %2808 = vmatpush3.bf16.msra.mxu1 %v2941_v27  ;;  %v657_v62 = vshll.u32 %v3279_v3, 16  ;;  %v728_v12 = vrot.slane %v2313_v4, 1  ;;  %v2261_v4 = vld [vmem:[%s3097_s28 + $0x60] sm:$0xe] }
  0x76   : > { %2801 = vmatprep.subr.bf16.mxu1 %v2945_v11  ;;  %2772 = vmatpush3.bf16.msra.mxu0 %v2941_v27  ;;  %v2232_v27 = vld [vmem:[%s3097_s28 + $0xc0] sm:$0xe]  ;;  %v629_v23 = vsel %vm348_vm1, %v624_v6, %v628_v63  ;;  %v647_v63 = vrot.slane %v645_v32, 1  ;;  %v896_v6 = vrot.slane %v894_v56, 1 }
  0x77   : > { %2773 = vmatprep.subr.bf16.mxu0 %v2945_v11  ;;  %1800 = vmatmul.mubr.bf16.gmra.mrb[40].mxu0 %v617_v50  ;;  %v2312_v30 = vcombine.low %v2232_v27, %v3249_v33  ;;  %v889_v33 = vshll.u32 %v3458_v19, 16  ;;  %v885_v50 = vsel %vm348_vm1, %v880_v39, %v884_v13  ;;  %v3498_v27 = vld [vmem:[%s3097_s28 + $0x11c] ss:$0 sps:$4 sm:$0x11]   ;;  %v659_v28 = vrot.slane %v657_v62, 1 }
  0x78   : > { %1897 = vmatmul.mubr.bf16.gmra.mrb[40].mxu1 %v3365_v2  ;;  %v2953_v2 = vld [vmem:[%s3661_s1 + $0x230] sm:$0xff]   ;;  %1807 = vmatprep.mubr.bf16.mxu0 %v721_v57  ;;  %v3486_v57 = vcombine.low %v2249_v38, %v3476_v43  ;;  %v648_v60 = vor.u32 %v647_v63, %v643_v51  ;;  %v730_v32 = vsel %vm477_vm0, %v728_v12, %v729_v14 }
  0x79   : > { %1904 = vmatprep.mubr.bf16.mxu1 %v861_v22  ;;  %2809 = vmatpush3.bf16.msra.mxu1 %v2945_v11  ;;  %v725_v22 = vrot.slane %v2312_v30, 1  ;;  %v662_v30 = vshll.u32 %v2950_v8, 16  ;;  %v2266_v62 = vld [vmem:[%s3097_s28 + $0x114] sm:$0xe] }
  0x7a   : > { %2802 = vmatprep.subr.bf16.mxu1 %v2949_v55  ;;  %2774 = vmatpush3.bf16.msra.mxu0 %v2945_v11  ;;  %v635_v11 = vrot.slane %v633_v61, 1  ;;  %v901_v10 = vshll.u32 %v3486_v57, 16  ;;  %v2338_v12 = vcombine.low %v2266_v62, %v3476_v43 }
  0x7b   : > { %2775 = vmatprep.subr.bf16.mxu0 %v2949_v55  ;;  %v727_v7 = vsel %vm477_vm0, %v725_v22, %v726_v46  ;;  %v664_v38 = vrot.slane %v662_v30, 1  ;;  %v2259_v46 = vld [vmem:[%s3097_s28 + $0x18] sm:$0xe] }
  0x7d   : > { %2810 = vmatpush3.bf16.msra.mxu1 %v2949_v55 }
  0x7e   : > { %2803 = vmatprep.subr.bf16.mxu1 %v2953_v2  ;;  %2776 = vmatpush3.bf16.msra.mxu0 %v2949_v55  ;;  %v891_v55 = vrot.slane %v889_v33, 1  ;;  %v669_v33 = vshll.u32 %v3309_v29, 16 }
  0x7f   : > { %2777 = vmatprep.subr.bf16.mxu0 %v2953_v2  ;;  %1808 = vmatmul.mubr.bf16.gmra.mrb[44].mxu0 %v629_v23  ;;  %v906_v23 = vshll.u32 %v3498_v27, 16 }
  0x80   : > { %1905 = vmatmul.mubr.bf16.gmra.mrb[44].mxu1 %v3389_v5  ;;  %1815 = vmatprep.mubr.bf16.mxu0 %v724_v31  ;;  %v636_v5 = vor.u32 %v635_v11, %v631_v24  ;;  %v892_v17 = vor.u32 %v891_v55, %v887_v52  ;;  %v655_v11 = vshrl.u32 %v3279_v3, 16  ;;  %v2314_v31 = vcombine.low %v2234_v15, %v3302_v25  ;;  %v2263_v3 = vld [vmem:[%s3097_s28 + $0xa8] sm:$0xe] }
  0x81   : > { %1912 = vmatprep.mubr.bf16.mxu1 %v873_v18  ;;  %2811 = vmatpush3.bf16.msra.mxu1 %v2953_v2  ;;  %v899_v18 = vshrl.u32 %v3486_v57, 16  ;;  %v908_v13 = vrot.slane %v906_v23, 1  ;;  %v671_v51 = vrot.slane %v669_v33, 1  ;;  %v2331_v55 = vcombine.low %v2259_v46, %v3327_v53 }
  0x82   : > { %2804 = vmatprep.subr.bf16.mxu1 %v2957_v21  ;;  %2778 = vmatpush3.bf16.msra.mxu0 %v2953_v2  ;;  %v641_v61 = vsel %vm348_vm1, %v636_v5, %v640_v36  ;;  %v3495_v2 = vsel %vm477_vm0, %v945_v35, %v946_v59  ;;  %v897_v16 = vsel %vm348_vm1, %v892_v17, %v896_v6  ;;  %v2954_v36 = vld [vmem:[%s3097_s28 + $0x110] ss:$0 sps:$4 sm:$0x11]   ;;  %v731_v44 = vrot.slane %v2314_v31, 1 }
  0x83   : > { %2779 = vmatprep.subr.bf16.mxu0 %v2957_v21  ;;  %v660_v5 = vor.u32 %v659_v28, %v655_v11  ;;  %v732_v22 = vrot.slane %v2954_v36, 1  ;;  %v674_v52 = vshll.u32 %v2954_v36, 16  ;;  %v955_v59 = vrot.slane %v3415_v47, 1 }
  0x84   : > { %v943_v35 = vrot.slane %v3332_v58, 1  ;;  %v2333_v17 = vcombine.low %v2261_v4, %v3360_v34  ;;  %v958_v58 = vrot.slane %v3442_v49, 1  ;;  %v963_v15 = vrot.slane %v2338_v12, 1 }
  0x85   : > { %2812 = vmatpush3.bf16.msra.mxu1 %v2957_v21  ;;  %v665_v48 = vsel %vm348_vm1, %v660_v5, %v664_v38  ;;  %v733_v54 = vsel %vm477_vm0, %v731_v44, %v732_v22  ;;  %v676_v63 = vrot.slane %v674_v52, 1 }
  0x86   : > { %2780 = vmatpush3.bf16.msra.mxu0 %v2957_v21  ;;  %v903_v21 = vrot.slane %v901_v10, 1  ;;  %v961_v10 = vrot.slane %v3471_v40, 1  ;;  %v964_v40 = vrot.slane %v3498_v27, 1  ;;  %v3552_v27 = vld [vmem:[%s3662_s2] ss:$0 sm:$0xff] }
  0x87   : > { %1816 = vmatmul.mubr.bf16.gmra.mrb[48].mxu0 %v641_v61 }
  0x88   : > { %1913 = vmatmul.mubr.bf16.gmra.mrb[48].mxu1 %v3412_v26  ;;  %1823 = vmatprep.mubr.bf16.mxu0 %v727_v7  ;;  %v652_v26 = vrot.slane %v650_v1, 1  ;;  %v904_v39 = vor.u32 %v903_v21, %v899_v18  ;;  %v2265_v1 = vld [vmem:[%s3097_s28 + $0xf0] sm:$0xe]  ;;  %v965_v18 = vsel %vm477_vm0, %v963_v15, %v964_v40 }
  0x89   : > { %1920 = vmatprep.mubr.bf16.mxu1 %v885_v50  ;;  %v667_v50 = vshrl.u32 %v3309_v29, 16  ;;  %v942_v29 = vrot.slane %v2331_v55, 1  ;;  %v2337_v53 = vcombine.low %v2265_v1, %v3451_v9  ;;  %v949_v9 = vrot.slane %v3368_v41, 1 }
  0x8a   : > { %v653_v24 = vsel %vm348_vm1, %v648_v60, %v652_v26  ;;  %v909_v25 = vsel %vm348_vm1, %v904_v39, %v908_v13  ;;  %v948_v60 = vrot.slane %v2333_v17, 1  ;;  %v2262_v26 = vld [vmem:[%s3097_s28 + $0x84] sm:$0xe] }
  0x8b   : > { %v672_v61 = vor.u32 %v671_v51, %v667_v50  ;;  %v944_v47 = vsel %vm477_vm0, %v942_v29, %v943_v35  ;;  %v2334_v14 = vcombine.low %v2262_v26, %v3386_v0 }
  0x8c   : > { %v950_v49 = vsel %vm477_vm0, %v948_v60, %v949_v9 }
  0x8d   : > { %v677_v8 = vsel %vm348_vm1, %v672_v61, %v676_v63  ;;  %v951_v41 = vrot.slane %v2334_v14, 1 }
  0x8f   : > { %1824 = vmatmul.mubr.bf16.gmra.mrb[52].mxu0 %v653_v24 }
  0x90   : > { %1921 = vmatmul.mubr.bf16.gmra.mrb[52].mxu1 %v3430_v42  ;;  %1831 = vmatprep.mubr.bf16.mxu0 %v730_v32  ;;  %v2335_v42 = vcombine.low %v2263_v3, %v3408_v20  ;;  %v2264_v20 = vld [vmem:[%s3097_s28 + $0xcc] sm:$0xe] }
  0x91   : > { %1928 = vmatprep.mubr.bf16.mxu1 %v897_v16  ;;  %v952_v16 = vrot.slane %v3392_v37, 1 }
  0x92   : > { %v954_v56 = vrot.slane %v2335_v42, 1 }
  0x93   : > { %v953_v43 = vsel %vm477_vm0, %v951_v41, %v952_v16 }
  0x94   : > { %v956_v7 = vsel %vm477_vm0, %v954_v56, %v955_v59 }
  0x97   : > { %1832 = vmatmul.mubr.bf16.gmra.mrb[56].mxu0 %v665_v48 }
  0x98   : > { %1929 = vmatmul.mubr.bf16.gmra.mrb[56].mxu1 %v3458_v19  ;;  %1839 = vmatprep.mubr.bf16.mxu0 %v733_v54  ;;  %v2336_v19 = vcombine.low %v2264_v20, %v3425_v45  ;;  %v960_v45 = vrot.slane %v2337_v53, 1 }
  0x99   : > { %1936 = vmatprep.mubr.bf16.mxu1 %v909_v25 }
  0x9a   : > { %v957_v6 = vrot.slane %v2336_v19, 1  ;;  %v962_v34 = vsel %vm477_vm0, %v960_v45, %v961_v10 }
  0x9f   : > { %1840 = vmatmul.mubr.bf16.gmra.mrb[60].mxu0 %v677_v8 }
  0xa0   : > { %1937 = vmatmul.mubr.bf16.gmra.mrb[60].mxu1 %v3486_v57  ;;  %2781 = vmatprep.mubr.bf16.mxu0 %v944_v47  ;;  %v959_v57 = vsel %vm477_vm0, %v957_v6, %v958_v58 }
  0xa1   : > { %2789 = vmatprep.mubr.bf16.mxu1 %v956_v7 }
  0xa7   : > { %2782 = vmatmul.mubr.bf16.vlgmr.msra.gmra.mrb[64].mxu0 %v3495_v2 }
  0xa8   : > { %2790 = vmatmul.mubr.bf16.vlgmr.msra.gmra.mrb[64].mxu1 %v959_v57  ;;  %2785 = vmatprep.mubr.bf16.mxu0 %v950_v49 }
  0xa9   : > { %2793 = vmatprep.mubr.bf16.mxu1 %v962_v34 }
  0xaf   : > { %2786 = vmatmul.mubr.bf16.gmra.mrb[68].mxu0 %v953_v43 }
  0xb0   : > { %2794 = vmatmul.mubr.bf16.gmra.mrb[68].mxu1 %v965_v18 }
  0xfa   : > { %v2509_v23 = vpop.f32.mrb[0].mxu0 }
  0xfb   : > { %v2573_v0 = vpop.f32.mrb[0].mxu1  ;;  %v2510_v2 = vpop.f32.mrb[1].mxu0 }
  0xfc   : > { %v2574_v21 = vpop.f32.mrb[1].mxu1  ;;  %v2511_v30 = vadd.f32 %v2510_v2, %v2509_v23  ;;  %v2512_v37 = vpop.f32.mrb[2].mxu0 }
  0xfd   : > { %v2575_v24 = vadd.f32 %v2574_v21, %v2573_v0  ;;  %v2576_v11 = vpop.f32.mrb[2].mxu1  ;;  %v2513_v32 = vpop.f32.mrb[3].mxu0 }
  0xfe   : > { %v2577_v28 = vpop.f32.mrb[3].mxu1  ;;  %v1592_v36 = vadd.f32 %v2511_v30, %v3552_v27  ;;  %v2514_v39 = vadd.f32 %v2513_v32, %v2512_v37 }
  0xff   : > { %v2578_v31 = vadd.f32 %v2577_v28, %v2576_v11 }
 0x100   : > { %v3555_v13 = vadd.f32 %v2575_v24, %v1592_v36  ;;  %v1595_v33 = vadd.f32 %v2514_v39, %v3552_v27 }
 0x102   : > { %v3558_v3 = vadd.f32 %v2578_v31, %v1595_v33  ;;  %v2515_v44 = vpop.f32.mrb[4].mxu0 }
 0x103   : > { %v2579_v5 = vpop.f32.mrb[4].mxu1  ;;  %v2516_v25 = vpop.f32.mrb[5].mxu0 }
 0x104   : > { %v2580_v38 = vpop.f32.mrb[5].mxu1  ;;  %v2517_v48 = vadd.f32 %v2516_v25, %v2515_v44  ;;  %v2518_v50 = vpop.f32.mrb[6].mxu0 }
 0x105   : > { %v2581_v22 = vadd.f32 %v2580_v38, %v2579_v5  ;;  %v2582_v46 = vpop.f32.mrb[6].mxu1  ;;  %v2519_v52 = vpop.f32.mrb[7].mxu0 }
 0x106   : > { %v2583_v42 = vpop.f32.mrb[7].mxu1  ;;  %v1600_v54 = vadd.f32 %v2517_v48, %v3552_v27  ;;  %v2520_v55 = vadd.f32 %v2519_v52, %v2518_v50 }
 0x107   : > { %v2584_v51 = vadd.f32 %v2583_v42, %v2582_v46 }
 0x108   : > { %v3561_v56 = vadd.f32 %v2581_v22, %v1600_v54  ;;  %v1603_v59 = vadd.f32 %v2520_v55, %v3552_v27 }
 0x10a   : > { %v3564_v63 = vadd.f32 %v2584_v51, %v1603_v59  ;;  %v2521_v1 = vpop.f32.mrb[8].mxu0 }
 0x10b   : > { %v2585_v20 = vpop.f32.mrb[8].mxu1  ;;  %v2522_v19 = vpop.f32.mrb[9].mxu0 }
 0x10c   : > { %v2586_v61 = vpop.f32.mrb[9].mxu1  ;;  %v2523_v7 = vadd.f32 %v2522_v19, %v2521_v1  ;;  %v2524_v53 = vpop.f32.mrb[10].mxu0 }
 0x10d   : > { %v2587_v29 = vadd.f32 %v2586_v61, %v2585_v20  ;;  %v2588_v35 = vpop.f32.mrb[10].mxu1  ;;  %v2525_v47 = vpop.f32.mrb[11].mxu0 }
 0x10e   : > { %v2589_v4 = vpop.f32.mrb[11].mxu1  ;;  %v1608_v17 = vadd.f32 %v2523_v7, %v3552_v27  ;;  %v2526_v6 = vadd.f32 %v2525_v47, %v2524_v53 }
 0x10f   : > { %v2590_v8 = vadd.f32 %v2589_v4, %v2588_v35 }
 0x110   : > { %v3567_v58 = vadd.f32 %v2587_v29, %v1608_v17  ;;  %v1611_v45 = vadd.f32 %v2526_v6, %v3552_v27 }
 0x112   : > { %v3570_v60 = vadd.f32 %v2590_v8, %v1611_v45  ;;  %v2527_v9 = vpop.f32.mrb[12].mxu0 }
 0x113   : > { %v2591_v10 = vpop.f32.mrb[12].mxu1  ;;  %v2528_v12 = vpop.f32.mrb[13].mxu0 }
 0x114   : > { %v2592_v62 = vpop.f32.mrb[13].mxu1  ;;  %v2529_v14 = vadd.f32 %v2528_v12, %v2527_v9  ;;  %v2530_v49 = vpop.f32.mrb[14].mxu0 }
 0x115   : > { %v2593_v26 = vadd.f32 %v2592_v62, %v2591_v10  ;;  %v2594_v57 = vpop.f32.mrb[14].mxu1  ;;  %v2531_v40 = vpop.f32.mrb[15].mxu0 }
 0x116   : > { %v2595_v34 = vpop.f32.mrb[15].mxu1  ;;  %v1616_v41 = vadd.f32 %v2529_v14, %v3552_v27  ;;  %v2532_v16 = vadd.f32 %v2531_v40, %v2530_v49 }
 0x117   : > { %v2596_v15 = vadd.f32 %v2595_v34, %v2594_v57 }
 0x118   : > { %v3573_v18 = vadd.f32 %v2593_v26, %v1616_v41  ;;  %v1619_v43 = vadd.f32 %v2532_v16, %v3552_v27 }
 0x11a   : > { %v3576_v23 = vadd.f32 %v2596_v15, %v1619_v43  ;;  %v2533_v24 = vpop.f32.mrb[16].mxu0 }
 0x11b   : > { %v2597_v0 = vpop.f32.mrb[16].mxu1  ;;  %v2534_v28 = vpop.f32.mrb[17].mxu0 }
 0x11c   : > { %v2598_v21 = vpop.f32.mrb[17].mxu1  ;;  %v2535_v37 = vadd.f32 %v2534_v28, %v2533_v24  ;;  %v2536_v31 = vpop.f32.mrb[18].mxu0 }
 0x11d   : > { %v2599_v11 = vadd.f32 %v2598_v21, %v2597_v0  ;;  %v2600_v2 = vpop.f32.mrb[18].mxu1  ;;  %v2537_v36 = vpop.f32.mrb[19].mxu0 }
 0x11e   : > { %v2601_v30 = vpop.f32.mrb[19].mxu1  ;;  %v1624_v39 = vadd.f32 %v2535_v37, %v3552_v27  ;;  %v2538_v33 = vadd.f32 %v2537_v36, %v2536_v31 }
 0x11f   : > { %v2602_v32 = vadd.f32 %v2601_v30, %v2600_v2 }
 0x120   : > { %v3579_v5 = vadd.f32 %v2599_v11, %v1624_v39  ;;  %v1627_v38 = vadd.f32 %v2538_v33, %v3552_v27 }
 0x122   : > { %v3582_v46 = vadd.f32 %v2602_v32, %v1627_v38  ;;  %v2539_v25 = vpop.f32.mrb[20].mxu0 }
 0x123   : > { %v2603_v44 = vpop.f32.mrb[20].mxu1  ;;  %v2540_v50 = vpop.f32.mrb[21].mxu0 }
 0x124   : > { %v2604_v22 = vpop.f32.mrb[21].mxu1  ;;  %v2541_v52 = vadd.f32 %v2540_v50, %v2539_v25  ;;  %v2542_v54 = vpop.f32.mrb[22].mxu0 }
 0x125   : > { %v2605_v42 = vadd.f32 %v2604_v22, %v2603_v44  ;;  %v2606_v48 = vpop.f32.mrb[22].mxu1  ;;  %v2543_v59 = vpop.f32.mrb[23].mxu0 }
 0x126   : > { %v2607_v51 = vpop.f32.mrb[23].mxu1  ;;  %v1632_v20 = vadd.f32 %v2541_v52, %v3552_v27  ;;  %v2544_v61 = vadd.f32 %v2543_v59, %v2542_v54 }
 0x127   : > { %v2608_v55 = vadd.f32 %v2607_v51, %v2606_v48 }
 0x128   : > { %v3585_v1 = vadd.f32 %v2605_v42, %v1632_v20  ;;  %v1635_v29 = vadd.f32 %v2544_v61, %v3552_v27 }
 0x12a   : > { %v3588_v4 = vadd.f32 %v2608_v55, %v1635_v29  ;;  %v2545_v7 = vpop.f32.mrb[24].mxu0 }
 0x12b   : > { %v2609_v35 = vpop.f32.mrb[24].mxu1  ;;  %v2546_v47 = vpop.f32.mrb[25].mxu0 }
 0x12c   : > { %v2610_v19 = vpop.f32.mrb[25].mxu1  ;;  %v2547_v6 = vadd.f32 %v2546_v47, %v2545_v7  ;;  %v2548_v45 = vpop.f32.mrb[26].mxu0 }
 0x12d   : > { %v2611_v53 = vadd.f32 %v2610_v19, %v2609_v35  ;;  %v2612_v8 = vpop.f32.mrb[26].mxu1  ;;  %v2549_v62 = vpop.f32.mrb[27].mxu0 }
 0x12e   : > { %v2613_v17 = vpop.f32.mrb[27].mxu1  ;;  %v1640_v9 = vadd.f32 %v2547_v6, %v3552_v27  ;;  %v2550_v26 = vadd.f32 %v2549_v62, %v2548_v45 }
 0x12f   : > { %v2614_v10 = vadd.f32 %v2613_v17, %v2612_v8 }
 0x130   : > { %v3591_v57 = vadd.f32 %v2611_v53, %v1640_v9  ;;  %v1643_v12 = vadd.f32 %v2550_v26, %v3552_v27 }
 0x132   : > { %v3594_v49 = vadd.f32 %v2614_v10, %v1643_v12  ;;  %v2551_v15 = vpop.f32.mrb[28].mxu0 }
 0x133   : > { %v2615_v34 = vpop.f32.mrb[28].mxu1  ;;  %v2552_v16 = vpop.f32.mrb[29].mxu0 }
 0x134   : > { %v2616_v14 = vpop.f32.mrb[29].mxu1  ;;  %v2553_v0 = vadd.f32 %v2552_v16, %v2551_v15  ;;  %v2554_v21 = vpop.f32.mrb[30].mxu0 }
 0x135   : > { %v2617_v40 = vadd.f32 %v2616_v14, %v2615_v34  ;;  %v2618_v41 = vpop.f32.mrb[30].mxu1  ;;  %v2555_v11 = vpop.f32.mrb[31].mxu0 }
 0x136   : > { %v2619_v43 = vpop.f32.mrb[31].mxu1  ;;  %v1648_v2 = vadd.f32 %v2553_v0, %v3552_v27  ;;  %v2556_v28 = vadd.f32 %v2555_v11, %v2554_v21 }
 0x137   : > { %v2620_v24 = vadd.f32 %v2619_v43, %v2618_v41 }
 0x138   : > { %v3597_v30 = vadd.f32 %v2617_v40, %v1648_v2  ;;  %v1651_v37 = vadd.f32 %v2556_v28, %v3552_v27 }
 0x13a   : > { %v3600_v36 = vadd.f32 %v2620_v24, %v1651_v37  ;;  %v2637_v39 = vpop.f32.mrb[32].mxu0 }
 0x13b   : > { %v2701_v31 = vpop.f32.mrb[32].mxu1  ;;  %v2638_v44 = vpop.f32.mrb[33].mxu0 }
 0x13c   : > { %v2702_v32 = vpop.f32.mrb[33].mxu1  ;;  %v2639_v25 = vadd.f32 %v2638_v44, %v2637_v39  ;;  %v2640_v42 = vpop.f32.mrb[34].mxu0 }
 0x13d   : > { %v2703_v33 = vadd.f32 %v2702_v32, %v2701_v31  ;;  %v2704_v38 = vpop.f32.mrb[34].mxu1  ;;  %v2641_v50 = vpop.f32.mrb[35].mxu0 }
 0x13e   : > { %v2705_v22 = vpop.f32.mrb[35].mxu1  ;;  %v1786_v51 = vadd.f32 %v2639_v25, %v3555_v13  ;;  %v2642_v52 = vadd.f32 %v2641_v50, %v2640_v42 }
 0x13f   : > { %v2706_v48 = vadd.f32 %v2705_v22, %v2704_v38 }
 0x140   : > { %v1789_v54 = vadd.f32 %v2642_v52, %v3558_v3  ;;  %v3604_v27 = vadd.f32 %v2703_v33, %v1786_v51 }
 0x142   : > { %v2643_v20 = vpop.f32.mrb[36].mxu0  ;;  %v3606_v35 = vadd.f32 %v2706_v48, %v1789_v54 }
 0x143   : > { %v2707_v55 = vpop.f32.mrb[36].mxu1  ;;  %v2644_v19 = vpop.f32.mrb[37].mxu0 }
 0x144   : > { %v2708_v59 = vpop.f32.mrb[37].mxu1  ;;  %v2645_v53 = vadd.f32 %v2644_v19, %v2643_v20  ;;  %v2646_v8 = vpop.f32.mrb[38].mxu0 }
 0x145   : > { %v2709_v61 = vadd.f32 %v2708_v59, %v2707_v55  ;;  %v2710_v29 = vpop.f32.mrb[38].mxu1  ;;  %v2647_v17 = vpop.f32.mrb[39].mxu0 }
 0x146   : > { %v2711_v7 = vpop.f32.mrb[39].mxu1  ;;  %v1794_v13 = vadd.f32 %v2645_v53, %v3561_v56  ;;  %v2648_v6 = vadd.f32 %v2647_v17, %v2646_v8 }
 0x147   : > { %v2712_v47 = vadd.f32 %v2711_v7, %v2710_v29 }
 0x148   : > { %v1797_v3 = vadd.f32 %v2648_v6, %v3564_v63  ;;  %v3610_v10 = vadd.f32 %v2709_v61, %v1794_v13 }
 0x14a   : > { %v2649_v9 = vpop.f32.mrb[40].mxu0  ;;  %v3612_v34 = vadd.f32 %v2712_v47, %v1797_v3 }
 0x14b   : > { %v2713_v45 = vpop.f32.mrb[40].mxu1  ;;  %v2650_v14 = vpop.f32.mrb[41].mxu0 }
 0x14c   : > { %v2714_v62 = vpop.f32.mrb[41].mxu1  ;;  %v2651_v40 = vadd.f32 %v2650_v14, %v2649_v9  ;;  %v2652_v41 = vpop.f32.mrb[42].mxu0 }
 0x14d   : > { %v2715_v26 = vadd.f32 %v2714_v62, %v2713_v45  ;;  %v2716_v12 = vpop.f32.mrb[42].mxu1  ;;  %v2653_v43 = vpop.f32.mrb[43].mxu0 }
 0x14e   : > { %v2717_v15 = vpop.f32.mrb[43].mxu1  ;;  %v1802_v56 = vadd.f32 %v2651_v40, %v3567_v58  ;;  %v2654_v0 = vadd.f32 %v2653_v43, %v2652_v41 }
 0x14f   : > { %v2718_v16 = vadd.f32 %v2717_v15, %v2716_v12 }
 0x150   : > { %v1805_v63 = vadd.f32 %v2654_v0, %v3570_v60  ;;  %v3616_v24 = vadd.f32 %v2715_v26, %v1802_v56 }
 0x152   : > { %v2655_v2 = vpop.f32.mrb[44].mxu0  ;;  %v3618_v31 = vadd.f32 %v2718_v16, %v1805_v63 }
 0x153   : > { %v2719_v21 = vpop.f32.mrb[44].mxu1  ;;  %v2656_v32 = vpop.f32.mrb[45].mxu0 }
 0x154   : > { %v2720_v11 = vpop.f32.mrb[45].mxu1  ;;  %v2657_v33 = vadd.f32 %v2656_v32, %v2655_v2  ;;  %v2658_v38 = vpop.f32.mrb[46].mxu0 }
 0x155   : > { %v2721_v28 = vadd.f32 %v2720_v11, %v2719_v21  ;;  %v2722_v37 = vpop.f32.mrb[46].mxu1  ;;  %v2659_v22 = vpop.f32.mrb[47].mxu0 }
 0x156   : > { %v2723_v39 = vpop.f32.mrb[47].mxu1  ;;  %v1810_v58 = vadd.f32 %v2657_v33, %v3573_v18  ;;  %v2660_v25 = vadd.f32 %v2659_v22, %v2658_v38 }
 0x157   : > { %v2724_v44 = vadd.f32 %v2723_v39, %v2722_v37 }
 0x158   : > { %v1813_v60 = vadd.f32 %v2660_v25, %v3576_v23  ;;  %v3622_v48 = vadd.f32 %v2721_v28, %v1810_v58 }
 0x15a   : > { %v2661_v51 = vpop.f32.mrb[48].mxu0  ;;  %v3624_v55 = vadd.f32 %v2724_v44, %v1813_v60 }
 0x15b   : > { %v2725_v42 = vpop.f32.mrb[48].mxu1  ;;  %v2662_v59 = vpop.f32.mrb[49].mxu0 }
 0x15c   : > { %v2726_v50 = vpop.f32.mrb[49].mxu1  ;;  %v2663_v61 = vadd.f32 %v2662_v59, %v2661_v51  ;;  %v2664_v29 = vpop.f32.mrb[50].mxu0 }
 0x15d   : > { %v2727_v52 = vadd.f32 %v2726_v50, %v2725_v42  ;;  %v2728_v54 = vpop.f32.mrb[50].mxu1  ;;  %v2665_v7 = vpop.f32.mrb[51].mxu0 }
 0x15e   : > { %v2729_v20 = vpop.f32.mrb[51].mxu1  ;;  %v1818_v18 = vadd.f32 %v2663_v61, %v3579_v5  ;;  %v2666_v53 = vadd.f32 %v2665_v7, %v2664_v29 }
 0x15f   : > { %v2730_v19 = vadd.f32 %v2729_v20, %v2728_v54 }
 0x160   : > { %v1821_v23 = vadd.f32 %v2666_v53, %v3582_v46  ;;  %v1915_v47 = vadd.f32 %v2727_v52, %v1818_v18 }
 0x162   : > { %v2667_v13 = vpop.f32.mrb[52].mxu0  ;;  %v1918_v45 = vadd.f32 %v2730_v19, %v1821_v23 }
 0x163   : > { %v2731_v8 = vpop.f32.mrb[52].mxu1  ;;  %v2668_v62 = vpop.f32.mrb[53].mxu0 }
 0x164   : > { %v2732_v17 = vpop.f32.mrb[53].mxu1  ;;  %v2669_v26 = vadd.f32 %v2668_v62, %v2667_v13  ;;  %v2670_v12 = vpop.f32.mrb[54].mxu0 }
 0x165   : > { %v2733_v6 = vadd.f32 %v2732_v17, %v2731_v8  ;;  %v2734_v3 = vpop.f32.mrb[54].mxu1  ;;  %v2671_v15 = vpop.f32.mrb[55].mxu0 }
 0x166   : > { %v2735_v9 = vpop.f32.mrb[55].mxu1  ;;  %v1826_v40 = vadd.f32 %v2669_v26, %v3585_v1  ;;  %v2672_v41 = vadd.f32 %v2671_v15, %v2670_v12 }
 0x167   : > { %v2736_v14 = vadd.f32 %v2735_v9, %v2734_v3 }
 0x168   : > { %v1829_v5 = vadd.f32 %v2672_v41, %v3588_v4  ;;  %v1923_v46 = vadd.f32 %v2733_v6, %v1826_v40 }
 0x16a   : > { %v2673_v56 = vpop.f32.mrb[56].mxu0  ;;  %v1926_v21 = vadd.f32 %v2736_v14, %v1829_v5 }
 0x16b   : > { %v2737_v16 = vpop.f32.mrb[56].mxu1  ;;  %v2674_v11 = vpop.f32.mrb[57].mxu0 }
 0x16c   : > { %v2738_v43 = vpop.f32.mrb[57].mxu1  ;;  %v2675_v28 = vadd.f32 %v2674_v11, %v2673_v56  ;;  %v2676_v37 = vpop.f32.mrb[58].mxu0 }
 0x16d   : > { %v2739_v0 = vadd.f32 %v2738_v43, %v2737_v16  ;;  %v2740_v63 = vpop.f32.mrb[58].mxu1  ;;  %v2677_v39 = vpop.f32.mrb[59].mxu0 }
 0x16e   : > { %v2741_v2 = vpop.f32.mrb[59].mxu1  ;;  %v1834_v33 = vadd.f32 %v2675_v28, %v3591_v57  ;;  %v2678_v1 = vadd.f32 %v2677_v39, %v2676_v37 }
 0x16f   : > { %v2742_v32 = vadd.f32 %v2741_v2, %v2740_v63 }
 0x170   : > { %v1837_v38 = vadd.f32 %v2678_v1, %v3594_v49  ;;  %v1931_v44 = vadd.f32 %v2739_v0, %v1834_v33 }
 0x172   : > { %v2679_v58 = vpop.f32.mrb[60].mxu0  ;;  %v1934_v42 = vadd.f32 %v2742_v32, %v1837_v38 }
 0x173   : > { %v2743_v4 = vpop.f32.mrb[60].mxu1  ;;  %v2680_v50 = vpop.f32.mrb[61].mxu0 }
 0x174   : > { %v2744_v22 = vpop.f32.mrb[61].mxu1  ;;  %v2681_v52 = vadd.f32 %v2680_v50, %v2679_v58  ;;  %v2682_v54 = vpop.f32.mrb[62].mxu0 }
 0x175   : > { %v2745_v25 = vadd.f32 %v2744_v22, %v2743_v4  ;;  %v2746_v60 = vpop.f32.mrb[62].mxu1  ;;  %v2683_v20 = vpop.f32.mrb[63].mxu0 }
 0x176   : > { %v2747_v51 = vpop.f32.mrb[63].mxu1  ;;  %v1842_v57 = vadd.f32 %v2681_v52, %v3597_v30  ;;  %v2684_v61 = vadd.f32 %v2683_v20, %v2682_v54 }
 0x177   : > { %v2748_v59 = vadd.f32 %v2747_v51, %v2746_v60 }
 0x178   : > { %v1845_v49 = vadd.f32 %v2684_v61, %v3600_v36  ;;  %v1939_v19 = vadd.f32 %v2745_v25, %v1842_v57 }
 0x17a   : > { %v2783_v53 = vpop.f32.mrb[64].mxu0  ;;  %v1942_v17 = vadd.f32 %v2748_v59, %v1845_v49 }
 0x17b   : > { %v2791_v29 = vpop.f32.mrb[64].mxu1  ;;  %v1988_v13 = vadd.f32 %v2783_v53, %v3610_v10  ;;  %v1979_v6 = vpop.f32.mrb[65].mxu0 }
 0x17c   : > { %v2020_v7 = vadd.f32 %v2791_v29, %v1923_v46  ;;  %v2011_v18 = vpop.f32.mrb[65].mxu1  ;;  %v1980_v30 = vadd.f32 %v1979_v6, %v3604_v27  ;;  %v2784_v9 = vpop.f32.mrb[66].mxu0 }
 0x17d   : > { %v2012_v23 = vadd.f32 %v2011_v18, %v1915_v47  ;;  %v2792_v8 = vpop.f32.mrb[66].mxu1  ;;  %v1991_v36 = vadd.f32 %v2784_v9, %v3612_v34  ;;  %v1982_v15 = vpop.f32.mrb[67].mxu0  ;;  %v2044_v41 = vmax.f32 %v1988_v13, 0.0 }
 0x17e   : > { %v2023_v3 = vadd.f32 %v2792_v8, %v1926_v21  ;;  %v2014_v62 = vpop.f32.mrb[67].mxu1  ;;  %v2052_v12 = vmax.f32 %v2020_v7, 0.0  ;;  %v1983_v10 = vadd.f32 %v1982_v15, %v3606_v35  ;;  %v2042_v5 = vmax.f32 %v1980_v30, 0.0 }
 0x17f   : > { %v2015_v26 = vadd.f32 %v2014_v62, %v1918_v45  ;;  %v2050_v40 = vmax.f32 %v2012_v23, 0.0  ;;  %v2045_v27 = vmax.f32 %v1991_v36, 0.0 }
 0x180   : > { %v2053_v14 = vmax.f32 %v2023_v3, 0.0  ;;  %v2043_v16 = vmax.f32 %v1983_v10, 0.0 }
 0x181   : > { %v2051_v47 = vmax.f32 %v2015_v26, 0.0  ;;  %v2454_v43 = vpack.c.bf16 %v2045_v27, %v2044_v41 }
 0x182   : > { %v2474_v45 = vpack.c.bf16 %v2053_v14, %v2052_v12  ;;  %v2449_v63 = vpack.c.bf16 %v2043_v16, %v2042_v5  ;;  %v2787_v21 = vpop.f32.mrb[68].mxu0 }
 0x183   : > { %v2469_v34 = vpack.c.bf16 %v2051_v47, %v2050_v40  ;;  %v2795_v46 = vpop.f32.mrb[68].mxu1  ;;  %2486 = vst [vmem:[%s3642_s21 + $0x8] sm:$0xff] %v2454_v43   ;;  %v2004_v35 = vadd.f32 %v2787_v21, %v3622_v48  ;;  %v1995_v28 = vpop.f32.mrb[69].mxu0 }
 0x184   : > { %2490 = vst [vmem:[%s3642_s21 + $0x28] sm:$0xff] %v2474_v45   ;;  %v2036_v56 = vadd.f32 %v2795_v46, %v1939_v19  ;;  %v2027_v0 = vpop.f32.mrb[69].mxu1  ;;  %2450 = vst [vmem:[%s3642_s21] sm:$0xff] %v2449_v63   ;;  %v1996_v39 = vadd.f32 %v1995_v28, %v3616_v24  ;;  %v2788_v33 = vpop.f32.mrb[70].mxu0 }
 0x185   : > { %2489 = vst [vmem:[%s3642_s21 + $0x20] sm:$0xff] %v2469_v34   ;;  %v2028_v11 = vadd.f32 %v2027_v0, %v1931_v44  ;;  %v2796_v2 = vpop.f32.mrb[70].mxu1  ;;  %v2007_v4 = vadd.f32 %v2788_v33, %v3624_v55  ;;  %v1998_v44 = vpop.f32.mrb[71].mxu0  ;;  %v2048_v60 = vmax.f32 %v2004_v35, 0.0 }
 0x186   : > { %v2039_v37 = vadd.f32 %v2796_v2, %v1942_v17  ;;  %v2030_v32 = vpop.f32.mrb[71].mxu1  ;;  %v2056_v38 = vmax.f32 %v2036_v56, 0.0  ;;  %v1999_v48 = vadd.f32 %v1998_v44, %v3618_v31  ;;  %v2046_v52 = vmax.f32 %v1996_v39, 0.0 }
 0x187   : > { %v2031_v1 = vadd.f32 %v2030_v32, %v1934_v42  ;;  %v2054_v58 = vmax.f32 %v2028_v11, 0.0  ;;  %v2049_v50 = vmax.f32 %v2007_v4, 0.0 }
 0x188   : > { %v2057_v22 = vmax.f32 %v2039_v37, 0.0  ;;  %v2047_v24 = vmax.f32 %v1999_v48, 0.0 }
 0x189   : > { %v2055_v25 = vmax.f32 %v2031_v1, 0.0  ;;  %v2464_v59 = vpack.c.bf16 %v2049_v50, %v2048_v60 }
 0x18a   : > { %v2484_v51 = vpack.c.bf16 %v2057_v22, %v2056_v38  ;;  %v2459_v42 = vpack.c.bf16 %v2047_v24, %v2046_v52 }
 0x18b   : > { %v2479_v54 = vpack.c.bf16 %v2055_v25, %v2054_v58  ;;  %2488 = vst [vmem:[%s3642_s21 + $0x18] sm:$0xff] %v2464_v59  }
 0x18c   : > { %2492 = vst [vmem:[%s3642_s21 + $0x38] sm:$0xff] %v2484_v51   ;;  %2487 = vst [vmem:[%s3642_s21 + $0x10] sm:$0xff] %v2459_v42  }
 0x18d   : > { %2491 = vst [vmem:[%s3642_s21 + $0x30] sm:$0xff] %v2479_v54  }
 0x18e PF: > { %s13_s12 = sadd.s32 1, %s2972_s12  }
 0x18f   : > { %p10_p5 = scmp.ge.s32.totalorder %s13_s12, 6  }
 0x191   :  { %12 = sbr.rel (!%p10_p5) target bundleno = 1 (0x1), region = 64 }

// kernel: decoder_block.3
= control target key start
LH: loop header
LB: loop body
LE: loop exit
PB: predicated region body
PF: predicated region fallthrough
CT: control target
= control target key end

     0   :  { %s3140_s18 = smov 0   ;;  %s3848_s0 = inlined_call_operand.vmem [shape: bf16[24,3,18,128], index: 0, kind: input, shape index: {}]   ;;  %s3849_s1 = inlined_call_operand.vmem [shape: bf16[1152,128], index: 1, kind: input, shape index: {}]   ;;  %s3850_s2 = inlined_call_operand.vmem [shape: f32[1,128], index: 2, kind: input, shape index: {}]   ;;  %s3851_s3 = inlined_call_operand.vmem [shape: bf16[128,128], index: 3, kind: input, shape index: {}]   ;;  %s3852_s4 = inlined_call_operand.vmem [shape: f32[1,128], index: 4, kind: input, shape index: {}]   ;;  %s3853_s5 = inlined_call_operand.vmem [shape: f32[384,128], index: 5, kind: output, shape index: {}]  }
   0x1 LB: > { %s2360_s19 = sadd.s32 4294967295, %s3108_s18   ;;  %p2364_p0 = scmp.ge.s32.totalorder %s3108_s18, 1  ;;  %s3108_s18 = sphi %s3140_s18, %s15_s18  }
   0x2   : > { %p189_p1 = scmp.lt.s32.totalorder %s3108_s18, 4 }
   0x4   : > { %p190_p2 = pnand %p2364_p0, %p189_p1 }
   0x5   : > { %v2950_v0 = vld [vmem:[%s3849_s1 + $0x40] sm:$0xff] (!%p190_p2)   ;;  %v2954_v4 = vld [vmem:[%s3849_s1 + $0x48] sm:$0xff] (!%p190_p2)   ;;  %v2958_v8 = vld [vmem:[%s3849_s1 + $0x50] sm:$0xff] (!%p190_p2)   ;;  %s2365_s25 = sshll.u32 (!%p190_p2), %s2360_s19, 3  ;;  %vm402_vm0 = vsmask.f32 (!%p190_p2), 7424 }
   0x6   : > { %193 = sbr.rel (%p190_p2) target bundleno = 630 (0x276), region = 40  ;;  %v2951_v1 = vld [vmem:[%s3849_s1] sm:$0xff] (!%p190_p2)   ;;  %2589 = vmatprep.subr.bf16.mxu0 (!%p190_p2), %v2950_v0  ;;  %v2955_v5 = vld [vmem:[%s3849_s1 + $0x8] sm:$0xff] (!%p190_p2)   ;;  %v2959_v9 = vld [vmem:[%s3849_s1 + $0x10] sm:$0xff] (!%p190_p2)   ;;  %p219_p3 = scmp.lt.s32.totalorder (!%p190_p2), %s2365_s25, 23  ;;  %vm531_vm1 = vcmask (!%p190_p2), 1046528  }
   0x7   : > { %v2952_v2 = vld [vmem:[%s3849_s1 + $0xc0] sm:$0xff] (!%p190_p2)   ;;  %2590 = vmatpush3.bf16.msra.mxu0 (!%p190_p2), %v2951_v1  ;;  %v2956_v6 = vld [vmem:[%s3849_s1 + $0xc8] sm:$0xff] (!%p190_p2)   ;;  %v2960_v10 = vld [vmem:[%s3849_s1 + $0xd0] sm:$0xff] (!%p190_p2)   ;;  %s2367_s30 = sshll.u32 (!%p190_p2), %s2360_s19, 4 }
   0x8   : > { %v2953_v3 = vld [vmem:[%s3849_s1 + $0x80] sm:$0xff] (!%p190_p2)   ;;  %2653 = vmatprep.subr.bf16.mxu1 (!%p190_p2), %v2952_v2  ;;  %2591 = vmatprep.subr.bf16.mxu0 (!%p190_p2), %v2954_v4  ;;  %v2957_v7 = vld [vmem:[%s3849_s1 + $0x88] sm:$0xff] (!%p190_p2)   ;;  %v2961_v11 = vld [vmem:[%s3849_s1 + $0x90] sm:$0xff] (!%p190_p2)   ;;  %p226_p4 = scmp.lt.s32.totalorder (!%p190_p2), %s2367_s30, 47 }
   0x9   : > { %2654 = vmatpush3.bf16.msra.mxu1 (!%p190_p2), %v2953_v3  ;;  %v2962_v12 = vld [vmem:[%s3849_s1 + $0x58] sm:$0xff] (!%p190_p2)   ;;  %v2966_v16 = vld [vmem:[%s3849_s1 + $0x60] sm:$0xff] (!%p190_p2)   ;;  %v2970_v20 = vld [vmem:[%s3849_s1 + $0x68] sm:$0xff] (!%p190_p2)  }
   0xa   : > { %2655 = vmatprep.subr.bf16.mxu1 (!%p190_p2), %v2956_v6  ;;  %v2963_v13 = vld [vmem:[%s3849_s1 + $0x18] sm:$0xff] (!%p190_p2)   ;;  %v2967_v17 = vld [vmem:[%s3849_s1 + $0x20] sm:$0xff] (!%p190_p2)   ;;  %v2971_v21 = vld [vmem:[%s3849_s1 + $0x28] sm:$0xff] (!%p190_p2)  }
   0xb   : > { %2592 = vmatpush3.bf16.msra.mxu0 (!%p190_p2), %v2955_v5  ;;  %v2964_v14 = vld [vmem:[%s3849_s1 + $0xd8] sm:$0xff] (!%p190_p2)   ;;  %v2968_v18 = vld [vmem:[%s3849_s1 + $0xe0] sm:$0xff] (!%p190_p2)   ;;  %v2972_v22 = vld [vmem:[%s3849_s1 + $0xe8] sm:$0xff] (!%p190_p2)  }
   0xc   : > { %2593 = vmatprep.subr.bf16.mxu0 (!%p190_p2), %v2958_v8  ;;  %v2965_v15 = vld [vmem:[%s3849_s1 + $0x98] sm:$0xff] (!%p190_p2)   ;;  %v2969_v19 = vld [vmem:[%s3849_s1 + $0xa0] sm:$0xff] (!%p190_p2)   ;;  %v2973_v23 = vld [vmem:[%s3849_s1 + $0xa8] sm:$0xff] (!%p190_p2)  }
   0xd   : > { %2656 = vmatpush3.bf16.msra.mxu1 %v2957_v7  ;;  %s3855_s25 = smov (!%p219_p3, %s2365_s25), 23  ;;  %v2974_v24 = vld [vmem:[%s3849_s1 + $0x70] sm:$0xff]   ;;  %v2978_v28 = vld [vmem:[%s3849_s1 + $0x78] sm:$0xff]   ;;  %v2984_v39 = vld [vmem:[%s3849_s1 + $0x140] sm:$0xff]   ;;  %s3857_s30 = smov (!%p226_p4, %s2367_s30), 47 }
   0xe   : > { %2657 = vmatprep.subr.bf16.mxu1 %v2960_v10  ;;  %s2941_s26 = smul.u32 36, %s3855_s25  ;;  %v2975_v25 = vld [vmem:[%s3849_s1 + $0x30] sm:$0xff]   ;;  %v2979_v29 = vld [vmem:[%s3849_s1 + $0x38] sm:$0xff]   ;;  %v2987_v51 = vld [vmem:[%s3849_s1 + $0x100] sm:$0xff]   ;;  %s2368_s6 = sshll.u32 %s3857_s30, 3 }
   0xf   : > { %2594 = vmatpush3.bf16.msra.mxu0 %v2959_v9  ;;  %v2976_v26 = vld [vmem:[%s3849_s1 + $0xf0] sm:$0xff]   ;;  %v2980_v30 = vld [vmem:[%s3849_s1 + $0xf8] sm:$0xff]   ;;  %v2991_v56 = vld [vmem:[%s3849_s1 + $0x148] sm:$0xff]   ;;  %s3827_s10 = scalar_lea.vmem %s3853_s5, %s2368_s6 }
  0x10   : > { %2595 = vmatprep.subr.bf16.mxu0 %v2962_v12  ;;  %v2977_v27 = vld [vmem:[%s3849_s1 + $0xb0] sm:$0xff]   ;;  %s3240_s11 = scalar_lea.vmem %s3848_s0, %s2941_s26  ;;  %v2983_v35 = vld [vmem:[%s3849_s1 + $0xb8] sm:$0xff]   ;;  %v2994_v2 = vld [vmem:[%s3849_s1 + $0x108] sm:$0xff]  }
  0x11   : > { %2658 = vmatpush3.bf16.msra.mxu1 %v2961_v11  ;;  %v232_v31 = vld [vmem:[%s3240_s11] sm:$0xf]  ;;  %v233_v32 = vld [vmem:[%s3240_s11 + $0x4] sm:$0xf]  ;;  %v2369_v40 = vld [vmem:[%s3240_s11 + $0xc] sm:$0xf] }
  0x12   : > { %2659 = vmatprep.subr.bf16.mxu1 %v2964_v14  ;;  %v2433_v33 = vcombine.low %v232_v31, %v233_v32  ;;  %v2982_v34 = vld [vmem:[%s3240_s11 + $0x8] ss:$0 sps:$4 sm:$0x11]   ;;  %v3259_v41 = vld [vmem:[%s3240_s11 + $0x10] sm:$0xf]  ;;  %v3011_v31 = vld [vmem:[%s3849_s1 + $0x180] sm:$0xff]  }
  0x13   : > { %2596 = vmatpush3.bf16.msra.mxu0 %v2963_v13  ;;  %v411_v38 = vshll.u32 %v2982_v34, 16  ;;  %v3262_v44 = vcombine.low %v2369_v40, %v3259_v41  ;;  %v256_v45 = vld [vmem:[%s3240_s11] sm:$0xe]  ;;  %v234_v46 = vld [vmem:[%s3240_s11 + $0x24] sm:$0xf]  ;;  %v533_v49 = vrot.slane %v2982_v34, 1 }
  0x14   : > { %2597 = vmatprep.subr.bf16.mxu0 %v2966_v16  ;;  %v404_v36 = vshrl.u32 %v2433_v33, 16  ;;  %v406_v37 = vshll.u32 %v2433_v33, 16  ;;  %v2449_v48 = vcombine.low %v256_v45, %v233_v32  ;;  %v235_v50 = vld [vmem:[%s3240_s11 + $0x28] sm:$0xf]  ;;  %v2371_v57 = vld [vmem:[%s3240_s11 + $0x30] sm:$0xf] }
  0x15   : > { %2660 = vmatpush3.bf16.msra.mxu1 %v2965_v15  ;;  %v413_v43 = vrot.slane %v411_v38, 1  ;;  %1740 = vmatprep.mubr.bf16.mxu1 %v3262_v44  ;;  %v2434_v52 = vcombine.low %v234_v46, %v235_v50  ;;  %v2990_v53 = vld [vmem:[%s3240_s11 + $0x2c] ss:$0 sps:$4 sm:$0x11]   ;;  %v3278_v61 = vld [vmem:[%s3240_s11 + $0x34] sm:$0xf] }
  0x16   : > { %2661 = vmatprep.subr.bf16.mxu1 %v2968_v18  ;;  %v408_v42 = vrot.slane %v406_v37, 1  ;;  %v532_v55 = vrot.slane %v2449_v48, 1  ;;  %v423_v60 = vshll.u32 %v2990_v53, 16  ;;  %v3282_v63 = vcombine.low %v2371_v57, %v3278_v61  ;;  %v257_v3 = vld [vmem:[%s3240_s11 + $0x24] sm:$0xe]  ;;  %v2998_v8 = vld [vmem:[%s3849_s1 + $0x150] sm:$0xff]  }
  0x17   : > { %2598 = vmatpush3.bf16.msra.mxu0 %v2967_v17  ;;  %v416_v58 = vshrl.u32 %v2434_v52, 16  ;;  %v418_v59 = vshll.u32 %v2434_v52, 16  ;;  %v2450_v4 = vcombine.low %v257_v3, %v235_v50  ;;  %v536_v5 = vrot.slane %v2990_v53, 1  ;;  %v236_v6 = vld [vmem:[%s3240_s11 + $0x48] sm:$0xf]  ;;  %v3001_v13 = vld [vmem:[%s3849_s1 + $0x110] sm:$0xff]  }
  0x18   : > { %2599 = vmatprep.subr.bf16.mxu0 %v2970_v20  ;;  %v409_v47 = vor.u32 %v408_v42, %v404_v36  ;;  %v534_v62 = vsel %vm531_vm1, %v532_v55, %v533_v49  ;;  %v425_v1 = vrot.slane %v423_v60, 1  ;;  %v237_v7 = vld [vmem:[%s3240_s11 + $0x4c] sm:$0xf]  ;;  %v2997_v11 = vld [vmem:[%s3240_s11 + $0x50] ss:$0 sps:$4 sm:$0x11]  }
  0x19   : > { %2662 = vmatpush3.bf16.msra.mxu1 %v2969_v19  ;;  %v420_v0 = vrot.slane %v418_v59, 1  ;;  %v2435_v10 = vcombine.low %v236_v6, %v237_v7  ;;  %v535_v12 = vrot.slane %v2450_v4, 1  ;;  %v435_v17 = vshll.u32 %v2997_v11, 16  ;;  %v2373_v18 = vld [vmem:[%s3240_s11 + $0x54] sm:$0xf]  ;;  %v3010_v19 = vld [vmem:[%s3849_s1 + $0x1c0] sm:$0xff]  }
  0x1a   : > { %2663 = vmatprep.subr.bf16.mxu1 %v2972_v22  ;;  %v414_v54 = vsel %vm402_vm0, %v409_v47, %v413_v43  ;;  %v3005_v22 = vld [vmem:[%s3849_s1 + $0x158] sm:$0xff]   ;;  %v3014_v37 = vld [vmem:[%s3849_s1 + $0x160] sm:$0xff]   ;;  %v259_v49 = vld [vmem:[%s3240_s11 + $0x6c] sm:$0xe] }
  0x1b   : > { %2600 = vmatpush3.bf16.msra.mxu0 %v2971_v21  ;;  %1643 = vmatprep.mubr.bf16.mxu0 %v414_v54  ;;  %v421_v9 = vor.u32 %v420_v0, %v416_v58  ;;  %v428_v15 = vshrl.u32 %v2435_v10, 16  ;;  %v430_v16 = vshll.u32 %v2435_v10, 16  ;;  %v537_v20 = vsel %vm531_vm1, %v535_v12, %v536_v5  ;;  %v3305_v21 = vld [vmem:[%s3240_s11 + $0x58] sm:$0xf]  ;;  %v3330_v45 = vld [vmem:[%s3240_s11 + $0x7c] sm:$0xf] }
  0x1c   : > { %2601 = vmatprep.subr.bf16.mxu0 %v2974_v24  ;;  %v437_v24 = vrot.slane %v435_v17, 1  ;;  %v2375_v43 = vld [vmem:[%s3240_s11 + $0x78] sm:$0xf]  ;;  %v3017_v46 = vld [vmem:[%s3849_s1 + $0x120] sm:$0xff]   ;;  %v3019_v53 = vld [vmem:[%s3849_s1 + $0x1c8] sm:$0xff]  }
  0x1d   : > { %2664 = vmatpush3.bf16.msra.mxu1 %v2973_v23  ;;  %v426_v14 = vsel %vm402_vm0, %v421_v9, %v425_v1  ;;  %v432_v23 = vrot.slane %v430_v16, 1  ;;  %v240_v58 = vld [vmem:[%s3240_s11 + $0x90] sm:$0xf]  ;;  %v241_v59 = vld [vmem:[%s3240_s11 + $0x94] sm:$0xf]  ;;  %v3023_v60 = vld [vmem:[%s3849_s1 + $0x168] sm:$0xff]  }
  0x1e   : > { %2665 = vmatprep.subr.bf16.mxu1 %v2976_v26  ;;  %v258_v26 = vld [vmem:[%s3240_s11 + $0x48] sm:$0xe]  ;;  %v2437_v0 = vcombine.low %v240_v58, %v241_v59  ;;  %v3013_v1 = vld [vmem:[%s3240_s11 + $0x98] ss:$0 sps:$4 sm:$0x11]  }
  0x1f   : > { %2602 = vmatpush3.bf16.msra.mxu0 %v2975_v25  ;;  %v3311_v25 = vcombine.low %v2373_v18, %v3305_v21  ;;  %v433_v32 = vor.u32 %v432_v23, %v428_v15  ;;  %v2377_v3 = vld [vmem:[%s3240_s11 + $0x9c] sm:$0xf]  ;;  %v459_v6 = vshll.u32 %v3013_v1, 16  ;;  %v242_v16 = vld [vmem:[%s3240_s11 + $0xb4] sm:$0xf]  ;;  %v545_v23 = vrot.slane %v3013_v1, 1 }
  0x20   : > { %2603 = vmatprep.subr.bf16.mxu0 %v2978_v28  ;;  %v2451_v28 = vcombine.low %v258_v26, %v237_v7  ;;  %v452_v4 = vshrl.u32 %v2437_v0, 16  ;;  %v454_v5 = vshll.u32 %v2437_v0, 16  ;;  %v3359_v7 = vld [vmem:[%s3240_s11 + $0xa0] sm:$0xf]  ;;  %v243_v17 = vld [vmem:[%s3240_s11 + $0xb8] sm:$0xf] }
  0x21   : > { %2666 = vmatpush3.bf16.msra.mxu1 %v2977_v27  ;;  %v3008_v27 = vld [vmem:[%s3849_s1 + $0x118] sm:$0xff]   ;;  %v438_v38 = vsel %vm402_vm0, %v433_v32, %v437_v24  ;;  %v461_v9 = vrot.slane %v459_v6, 1  ;;  %v3364_v12 = vcombine.low %v2377_v3, %v3359_v7  ;;  %v2438_v18 = vcombine.low %v242_v16, %v243_v17  ;;  %v3039_v3 = vld [vmem:[%s3849_s1 + $0x1e0] sm:$0xff]   ;;  %v3044_v16 = vld [vmem:[%s3849_s1 + $0x1a8] sm:$0xff]  }
  0x22   : > { %2667 = vmatprep.subr.bf16.mxu1 %v2980_v30  ;;  %v239_v30 = vld [vmem:[%s3240_s11 + $0x70] sm:$0xf]  ;;  %v538_v36 = vrot.slane %v2451_v28, 1  ;;  %v2379_v28 = vld [vmem:[%s3240_s11 + $0xc0] sm:$0xf] }
  0x23   : > { %2604 = vmatpush3.bf16.msra.mxu0 %v2979_v29  ;;  %v238_v29 = vld [vmem:[%s3240_s11 + $0x6c] sm:$0xf]  ;;  %v464_v24 = vshrl.u32 %v2438_v18, 16  ;;  %v466_v26 = vshll.u32 %v2438_v18, 16  ;;  %v3040_v6 = vld [vmem:[%s3849_s1 + $0x1a0] sm:$0xff]  }
  0x24   : > { %2717 = vmatprep.subr.bf16.mxu0 %v2984_v39  ;;  %v2436_v34 = vcombine.low %v238_v29, %v239_v30  ;;  %v3029_v29 = vld [vmem:[%s3849_s1 + $0x190] sm:$0xff]  }
  0x25   : > { %2668 = vmatpush3.bf16.msra.mxu1 %v2983_v35  ;;  %v3004_v35 = vld [vmem:[%s3240_s11 + $0x74] ss:$0 sps:$4 sm:$0x11]  }
  0x26   : > { %1644 = vmatmul.mubr.bf16.vlgmr.msra.gmra.mrb[0].mxu0 %v2433_v33  ;;  %2781 = vmatprep.subr.bf16.mxu1 %v3010_v19  ;;  %v539_v33 = vrot.slane %v2997_v11, 1  ;;  %v440_v39 = vshrl.u32 %v2436_v34, 16  ;;  %v442_v40 = vshll.u32 %v2436_v34, 16  ;;  %v447_v42 = vshll.u32 %v3004_v35, 16 }
  0x27   : > { %2718 = vmatpush3.bf16.msra.mxu0 %v2987_v51  ;;  %1651 = vmatprep.mubr.bf16.mxu0 %v426_v14  ;;  %v3338_v51 = vcombine.low %v2375_v43, %v3330_v45  ;;  %v542_v55 = vrot.slane %v3004_v35, 1  ;;  %v3028_v14 = vld [vmem:[%s3849_s1 + $0x1d0] sm:$0xff]   ;;  %v3022_v19 = vld [vmem:[%s3240_s11 + $0xbc] ss:$0 sps:$4 sm:$0x11]  }
  0x28   : > { %1741 = vmatmul.mubr.bf16.vlgmr.msra.gmra.mrb[0].mxu1 %v534_v62  ;;  %2719 = vmatprep.subr.bf16.mxu0 %v2991_v56  ;;  %v444_v47 = vrot.slane %v442_v40, 1  ;;  %v449_v48 = vrot.slane %v447_v42, 1  ;;  %v540_v50 = vsel %vm531_vm1, %v538_v36, %v539_v33  ;;  %v3020_v56 = vld [vmem:[%s3849_s1 + $0x188] sm:$0xff]   ;;  %v261_v33 = vld [vmem:[%s3240_s11 + $0xb4] sm:$0xe]  ;;  %v548_v36 = vrot.slane %v3022_v19, 1 }
  0x29   : > { %1748 = vmatprep.mubr.bf16.mxu1 %v3282_v63  ;;  %2782 = vmatpush3.bf16.msra.mxu1 %v3011_v31  ;;  %v468_v31 = vrot.slane %v466_v26, 1  ;;  %v2454_v35 = vcombine.low %v261_v33, %v243_v17  ;;  %v244_v43 = vld [vmem:[%s3240_s11 + $0xd8] sm:$0xf]  ;;  %v637_v26 = vshrl.u32 %v3262_v44, 16  ;;  %v263_v33 = vld [vmem:[%s3240_s11 + $0xfc] sm:$0xe] }
  0x2a   : > { %v445_v54 = vor.u32 %v444_v47, %v440_v39  ;;  %2783 = vmatprep.subr.bf16.mxu1 %v3019_v53  ;;  %v2381_v53 = vld [vmem:[%s3240_s11 + $0xe4] sm:$0xf] }
  0x2b   : > { %2720 = vmatpush3.bf16.msra.mxu0 %v2994_v2  ;;  %v3026_v2 = vld [vmem:[%s3849_s1 + $0x128] sm:$0xff]   ;;  %v469_v39 = vor.u32 %v468_v31, %v464_v24  ;;  %v547_v42 = vrot.slane %v2454_v35, 1  ;;  %v3048_v24 = vld [vmem:[%s3849_s1 + $0x138] sm:$0xff]  }
  0x2c   : > { %2721 = vmatprep.subr.bf16.mxu0 %v2998_v8  ;;  %v450_v62 = vsel %vm402_vm0, %v445_v54, %v449_v48  ;;  %v456_v8 = vrot.slane %v454_v5, 1  ;;  %v245_v48 = vld [vmem:[%s3240_s11 + $0xdc] sm:$0xf] }
  0x2d   : > { %2784 = vmatpush3.bf16.msra.mxu1 %v3020_v56 }
  0x2e   : > { %1652 = vmatmul.mubr.bf16.gmra.mrb[4].mxu0 %v2434_v52  ;;  %v2452_v52 = vcombine.low %v259_v49, %v239_v30  ;;  %v457_v15 = vor.u32 %v456_v8, %v452_v4  ;;  %2785 = vmatprep.subr.bf16.mxu1 %v3028_v14  ;;  %v3379_v30 = vld [vmem:[%s3240_s11 + $0xc4] sm:$0xf]  ;;  %v2439_v49 = vcombine.low %v244_v43, %v245_v48  ;;  %v2394_v43 = vld [vmem:[%s3240_s11 + $0x30] sm:$0xe] }
  0x2f   : > { %2722 = vmatpush3.bf16.msra.mxu0 %v3001_v13  ;;  %1659 = vmatprep.mubr.bf16.mxu0 %v438_v38  ;;  %v3390_v40 = vcombine.low %v2379_v28, %v3379_v30 }
  0x30   : > { %1749 = vmatmul.mubr.bf16.gmra.mrb[4].mxu1 %v537_v20  ;;  %2723 = vmatprep.subr.bf16.mxu0 %v3005_v22  ;;  %v541_v57 = vrot.slane %v2452_v52, 1  ;;  %v462_v20 = vsel %vm402_vm0, %v457_v15, %v461_v9  ;;  %v3037_v52 = vld [vmem:[%s3849_s1 + $0x130] sm:$0xff]   ;;  %v476_v54 = vshrl.u32 %v2439_v49, 16  ;;  %v3041_v9 = vld [vmem:[%s3849_s1 + $0x1e8] sm:$0xff]  }
  0x31   : > { %1756 = vmatprep.mubr.bf16.mxu1 %v3311_v25  ;;  %2786 = vmatpush3.bf16.msra.mxu1 %v3029_v29  ;;  %v3043_v15 = vld [vmem:[%s3240_s11 + $0x104] ss:$0 sps:$4 sm:$0x11]  }
  0x32   : > { %v543_v11 = vsel %vm531_vm1, %v541_v57, %v542_v55  ;;  %v478_v55 = vshll.u32 %v2439_v49, 16  ;;  %v3405_v57 = vld [vmem:[%s3240_s11 + $0xe8] sm:$0xf] }
  0x33   : > { %2724 = vmatpush3.bf16.msra.mxu0 %v3008_v27  ;;  %v471_v27 = vshll.u32 %v3022_v19, 16  ;;  %v3411_v1 = vcombine.low %v2381_v53, %v3405_v57  ;;  %v3055_v53 = vld [vmem:[%s3849_s1 + $0x200] sm:$0xff]  }
  0x34   : > { %2725 = vmatprep.subr.bf16.mxu0 %v3014_v37  ;;  %v3033_v37 = vld [vmem:[%s3849_s1 + $0x198] sm:$0xff]   ;;  %v480_v58 = vrot.slane %v478_v55, 1 }
  0x35   : > { %v473_v32 = vrot.slane %v471_v27, 1  ;;  %v639_v27 = vshll.u32 %v3262_v44, 16  ;;  %v3050_v44 = vld [vmem:[%s3849_s1 + $0x1f0] sm:$0xff]   ;;  %v3469_v55 = vld [vmem:[%s3240_s11 + $0x1c] sm:$0xf] }
  0x36   : > { %1660 = vmatmul.mubr.bf16.gmra.mrb[8].mxu0 %v2435_v10  ;;  %v260_v10 = vld [vmem:[%s3240_s11 + $0x90] sm:$0xe]  ;;  %v481_v4 = vor.u32 %v480_v58, %v476_v54  ;;  %v2401_v54 = vld [vmem:[%s3240_s11 + $0x18] sm:$0xf] }
  0x37   : > { %2726 = vmatpush3.bf16.msra.mxu0 %v3017_v46  ;;  %1667 = vmatprep.mubr.bf16.mxu0 %v450_v62  ;;  %v2453_v13 = vcombine.low %v260_v10, %v241_v59  ;;  %v3034_v46 = vld [vmem:[%s3849_s1 + $0x170] sm:$0xff]   ;;  %v474_v47 = vsel %vm402_vm0, %v469_v39, %v473_v32  ;;  %v2393_v62 = vld [vmem:[%s3240_s11 + $0xc] sm:$0xe]  ;;  %v246_v10 = vld [vmem:[%s3240_s11 + $0xfc] sm:$0xf] }
  0x38   : > { %1757 = vmatmul.mubr.bf16.gmra.mrb[8].mxu1 %v540_v50  ;;  %2727 = vmatprep.subr.bf16.mxu0 %v3023_v60  ;;  %v3032_v50 = vld [vmem:[%s3240_s11 + $0xe0] ss:$0 sps:$4 sm:$0x11]   ;;  %v262_v60 = vld [vmem:[%s3240_s11 + $0xd8] sm:$0xe]  ;;  %v2473_v17 = vcombine.low %v2393_v62, %v3259_v41  ;;  %v2474_v62 = vcombine.low %v2394_v43, %v3278_v61 }
  0x39   : > { %1764 = vmatprep.mubr.bf16.mxu1 %v3338_v51  ;;  %v544_v22 = vrot.slane %v2453_v13, 1  ;;  %v483_v56 = vshll.u32 %v3032_v50, 16  ;;  %v551_v5 = vrot.slane %v3032_v50, 1  ;;  %v247_v13 = vld [vmem:[%s3240_s11 + $0x100] sm:$0xf] }
  0x3a   : > { %v2440_v14 = vcombine.low %v246_v10, %v247_v13  ;;  %v3441_v41 = vld [vmem:[%s3240_s11 + $0x10c] sm:$0xf]  ;;  %v764_v35 = vrot.slane %v2473_v17, 1  ;;  %v2403_v10 = vld [vmem:[%s3240_s11 + $0x3c] sm:$0xf]  ;;  %v649_v17 = vshrl.u32 %v3282_v63, 16 }
  0x3b   : > { %2728 = vmatpush3.bf16.msra.mxu0 %v3026_v2  ;;  %v546_v38 = vsel %vm531_vm1, %v544_v22, %v545_v23  ;;  %v485_v59 = vrot.slane %v483_v56, 1  ;;  %v2455_v2 = vcombine.low %v262_v60, %v245_v48  ;;  %v495_v22 = vshll.u32 %v3043_v15, 16  ;;  %v2383_v23 = vld [vmem:[%s3240_s11 + $0x108] sm:$0xf]  ;;  %v3054_v48 = vld [vmem:[%s3849_s1 + $0x1b8] sm:$0xff]  }
  0x3c   : > { %2729 = vmatprep.subr.bf16.mxu0 %v3034_v46  ;;  %v488_v19 = vshrl.u32 %v2440_v14, 16  ;;  %v3445_v32 = vcombine.low %v2383_v23, %v3441_v41  ;;  %v3475_v60 = vld [vmem:[%s3240_s11 + $0x20] ss:$0 sps:$4 sm:$0x11]  }
  0x3d   : > { %v550_v8 = vrot.slane %v2455_v2, 1  ;;  %v497_v31 = vrot.slane %v495_v22, 1  ;;  %v651_v2 = vshll.u32 %v3282_v63, 16  ;;  %v3059_v63 = vld [vmem:[%s3849_s1 + $0x208] sm:$0xff]  }
  0x3e   : > { %1668 = vmatmul.mubr.bf16.gmra.mrb[12].mxu0 %v2436_v34  ;;  %v3030_v34 = vld [vmem:[%s3849_s1 + $0x1d8] sm:$0xff]  }
  0x3f   : > { %1675 = vmatprep.mubr.bf16.mxu0 %v462_v20  ;;  %2787 = vmatprep.subr.bf16.mxu1 %v3030_v34  ;;  %v490_v20 = vshll.u32 %v2440_v14, 16  ;;  %v552_v28 = vsel %vm531_vm1, %v550_v8, %v551_v5  ;;  %v2456_v34 = vcombine.low %v263_v33, %v247_v13  ;;  %v876_v5 = vshll.u32 %v3475_v60, 16 }
  0x40   : > { %1765 = vmatmul.mubr.bf16.gmra.mrb[12].mxu1 %v543_v11  ;;  %2730 = vmatpush3.bf16.msra.mxu0 %v3037_v52  ;;  %v486_v11 = vsel %vm402_vm0, %v481_v4, %v485_v59  ;;  %v2481_v59 = vcombine.low %v2401_v54, %v3469_v55  ;;  %v2396_v54 = vld [vmem:[%s3240_s11 + $0x78] sm:$0xe] }
  0x41   : > { %1772 = vmatprep.mubr.bf16.mxu1 %v3364_v12  ;;  %2788 = vmatpush3.bf16.msra.mxu1 %v3033_v37  ;;  %v492_v29 = vrot.slane %v490_v20, 1  ;;  %v554_v37 = vrot.slane %v3043_v15, 1  ;;  %v553_v39 = vrot.slane %v2456_v34, 1  ;;  %v878_v13 = vrot.slane %v876_v5, 1  ;;  %v2405_v34 = vld [vmem:[%s3240_s11 + $0x60] sm:$0xf] }
  0x42   : > { %2789 = vmatprep.subr.bf16.mxu1 %v3039_v3  ;;  %v869_v3 = vshrl.u32 %v2481_v59, 16  ;;  %v871_v4 = vshll.u32 %v2481_v59, 16  ;;  %v653_v20 = vrot.slane %v651_v2, 1  ;;  %v3526_v2 = vld [vmem:[%s3240_s11 + $0x88] sm:$0xf] }
  0x43   : > { %v555_v56 = vsel %vm531_vm1, %v553_v39, %v554_v37  ;;  %v3513_v39 = vld [vmem:[%s3240_s11 + $0x68] ss:$0 sps:$4 sm:$0x11]  }
  0x44   : > { %v873_v61 = vrot.slane %v871_v4, 1 }
  0x45   : > { %2790 = vmatpush3.bf16.msra.mxu1 %v3040_v6  ;;  %v2395_v6 = vld [vmem:[%s3240_s11 + $0x54] sm:$0xe] }
  0x46   : > { %1676 = vmatmul.mubr.bf16.gmra.mrb[16].mxu0 %v2437_v0  ;;  %v549_v0 = vsel %vm531_vm1, %v547_v42, %v548_v36  ;;  %2791 = vmatprep.subr.bf16.mxu1 %v3041_v9  ;;  %v493_v36 = vor.u32 %v492_v29, %v488_v19  ;;  %v3052_v42 = vld [vmem:[%s3849_s1 + $0x1f8] sm:$0xff]   ;;  %v874_v19 = vor.u32 %v873_v61, %v869_v3 }
  0x47   : > { %1683 = vmatprep.mubr.bf16.mxu0 %v474_v47  ;;  %v3053_v47 = vld [vmem:[%s3240_s11 + $0x14] ss:$0 sps:$4 sm:$0x11]   ;;  %v2475_v29 = vcombine.low %v2395_v6, %v3305_v21  ;;  %v3067_v61 = vld [vmem:[%s3849_s1 + $0x218] sm:$0xff]  }
  0x48   : > { %1773 = vmatmul.mubr.bf16.gmra.mrb[16].mxu1 %v546_v38  ;;  %v3051_v38 = vld [vmem:[%s3849_s1 + $0x1b0] sm:$0xff]   ;;  %v498_v46 = vsel %vm402_vm0, %v493_v36, %v497_v31  ;;  %v644_v50 = vshll.u32 %v3053_v47, 16  ;;  %v765_v52 = vrot.slane %v3053_v47, 1  ;;  %v879_v31 = vsel %vm402_vm0, %v874_v19, %v878_v13  ;;  %v2409_v19 = vld [vmem:[%s3240_s11 + $0xa8] sm:$0xf] }
  0x49   : > { %1780 = vmatprep.mubr.bf16.mxu1 %v3390_v40  ;;  %2792 = vmatpush3.bf16.msra.mxu1 %v3044_v16 }
  0x4a   : > { %2793 = vmatprep.subr.bf16.mxu1 %v3050_v44  ;;  %v766_v58 = vsel %vm531_vm1, %v764_v35, %v765_v52  ;;  %v646_v9 = vrot.slane %v644_v50, 1  ;;  %v3505_v44 = vld [vmem:[%s3240_s11 + $0x64] sm:$0xf]  ;;  %v3063_v52 = vld [vmem:[%s3849_s1 + $0x210] sm:$0xff]  }
  0x4b   : > { %v3509_v37 = vcombine.low %v2405_v34, %v3505_v44  ;;  %v3071_v34 = vld [vmem:[%s3849_s1 + $0x220] sm:$0xff]  }
  0x4d   : > { %2794 = vmatpush3.bf16.msra.mxu1 %v3051_v38  ;;  %v663_v38 = vshll.u32 %v3311_v25, 16  ;;  %v895_v47 = vshll.u32 %v3509_v37, 16 }
  0x4e   : > { %1684 = vmatmul.mubr.bf16.gmra.mrb[20].mxu0 %v2438_v18  ;;  %v3045_v18 = vld [vmem:[%s3849_s1 + $0x178] sm:$0xff]   ;;  %2795 = vmatprep.subr.bf16.mxu1 %v3052_v42  ;;  %v654_v42 = vor.u32 %v653_v20, %v649_v17  ;;  %v675_v17 = vshll.u32 %v3338_v51, 16 }
  0x4f   : > { %1691 = vmatprep.mubr.bf16.mxu0 %v486_v11  ;;  %2731 = vmatprep.subr.bf16.mxu0 %v3045_v18  ;;  %v3484_v11 = vld [vmem:[%s3240_s11 + $0x40] sm:$0xf]  ;;  %v3491_v18 = vld [vmem:[%s3240_s11 + $0x44] ss:$0 sps:$4 sm:$0x11]  }
  0x50   : > { %1781 = vmatmul.mubr.bf16.gmra.mrb[20].mxu1 %v549_v0  ;;  %2732 = vmatpush3.bf16.msra.mxu0 %v3048_v24  ;;  %v3058_v0 = vld [vmem:[%s3240_s11 + $0x38] ss:$0 sps:$4 sm:$0x11]   ;;  %v3487_v15 = vcombine.low %v2403_v10, %v3484_v11  ;;  %v3062_v24 = vld [vmem:[%s3240_s11 + $0x5c] ss:$0 sps:$4 sm:$0x11]  }
  0x51   : > { %1788 = vmatprep.mubr.bf16.mxu1 %v3411_v1  ;;  %2877 = vmatprep.subr.bf16.mxu0 %v3055_v53  ;;  %v768_v16 = vrot.slane %v3058_v0, 1  ;;  %v771_v50 = vrot.slane %v3062_v24, 1  ;;  %v668_v4 = vshll.u32 %v3062_v24, 16  ;;  %v3066_v10 = vld [vmem:[%s3240_s11 + $0x80] ss:$0 sps:$4 sm:$0x11]  }
  0x52   : > { %2796 = vmatpush3.bf16.msra.mxu1 %v3054_v48  ;;  %v881_v22 = vshrl.u32 %v3487_v15, 16  ;;  %v883_v23 = vshll.u32 %v3487_v15, 16  ;;  %v2397_v20 = vld [vmem:[%s3240_s11 + $0x9c] sm:$0xe] }
  0x54   : > { %v885_v33 = vrot.slane %v883_v23, 1  ;;  %v670_v23 = vrot.slane %v668_v4, 1  ;;  %v3079_v4 = vld [vmem:[%s3849_s1 + $0x230] sm:$0xff]  }
  0x56   : > { %1692 = vmatmul.mubr.bf16.gmra.mrb[24].mxu0 %v2439_v49  ;;  %v641_v49 = vrot.slane %v639_v27, 1  ;;  %v656_v27 = vshll.u32 %v3058_v0, 16  ;;  %v886_v21 = vor.u32 %v885_v33, %v881_v22 }
  0x57   : > { %1699 = vmatprep.mubr.bf16.mxu0 %v498_v46  ;;  %v893_v46 = vshrl.u32 %v3509_v37, 16 }
  0x58   : > { %1789 = vmatmul.mubr.bf16.gmra.mrb[24].mxu1 %v552_v28  ;;  %v642_v8 = vor.u32 %v641_v49, %v637_v26  ;;  %v888_v28 = vshll.u32 %v3491_v18, 16  ;;  %v658_v43 = vrot.slane %v656_v27, 1  ;;  %v770_v49 = vrot.slane %v2475_v29, 1 }
  0x59   : > { %1796 = vmatprep.mubr.bf16.mxu1 %v3445_v32 }
  0x5a   : > { %v647_v26 = vsel %vm402_vm0, %v642_v8, %v646_v9  ;;  %v890_v36 = vrot.slane %v888_v28, 1  ;;  %v659_v3 = vsel %vm402_vm0, %v654_v42, %v658_v43  ;;  %v3533_v8 = vld [vmem:[%s3240_s11 + $0x8c] ss:$0 sps:$4 sm:$0x11]   ;;  %v772_v9 = vsel %vm531_vm1, %v770_v49, %v771_v50 }
  0x5b   : > { %v774_v28 = vrot.slane %v3066_v10, 1  ;;  %v680_v42 = vshll.u32 %v3066_v10, 16  ;;  %v2411_v43 = vld [vmem:[%s3240_s11 + $0xcc] sm:$0xf]  ;;  %v3592_v10 = vld [vmem:[%s3240_s11 + $0xf4] sm:$0xf] }
  0x5c   : > { %v891_v48 = vsel %vm402_vm0, %v886_v21, %v890_v36  ;;  %v677_v21 = vrot.slane %v675_v17, 1 }
  0x5e   : > { %1700 = vmatmul.mubr.bf16.gmra.mrb[28].mxu0 %v2440_v14  ;;  %v767_v14 = vrot.slane %v2474_v62, 1  ;;  %v665_v62 = vrot.slane %v663_v38, 1 }
  0x5f   : > { %1837 = vmatprep.mubr.bf16.mxu0 %v766_v58  ;;  %v897_v58 = vrot.slane %v895_v47, 1 }
  0x60   : > { %1797 = vmatmul.mubr.bf16.gmra.mrb[28].mxu1 %v555_v56  ;;  %v769_v35 = vsel %vm531_vm1, %v767_v14, %v768_v16  ;;  %v661_v56 = vshrl.u32 %v3311_v25, 16  ;;  %v2476_v25 = vcombine.low %v2396_v54, %v3330_v45  ;;  %v912_v45 = vshll.u32 %v3533_v8, 16 }
  0x61   : > { %1934 = vmatprep.mubr.bf16.mxu1 %v879_v31  ;;  %v898_v5 = vor.u32 %v897_v58, %v893_v46  ;;  %v3556_v31 = vld [vmem:[%s3240_s11 + $0xb0] ss:$0 sps:$4 sm:$0x11]   ;;  %v2477_v46 = vcombine.low %v2397_v20, %v3359_v7  ;;  %v687_v7 = vshll.u32 %v3364_v12, 16 }
  0x62   : > { %v666_v22 = vor.u32 %v665_v62, %v661_v56  ;;  %v773_v27 = vrot.slane %v2476_v25, 1  ;;  %v914_v33 = vrot.slane %v912_v45, 1  ;;  %v924_v47 = vshll.u32 %v3556_v31, 16  ;;  %v2398_v56 = vld [vmem:[%s3240_s11 + $0xc0] sm:$0xe] }
  0x63   : > { %v776_v62 = vrot.slane %v2477_v46, 1  ;;  %v3587_v25 = vld [vmem:[%s3240_s11 + $0xd4] ss:$0 sps:$4 sm:$0x11]   ;;  %v2478_v17 = vcombine.low %v2398_v56, %v3379_v30  ;;  %v3083_v30 = vld [vmem:[%s3849_s1 + $0x238] sm:$0xff]  }
  0x64   : > { %v671_v38 = vsel %vm402_vm0, %v666_v22, %v670_v23  ;;  %v3618_v46 = vld [vmem:[%s3240_s11 + $0x118] sm:$0xf]  ;;  %v3078_v56 = vld [vmem:[%s3240_s11 + $0xec] ss:$0 sps:$4 sm:$0x11]  }
  0x66   : > { %1838 = vmatmul.mubr.bf16.vlgmr.msra.gmra.mrb[32].mxu0 %v647_v26  ;;  %v3550_v26 = vld [vmem:[%s3240_s11 + $0xac] sm:$0xf] }
  0x67   : > { %2878 = vmatpush3.bf16.msra.mxu0 %v3055_v53  ;;  %1845 = vmatprep.mubr.bf16.mxu0 %v769_v35  ;;  %v900_v53 = vshll.u32 %v3513_v39, 16  ;;  %v3553_v29 = vcombine.low %v2409_v19, %v3550_v26  ;;  %v3070_v35 = vld [vmem:[%s3240_s11 + $0xa4] ss:$0 sps:$4 sm:$0x11]  }
  0x68   : > { %1935 = vmatmul.mubr.bf16.vlgmr.msra.gmra.mrb[32].mxu1 %v2481_v59  ;;  %2879 = vmatprep.subr.bf16.mxu0 %v3059_v63  ;;  %v2407_v59 = vld [vmem:[%s3240_s11 + $0x84] sm:$0xf]  ;;  %v3074_v19 = vld [vmem:[%s3240_s11 + $0xc8] ss:$0 sps:$4 sm:$0x11]  }
  0x69   : > { %1942 = vmatprep.mubr.bf16.mxu1 %v891_v48  ;;  %v902_v0 = vrot.slane %v900_v53, 1  ;;  %v3530_v6 = vcombine.low %v2407_v59, %v3526_v2  ;;  %v919_v36 = vshll.u32 %v3553_v29, 16  ;;  %v3570_v48 = vld [vmem:[%s3240_s11 + $0xd0] sm:$0xf]  ;;  %v917_v50 = vshrl.u32 %v3553_v29, 16  ;;  %v3075_v53 = vld [vmem:[%s3849_s1 + $0x228] sm:$0xff]  }
  0x6a   : > { %v3578_v54 = vcombine.low %v2411_v43, %v3570_v48  ;;  %v682_v59 = vrot.slane %v680_v42, 1  ;;  %v2415_v43 = vld [vmem:[%s3240_s11 + $0x114] sm:$0xf] }
  0x6b   : > { %2880 = vmatpush3.bf16.msra.mxu0 %v3059_v63  ;;  %v903_v13 = vsel %vm402_vm0, %v898_v5, %v902_v0  ;;  %v905_v14 = vshrl.u32 %v3530_v6, 16  ;;  %v907_v16 = vshll.u32 %v3530_v6, 16  ;;  %v777_v0 = vrot.slane %v3070_v35, 1 }
  0x6c   : > { %2881 = vmatprep.subr.bf16.mxu0 %v3063_v52  ;;  %v929_v20 = vshrl.u32 %v3578_v54, 16 }
  0x6d   : > { %v909_v24 = vrot.slane %v907_v16, 1  ;;  %v692_v16 = vshll.u32 %v3070_v35, 16  ;;  %v778_v45 = vsel %vm531_vm1, %v776_v62, %v777_v0  ;;  %v2426_v35 = vld [vmem:[%s3240_s11 + $0x3c] sm:$0xe]  ;;  %v711_v0 = vshll.u32 %v3411_v1, 16 }
  0x6e   : > { %1846 = vmatmul.mubr.bf16.gmra.mrb[36].mxu0 %v659_v3  ;;  %v926_v3 = vrot.slane %v924_v47, 1  ;;  %v1000_v47 = vrot.slane %v3491_v18, 1 }
  0x6f   : > { %1853 = vmatprep.mubr.bf16.mxu0 %v772_v9  ;;  %2882 = vmatpush3.bf16.msra.mxu0 %v3063_v52  ;;  %v910_v63 = vor.u32 %v909_v24, %v905_v14  ;;  %v921_v52 = vrot.slane %v919_v36, 1  ;;  %v931_v9 = vshll.u32 %v3578_v54, 16  ;;  %v689_v14 = vrot.slane %v687_v7, 1 }
  0x70   : > { %1943 = vmatmul.mubr.bf16.gmra.mrb[36].mxu1 %v3487_v15  ;;  %v673_v15 = vshrl.u32 %v3338_v51, 16  ;;  %2883 = vmatprep.subr.bf16.mxu0 %v3067_v61  ;;  %v775_v51 = vsel %vm531_vm1, %v773_v27, %v774_v28  ;;  %v936_v24 = vshll.u32 %v3587_v25, 16  ;;  %v699_v27 = vshll.u32 %v3390_v40, 16 }
  0x71   : > { %1950 = vmatprep.mubr.bf16.mxu1 %v903_v13  ;;  %v915_v49 = vsel %vm402_vm0, %v910_v63, %v914_v33  ;;  %v922_v5 = vor.u32 %v921_v52, %v917_v50  ;;  %v685_v13 = vshrl.u32 %v3364_v12, 16  ;;  %v933_v23 = vrot.slane %v931_v9, 1  ;;  %v2399_v63 = vld [vmem:[%s3240_s11 + $0xe4] sm:$0xe] }
  0x72   : > { %v678_v58 = vor.u32 %v677_v21, %v673_v15  ;;  %v694_v15 = vrot.slane %v692_v16, 1  ;;  %v779_v33 = vrot.slane %v2478_v17, 1  ;;  %v3613_v21 = vld [vmem:[%s3240_s11 + $0xf8] ss:$0 sps:$4 sm:$0x11]   ;;  %v697_v52 = vshrl.u32 %v3390_v40, 16 }
  0x73   : > { %2884 = vmatpush3.bf16.msra.mxu0 %v3067_v61  ;;  %v927_v22 = vsel %vm402_vm0, %v922_v5, %v926_v3  ;;  %v690_v28 = vor.u32 %v689_v14, %v685_v13  ;;  %v934_v36 = vor.u32 %v933_v23, %v929_v20  ;;  %v948_v18 = vshll.u32 %v3613_v21, 16  ;;  %v3639_v13 = vld [vmem:[%s3240_s11 + $0x11c] ss:$0 sps:$4 sm:$0x11]  }
  0x74   : > { %2885 = vmatprep.subr.bf16.mxu0 %v3071_v34  ;;  %v683_v61 = vsel %vm402_vm0, %v678_v58, %v682_v59  ;;  %v3082_v20 = vld [vmem:[%s3240_s11 + $0x110] ss:$0 sps:$4 sm:$0x11]  }
  0x75   : > { %v695_v50 = vsel %vm402_vm0, %v690_v28, %v694_v15  ;;  %v950_v16 = vrot.slane %v948_v18, 1  ;;  %v723_v28 = vshll.u32 %v3445_v32, 16 }
  0x76   : > { %1854 = vmatmul.mubr.bf16.gmra.mrb[40].mxu0 %v671_v38  ;;  %v938_v38 = vrot.slane %v936_v24, 1 }
  0x77   : > { %1861 = vmatprep.mubr.bf16.mxu0 %v775_v51  ;;  %2886 = vmatpush3.bf16.msra.mxu0 %v3071_v34  ;;  %v780_v34 = vrot.slane %v3074_v19, 1  ;;  %v2498_v51 = vcombine.low %v2426_v35, %v3484_v11 }
  0x78   : > { %1951 = vmatmul.mubr.bf16.gmra.mrb[40].mxu1 %v3509_v37  ;;  %2887 = vmatprep.subr.bf16.mxu0 %v3075_v53  ;;  %v2413_v37 = vld [vmem:[%s3240_s11 + $0xf0] sm:$0xf]  ;;  %v939_v62 = vsel %vm402_vm0, %v934_v36, %v938_v38  ;;  %v2425_v36 = vld [vmem:[%s3240_s11 + $0x18] sm:$0xe] }
  0x79   : > { %1958 = vmatprep.mubr.bf16.mxu1 %v915_v49  ;;  %v3603_v12 = vcombine.low %v2413_v37, %v3592_v10  ;;  %v2479_v49 = vcombine.low %v2399_v63, %v3405_v57  ;;  %v781_v7 = vsel %vm531_vm1, %v779_v33, %v780_v34  ;;  %v999_v59 = vrot.slane %v2498_v51, 1 }
  0x7a   : > { %v2488_v57 = vcombine.low %v2415_v43, %v3618_v46  ;;  %v709_v37 = vshrl.u32 %v3411_v1, 16  ;;  %v728_v43 = vshll.u32 %v3082_v20, 16 }
  0x7b   : > { %2888 = vmatpush3.bf16.msra.mxu0 %v3075_v53  ;;  %v943_v42 = vshll.u32 %v3603_v12, 16  ;;  %v701_v53 = vrot.slane %v699_v27, 1  ;;  %v941_v58 = vshrl.u32 %v3603_v12, 16  ;;  %v3633_v3 = vsel %vm531_vm1, %v999_v59, %v1000_v47  ;;  %v2428_v59 = vld [vmem:[%s3240_s11 + $0x84] sm:$0xe] }
  0x7c   : > { %2889 = vmatprep.subr.bf16.mxu0 %v3079_v4  ;;  %v782_v9 = vrot.slane %v2479_v49, 1  ;;  %v955_v17 = vshll.u32 %v2488_v57, 16  ;;  %v953_v1 = vshrl.u32 %v2488_v57, 16  ;;  %v960_v27 = vshll.u32 %v3639_v13, 16 }
  0x7d   : > { %v945_v11 = vrot.slane %v943_v42, 1  ;;  %v702_v5 = vor.u32 %v701_v53, %v697_v52  ;;  %v721_v42 = vshrl.u32 %v3445_v32, 16  ;;  %v997_v32 = vrot.slane %v3475_v60, 1  ;;  %v2427_v53 = vld [vmem:[%s3240_s11 + $0x60] sm:$0xe] }
  0x7e   : > { %1862 = vmatmul.mubr.bf16.gmra.mrb[44].mxu0 %v683_v61  ;;  %v783_v61 = vrot.slane %v3078_v56, 1  ;;  %v962_v35 = vrot.slane %v960_v27, 1 }
  0x7f   : > { %1869 = vmatprep.mubr.bf16.mxu0 %v778_v45  ;;  %2890 = vmatpush3.bf16.msra.mxu0 %v3079_v4  ;;  %v2400_v4 = vld [vmem:[%s3240_s11 + $0x108] sm:$0xe]  ;;  %v946_v14 = vor.u32 %v945_v11, %v941_v58  ;;  %v713_v45 = vrot.slane %v711_v0, 1  ;;  %v1003_v58 = vrot.slane %v3513_v39, 1  ;;  %v2500_v11 = vcombine.low %v2428_v59, %v3526_v2  ;;  %v2431_v39 = vld [vmem:[%s3240_s11 + $0xf0] sm:$0xe] }
  0x80   : > { %1959 = vmatmul.mubr.bf16.gmra.mrb[44].mxu1 %v3530_v6  ;;  %2891 = vmatprep.subr.bf16.mxu0 %v3083_v30  ;;  %v704_v6 = vshll.u32 %v3074_v19, 16  ;;  %v716_v19 = vshll.u32 %v3078_v56, 16  ;;  %v2480_v23 = vcombine.low %v2400_v4, %v3441_v41  ;;  %v786_v41 = vrot.slane %v3082_v20, 1  ;;  %v2430_v4 = vld [vmem:[%s3240_s11 + $0xcc] sm:$0xe] }
  0x81   : > { %1966 = vmatprep.mubr.bf16.mxu1 %v927_v22  ;;  %v951_v24 = vsel %vm402_vm0, %v946_v14, %v950_v16  ;;  %v714_v15 = vor.u32 %v713_v45, %v709_v37  ;;  %v2502_v2 = vcombine.low %v2430_v4, %v3570_v48  ;;  %v1012_v37 = vrot.slane %v3587_v25, 1  ;;  %v2432_v14 = vld [vmem:[%s3240_s11 + $0x114] sm:$0xe]  ;;  %v3094_v25 = vld [vmem:[%s3851_s3] sm:$0xff]   ;;  %v3099_v20 = vld [vmem:[%s3851_s3 + $0x28] sm:$0xff]  }
  0x82   : > { %v706_v40 = vrot.slane %v704_v6, 1  ;;  %v718_v63 = vrot.slane %v716_v19, 1  ;;  %v785_v33 = vrot.slane %v2480_v23, 1  ;;  %v725_v6 = vrot.slane %v723_v28, 1  ;;  %2909 = vmatprep.subr.bf16.mxu1 %v3094_v25  ;;  %v3098_v19 = vld [vmem:[%s3851_s3 + $0x20] sm:$0xff]  }
  0x83   : > { %2892 = vmatpush3.bf16.msra.mxu0 %v3083_v30  ;;  %v957_v30 = vrot.slane %v955_v17, 1  ;;  %v2504_v16 = vcombine.low %v2432_v14, %v3618_v46  ;;  %2910 = vmatpush3.bf16.msra.mxu1 %v3094_v25  ;;  %v3096_v46 = vld [vmem:[%s3851_s3 + $0x10] sm:$0xff]  }
  0x84   : > { %v707_v22 = vsel %vm402_vm0, %v702_v5, %v706_v40  ;;  %v719_v38 = vsel %vm402_vm0, %v714_v15, %v718_v63  ;;  %v787_v51 = vsel %vm531_vm1, %v785_v33, %v786_v41  ;;  %v726_v49 = vor.u32 %v725_v6, %v721_v42 }
  0x85   : > { %v958_v34 = vor.u32 %v957_v30, %v953_v1  ;;  %v1009_v40 = vrot.slane %v3556_v31, 1  ;;  %v1017_v48 = vrot.slane %v2504_v16, 1 }
  0x86   : > { %1870 = vmatmul.mubr.bf16.gmra.mrb[48].mxu0 %v695_v50  ;;  %v730_v50 = vrot.slane %v728_v43, 1 }
  0x87   : > { %1877 = vmatprep.mubr.bf16.mxu0 %v781_v7  ;;  %v963_v47 = vsel %vm402_vm0, %v958_v34, %v962_v35 }
  0x88   : > { %1967 = vmatmul.mubr.bf16.gmra.mrb[48].mxu1 %v3553_v29  ;;  %v784_v29 = vsel %vm531_vm1, %v782_v9, %v783_v61  ;;  %v731_v7 = vsel %vm402_vm0, %v726_v49, %v730_v50 }
  0x89   : > { %1974 = vmatprep.mubr.bf16.mxu1 %v939_v62  ;;  %v2429_v62 = vld [vmem:[%s3240_s11 + $0xa8] sm:$0xe] }
  0x8a   : > { %v2501_v18 = vcombine.low %v2429_v62, %v3550_v26  ;;  %v2503_v26 = vcombine.low %v2431_v39, %v3592_v10  ;;  %v1018_v10 = vrot.slane %v3639_v13, 1  ;;  %v3097_v13 = vld [vmem:[%s3851_s3 + $0x18] sm:$0xff]  }
  0x8c   : > { %v1008_v0 = vrot.slane %v2501_v18, 1  ;;  %v1014_v61 = vrot.slane %v2503_v26, 1  ;;  %v1019_v45 = vsel %vm531_vm1, %v1017_v48, %v1018_v10 }
  0x8e   : > { %1878 = vmatmul.mubr.bf16.gmra.mrb[52].mxu0 %v707_v22  ;;  %v1010_v9 = vsel %vm531_vm1, %v1008_v0, %v1009_v40  ;;  %v3100_v22 = vld [vmem:[%s3851_s3 + $0x30] sm:$0xff]  }
  0x8f   : > { %1885 = vmatprep.mubr.bf16.mxu0 %v784_v29  ;;  %v3708_v29 = vld [vmem:[%s3850_s2] ss:$0 sm:$0xff] }
  0x90   : > { %1975 = vmatmul.mubr.bf16.gmra.mrb[52].mxu1 %v3578_v54  ;;  %v2497_v54 = vcombine.low %v2425_v36, %v3469_v55  ;;  %v2499_v55 = vcombine.low %v2427_v53, %v3505_v44  ;;  %v1005_v44 = vrot.slane %v2500_v11, 1 }
  0x91   : > { %1982 = vmatprep.mubr.bf16.mxu1 %v951_v24 }
  0x92   : > { %v996_v52 = vrot.slane %v2497_v54, 1 }
  0x94   : > { %v998_v56 = vsel %vm531_vm1, %v996_v52, %v997_v32 }
  0x96   : > { %1886 = vmatmul.mubr.bf16.gmra.mrb[56].mxu0 %v719_v38  ;;  %v3101_v38 = vld [vmem:[%s3851_s3 + $0x38] sm:$0xff]  }
  0x97   : > { %1893 = vmatprep.mubr.bf16.mxu0 %v787_v51 }
  0x98   : > { %1983 = vmatmul.mubr.bf16.gmra.mrb[56].mxu1 %v3603_v12  ;;  %v1002_v12 = vrot.slane %v2499_v55, 1 }
  0x99   : > { %1990 = vmatprep.mubr.bf16.mxu1 %v963_v47 }
  0x9a   : > { %v1004_v60 = vsel %vm531_vm1, %v1002_v12, %v1003_v58 }
  0x9e   : > { %1894 = vmatmul.mubr.bf16.gmra.mrb[60].mxu0 %v731_v7 }
  0x9f   : > { %2893 = vmatprep.mubr.bf16.mxu0 %v998_v56 }
  0xa0   : > { %1991 = vmatmul.mubr.bf16.gmra.mrb[60].mxu1 %v2488_v57  ;;  %v1006_v57 = vrot.slane %v3533_v8, 1  ;;  %v1015_v8 = vrot.slane %v3613_v21, 1  ;;  %v3095_v21 = vld [vmem:[%s3851_s3 + $0x8] sm:$0xff]  }
  0xa1   : > { %2911 = vmatprep.subr.bf16.mxu1 %v3095_v21 }
  0xa2   : > { %v1007_v5 = vsel %vm531_vm1, %v1005_v44, %v1006_v57  ;;  %v1016_v17 = vsel %vm531_vm1, %v1014_v61, %v1015_v8  ;;  %2912 = vmatpush3.bf16.msra.mxu1 %v3095_v21 }
  0xa3   : > { %2913 = vmatprep.subr.bf16.mxu1 %v3096_v46 }
  0xa6   : > { %2894 = vmatmul.mubr.bf16.vlgmr.msra.gmra.mrb[64].mxu0 %v3633_v3  ;;  %v1011_v3 = vrot.slane %v2502_v2, 1  ;;  %2914 = vmatpush3.bf16.msra.mxu1 %v3096_v46 }
  0xa7   : > { %2897 = vmatprep.mubr.bf16.mxu0 %v1004_v60  ;;  %2915 = vmatprep.subr.bf16.mxu1 %v3097_v13 }
  0xa8   : > { %v1013_v31 = vsel %vm531_vm1, %v1011_v3, %v1012_v37 }
  0xaa   : > { %2916 = vmatpush3.bf16.msra.mxu1 %v3097_v13 }
  0xab   : > { %2917 = vmatprep.subr.bf16.mxu1 %v3098_v19 }
  0xae   : > { %2898 = vmatmul.mubr.bf16.gmra.mrb[68].mxu0 %v1007_v5  ;;  %2918 = vmatpush3.bf16.msra.mxu1 %v3098_v19 }
  0xaf   : > { %2901 = vmatprep.mubr.bf16.mxu0 %v1010_v9  ;;  %2919 = vmatprep.subr.bf16.mxu1 %v3099_v20 }
  0xb2   : > { %2920 = vmatpush3.bf16.msra.mxu1 %v3099_v20 }
  0xb3   : > { %2921 = vmatprep.subr.bf16.mxu1 %v3100_v22 }
  0xb6   : > { %2902 = vmatmul.mubr.bf16.gmra.mrb[72].mxu0 %v1013_v31  ;;  %2922 = vmatpush3.bf16.msra.mxu1 %v3100_v22 }
  0xb7   : > { %2905 = vmatprep.mubr.bf16.mxu0 %v1016_v17  ;;  %2923 = vmatprep.subr.bf16.mxu1 %v3101_v38 }
  0xba   : > { %2924 = vmatpush3.bf16.msra.mxu1 %v3101_v38 }
  0xbe   : > { %2906 = vmatmul.mubr.bf16.gmra.mrb[76].mxu0 %v1019_v45 }
  0xf9   : > { %v2605_v23 = vpop.f32.mrb[0].mxu0 }
  0xfa   : > { %v2606_v24 = vpop.f32.mrb[1].mxu0 }
  0xfb   : > { %v2669_v1 = vpop.f32.mrb[0].mxu1  ;;  %v2607_v30 = vadd.f32 %v2606_v24, %v2605_v23  ;;  %v2608_v27 = vpop.f32.mrb[2].mxu0 }
  0xfc   : > { %v2670_v28 = vpop.f32.mrb[1].mxu1  ;;  %v2609_v15 = vpop.f32.mrb[3].mxu0 }
  0xfd   : > { %v2671_v63 = vadd.f32 %v2670_v28, %v2669_v1  ;;  %v2672_v33 = vpop.f32.mrb[2].mxu1  ;;  %v1646_v41 = vadd.f32 %v2607_v30, %v3708_v29  ;;  %v2610_v34 = vadd.f32 %v2609_v15, %v2608_v27 }
  0xfe   : > { %v2673_v35 = vpop.f32.mrb[3].mxu1 }
  0xff   : > { %v2674_v36 = vadd.f32 %v2673_v35, %v2672_v33  ;;  %v1649_v42 = vadd.f32 %v2610_v34, %v3708_v29  ;;  %v3715_v6 = vadd.f32 %v2671_v63, %v1646_v41 }
 0x101   : > { %v3717_v43 = vadd.f32 %v2674_v36, %v1649_v42  ;;  %v2611_v51 = vpop.f32.mrb[4].mxu0 }
 0x102   : > { %v2612_v54 = vpop.f32.mrb[5].mxu0 }
 0x103   : > { %v2675_v47 = vpop.f32.mrb[4].mxu1  ;;  %v2613_v49 = vadd.f32 %v2612_v54, %v2611_v51  ;;  %v2614_v50 = vpop.f32.mrb[6].mxu0 }
 0x104   : > { %v2676_v52 = vpop.f32.mrb[5].mxu1  ;;  %v2615_v32 = vpop.f32.mrb[7].mxu0 }
 0x105   : > { %v2677_v53 = vadd.f32 %v2676_v52, %v2675_v47  ;;  %v2678_v7 = vpop.f32.mrb[6].mxu1  ;;  %v1654_v56 = vadd.f32 %v2613_v49, %v3708_v29  ;;  %v2616_v55 = vadd.f32 %v2615_v32, %v2614_v50 }
 0x106   : > { %v2679_v12 = vpop.f32.mrb[7].mxu1 }
 0x107   : > { %v2680_v58 = vadd.f32 %v2679_v12, %v2678_v7  ;;  %v1657_v59 = vadd.f32 %v2616_v55, %v3708_v29  ;;  %v3721_v62 = vadd.f32 %v2677_v53, %v1654_v56 }
 0x109   : > { %v3723_v11 = vadd.f32 %v2680_v58, %v1657_v59  ;;  %v2617_v60 = vpop.f32.mrb[8].mxu0 }
 0x10a   : > { %v2618_v18 = vpop.f32.mrb[9].mxu0 }
 0x10b   : > { %v2681_v44 = vpop.f32.mrb[8].mxu1  ;;  %v2619_v57 = vadd.f32 %v2618_v18, %v2617_v60  ;;  %v2620_v0 = vpop.f32.mrb[10].mxu0 }
 0x10c   : > { %v2682_v40 = vpop.f32.mrb[9].mxu1  ;;  %v2621_v4 = vpop.f32.mrb[11].mxu0 }
 0x10d   : > { %v2683_v39 = vadd.f32 %v2682_v40, %v2681_v44  ;;  %v2684_v5 = vpop.f32.mrb[10].mxu1  ;;  %v1662_v2 = vadd.f32 %v2619_v57, %v3708_v29  ;;  %v2622_v9 = vadd.f32 %v2621_v4, %v2620_v0 }
 0x10e   : > { %v2685_v26 = vpop.f32.mrb[11].mxu1 }
 0x10f   : > { %v2686_v3 = vadd.f32 %v2685_v26, %v2684_v5  ;;  %v1665_v37 = vadd.f32 %v2622_v9, %v3708_v29  ;;  %v3727_v61 = vadd.f32 %v2683_v39, %v1662_v2 }
 0x111   : > { %v3729_v8 = vadd.f32 %v2686_v3, %v1665_v37  ;;  %v2623_v14 = vpop.f32.mrb[12].mxu0 }
 0x112   : > { %v2624_v31 = vpop.f32.mrb[13].mxu0 }
 0x113   : > { %v2687_v16 = vpop.f32.mrb[12].mxu1  ;;  %v2625_v17 = vadd.f32 %v2624_v31, %v2623_v14  ;;  %v2626_v48 = vpop.f32.mrb[14].mxu0 }
 0x114   : > { %v2688_v10 = vpop.f32.mrb[13].mxu1  ;;  %v2627_v45 = vpop.f32.mrb[15].mxu0 }
 0x115   : > { %v2689_v25 = vadd.f32 %v2688_v10, %v2687_v16  ;;  %v2690_v21 = vpop.f32.mrb[14].mxu1  ;;  %v1670_v46 = vadd.f32 %v2625_v17, %v3708_v29  ;;  %v2628_v13 = vadd.f32 %v2627_v45, %v2626_v48 }
 0x116   : > { %v2691_v19 = vpop.f32.mrb[15].mxu1 }
 0x117   : > { %v2692_v20 = vadd.f32 %v2691_v19, %v2690_v21  ;;  %v1673_v22 = vadd.f32 %v2628_v13, %v3708_v29  ;;  %v3733_v23 = vadd.f32 %v2689_v25, %v1670_v46 }
 0x119   : > { %v3735_v24 = vadd.f32 %v2692_v20, %v1673_v22  ;;  %v2629_v1 = vpop.f32.mrb[16].mxu0 }
 0x11a   : > { %v2630_v30 = vpop.f32.mrb[17].mxu0 }
 0x11b   : > { %v2693_v27 = vpop.f32.mrb[16].mxu1  ;;  %v2631_v28 = vadd.f32 %v2630_v30, %v2629_v1  ;;  %v2632_v15 = vpop.f32.mrb[18].mxu0 }
 0x11c   : > { %v2694_v63 = vpop.f32.mrb[17].mxu1  ;;  %v2633_v33 = vpop.f32.mrb[19].mxu0 }
 0x11d   : > { %v2695_v41 = vadd.f32 %v2694_v63, %v2693_v27  ;;  %v2696_v34 = vpop.f32.mrb[18].mxu1  ;;  %v1678_v35 = vadd.f32 %v2631_v28, %v3708_v29  ;;  %v2634_v36 = vadd.f32 %v2633_v33, %v2632_v15 }
 0x11e   : > { %v2697_v38 = vpop.f32.mrb[19].mxu1 }
 0x11f   : > { %v2698_v42 = vadd.f32 %v2697_v38, %v2696_v34  ;;  %v1681_v51 = vadd.f32 %v2634_v36, %v3708_v29  ;;  %v3739_v54 = vadd.f32 %v2695_v41, %v1678_v35 }
 0x121   : > { %v3741_v47 = vadd.f32 %v2698_v42, %v1681_v51  ;;  %v2635_v49 = vpop.f32.mrb[20].mxu0 }
 0x122   : > { %v2636_v50 = vpop.f32.mrb[21].mxu0 }
 0x123   : > { %v2699_v52 = vpop.f32.mrb[20].mxu1  ;;  %v2637_v32 = vadd.f32 %v2636_v50, %v2635_v49  ;;  %v2638_v53 = vpop.f32.mrb[22].mxu0 }
 0x124   : > { %v2700_v7 = vpop.f32.mrb[21].mxu1  ;;  %v2639_v56 = vpop.f32.mrb[23].mxu0 }
 0x125   : > { %v2701_v55 = vadd.f32 %v2700_v7, %v2699_v52  ;;  %v2702_v12 = vpop.f32.mrb[22].mxu1  ;;  %v1686_v58 = vadd.f32 %v2637_v32, %v3708_v29  ;;  %v2640_v59 = vadd.f32 %v2639_v56, %v2638_v53 }
 0x126   : > { %v2703_v60 = vpop.f32.mrb[23].mxu1 }
 0x127   : > { %v2704_v18 = vadd.f32 %v2703_v60, %v2702_v12  ;;  %v1689_v44 = vadd.f32 %v2640_v59, %v3708_v29  ;;  %v3745_v57 = vadd.f32 %v2701_v55, %v1686_v58 }
 0x129   : > { %v3747_v0 = vadd.f32 %v2704_v18, %v1689_v44  ;;  %v2641_v40 = vpop.f32.mrb[24].mxu0 }
 0x12a   : > { %v2642_v4 = vpop.f32.mrb[25].mxu0 }
 0x12b   : > { %v2705_v39 = vpop.f32.mrb[24].mxu1  ;;  %v2643_v5 = vadd.f32 %v2642_v4, %v2641_v40  ;;  %v2644_v2 = vpop.f32.mrb[26].mxu0 }
 0x12c   : > { %v2706_v9 = vpop.f32.mrb[25].mxu1  ;;  %v2645_v26 = vpop.f32.mrb[27].mxu0 }
 0x12d   : > { %v2707_v3 = vadd.f32 %v2706_v9, %v2705_v39  ;;  %v2708_v37 = vpop.f32.mrb[26].mxu1  ;;  %v1694_v14 = vadd.f32 %v2643_v5, %v3708_v29  ;;  %v2646_v31 = vadd.f32 %v2645_v26, %v2644_v2 }
 0x12e   : > { %v2709_v16 = vpop.f32.mrb[27].mxu1 }
 0x12f   : > { %v2710_v17 = vadd.f32 %v2709_v16, %v2708_v37  ;;  %v1697_v48 = vadd.f32 %v2646_v31, %v3708_v29  ;;  %v3751_v10 = vadd.f32 %v2707_v3, %v1694_v14 }
 0x131   : > { %v3753_v45 = vadd.f32 %v2710_v17, %v1697_v48  ;;  %v2647_v25 = vpop.f32.mrb[28].mxu0 }
 0x132   : > { %v2648_v21 = vpop.f32.mrb[29].mxu0 }
 0x133   : > { %v2711_v46 = vpop.f32.mrb[28].mxu1  ;;  %v2649_v13 = vadd.f32 %v2648_v21, %v2647_v25  ;;  %v2650_v19 = vpop.f32.mrb[30].mxu0 }
 0x134   : > { %v2712_v20 = vpop.f32.mrb[29].mxu1  ;;  %v2651_v22 = vpop.f32.mrb[31].mxu0 }
 0x135   : > { %v2713_v1 = vadd.f32 %v2712_v20, %v2711_v46  ;;  %v2714_v30 = vpop.f32.mrb[30].mxu1  ;;  %v1702_v27 = vadd.f32 %v2649_v13, %v3708_v29  ;;  %v2652_v28 = vadd.f32 %v2651_v22, %v2650_v19 }
 0x136   : > { %v2715_v15 = vpop.f32.mrb[31].mxu1 }
 0x137   : > { %v2716_v63 = vadd.f32 %v2715_v15, %v2714_v30  ;;  %v1705_v33 = vadd.f32 %v2652_v28, %v3708_v29  ;;  %v3757_v41 = vadd.f32 %v2713_v1, %v1702_v27 }
 0x139   : > { %v3759_v34 = vadd.f32 %v2716_v63, %v1705_v33  ;;  %v2733_v35 = vpop.f32.mrb[32].mxu0 }
 0x13a   : > { %v2734_v36 = vpop.f32.mrb[33].mxu0 }
 0x13b   : > { %v2797_v38 = vpop.f32.mrb[32].mxu1  ;;  %v2735_v42 = vadd.f32 %v2734_v36, %v2733_v35  ;;  %v2736_v51 = vpop.f32.mrb[34].mxu0 }
 0x13c   : > { %v2798_v49 = vpop.f32.mrb[33].mxu1  ;;  %v2737_v50 = vpop.f32.mrb[35].mxu0 }
 0x13d   : > { %v2799_v52 = vadd.f32 %v2798_v49, %v2797_v38  ;;  %v2800_v32 = vpop.f32.mrb[34].mxu1  ;;  %v1840_v53 = vadd.f32 %v2735_v42, %v3715_v6  ;;  %v2738_v7 = vadd.f32 %v2737_v50, %v2736_v51 }
 0x13e   : > { %v2801_v56 = vpop.f32.mrb[35].mxu1 }
 0x13f   : > { %v2802_v55 = vadd.f32 %v2801_v56, %v2800_v32  ;;  %v1843_v29 = vadd.f32 %v2738_v7, %v3717_v43  ;;  %v3763_v12 = vadd.f32 %v2799_v52, %v1840_v53 }
 0x141   : > { %v2739_v58 = vpop.f32.mrb[36].mxu0  ;;  %v3765_v59 = vadd.f32 %v2802_v55, %v1843_v29 }
 0x142   : > { %v2740_v60 = vpop.f32.mrb[37].mxu0 }
 0x143   : > { %v2803_v18 = vpop.f32.mrb[36].mxu1  ;;  %v2741_v44 = vadd.f32 %v2740_v60, %v2739_v58  ;;  %v2742_v40 = vpop.f32.mrb[38].mxu0 }
 0x144   : > { %v2804_v4 = vpop.f32.mrb[37].mxu1  ;;  %v2743_v39 = vpop.f32.mrb[39].mxu0 }
 0x145   : > { %v2805_v5 = vadd.f32 %v2804_v4, %v2803_v18  ;;  %v2806_v2 = vpop.f32.mrb[38].mxu1  ;;  %v1848_v6 = vadd.f32 %v2741_v44, %v3721_v62  ;;  %v2744_v9 = vadd.f32 %v2743_v39, %v2742_v40 }
 0x146   : > { %v2807_v26 = vpop.f32.mrb[39].mxu1 }
 0x147   : > { %v2808_v3 = vadd.f32 %v2807_v26, %v2806_v2  ;;  %v1851_v43 = vadd.f32 %v2744_v9, %v3723_v11  ;;  %v3769_v37 = vadd.f32 %v2805_v5, %v1848_v6 }
 0x149   : > { %v2745_v14 = vpop.f32.mrb[40].mxu0  ;;  %v3771_v31 = vadd.f32 %v2808_v3, %v1851_v43 }
 0x14a   : > { %v2746_v16 = vpop.f32.mrb[41].mxu0 }
 0x14b   : > { %v2809_v17 = vpop.f32.mrb[40].mxu1  ;;  %v2747_v48 = vadd.f32 %v2746_v16, %v2745_v14  ;;  %v2748_v25 = vpop.f32.mrb[42].mxu0 }
 0x14c   : > { %v2810_v21 = vpop.f32.mrb[41].mxu1  ;;  %v2749_v46 = vpop.f32.mrb[43].mxu0 }
 0x14d   : > { %v2811_v13 = vadd.f32 %v2810_v21, %v2809_v17  ;;  %v2812_v19 = vpop.f32.mrb[42].mxu1  ;;  %v1856_v62 = vadd.f32 %v2747_v48, %v3727_v61  ;;  %v2750_v20 = vadd.f32 %v2749_v46, %v2748_v25 }
 0x14e   : > { %v2813_v22 = vpop.f32.mrb[43].mxu1 }
 0x14f   : > { %v2814_v1 = vadd.f32 %v2813_v22, %v2812_v19  ;;  %v1859_v11 = vadd.f32 %v2750_v20, %v3729_v8  ;;  %v3775_v30 = vadd.f32 %v2811_v13, %v1856_v62 }
 0x151   : > { %v2751_v27 = vpop.f32.mrb[44].mxu0  ;;  %v3777_v28 = vadd.f32 %v2814_v1, %v1859_v11 }
 0x152   : > { %v2752_v15 = vpop.f32.mrb[45].mxu0 }
 0x153   : > { %v2815_v63 = vpop.f32.mrb[44].mxu1  ;;  %v2753_v33 = vadd.f32 %v2752_v15, %v2751_v27  ;;  %v2754_v35 = vpop.f32.mrb[46].mxu0 }
 0x154   : > { %v2816_v36 = vpop.f32.mrb[45].mxu1  ;;  %v2755_v38 = vpop.f32.mrb[47].mxu0 }
 0x155   : > { %v2817_v42 = vadd.f32 %v2816_v36, %v2815_v63  ;;  %v2818_v51 = vpop.f32.mrb[46].mxu1  ;;  %v1864_v61 = vadd.f32 %v2753_v33, %v3733_v23  ;;  %v2756_v49 = vadd.f32 %v2755_v38, %v2754_v35 }
 0x156   : > { %v2819_v50 = vpop.f32.mrb[47].mxu1 }
 0x157   : > { %v2820_v52 = vadd.f32 %v2819_v50, %v2818_v51  ;;  %v1867_v8 = vadd.f32 %v2756_v49, %v3735_v24  ;;  %v3781_v32 = vadd.f32 %v2817_v42, %v1864_v61 }
 0x159   : > { %v2757_v53 = vpop.f32.mrb[48].mxu0  ;;  %v3783_v7 = vadd.f32 %v2820_v52, %v1867_v8 }
 0x15a   : > { %v2758_v56 = vpop.f32.mrb[49].mxu0 }
 0x15b   : > { %v2821_v55 = vpop.f32.mrb[48].mxu1  ;;  %v2759_v29 = vadd.f32 %v2758_v56, %v2757_v53  ;;  %v2760_v58 = vpop.f32.mrb[50].mxu0 }
 0x15c   : > { %v2822_v60 = vpop.f32.mrb[49].mxu1  ;;  %v2761_v18 = vpop.f32.mrb[51].mxu0 }
 0x15d   : > { %v2823_v44 = vadd.f32 %v2822_v60, %v2821_v55  ;;  %v2824_v40 = vpop.f32.mrb[50].mxu1  ;;  %v1872_v23 = vadd.f32 %v2759_v29, %v3739_v54  ;;  %v2762_v4 = vadd.f32 %v2761_v18, %v2760_v58 }
 0x15e   : > { %v2825_v39 = vpop.f32.mrb[51].mxu1 }
 0x15f   : > { %v2826_v5 = vadd.f32 %v2825_v39, %v2824_v40  ;;  %v1875_v24 = vadd.f32 %v2762_v4, %v3741_v47  ;;  %v3787_v2 = vadd.f32 %v2823_v44, %v1872_v23 }
 0x161   : > { %v2763_v6 = vpop.f32.mrb[52].mxu0  ;;  %v3789_v9 = vadd.f32 %v2826_v5, %v1875_v24 }
 0x162   : > { %v2764_v26 = vpop.f32.mrb[53].mxu0 }
 0x163   : > { %v2827_v3 = vpop.f32.mrb[52].mxu1  ;;  %v2765_v43 = vadd.f32 %v2764_v26, %v2763_v6  ;;  %v2766_v14 = vpop.f32.mrb[54].mxu0 }
 0x164   : > { %v2828_v16 = vpop.f32.mrb[53].mxu1  ;;  %v2767_v17 = vpop.f32.mrb[55].mxu0 }
 0x165   : > { %v2829_v48 = vadd.f32 %v2828_v16, %v2827_v3  ;;  %v2830_v25 = vpop.f32.mrb[54].mxu1  ;;  %v1880_v54 = vadd.f32 %v2765_v43, %v3745_v57  ;;  %v2768_v21 = vadd.f32 %v2767_v17, %v2766_v14 }
 0x166   : > { %v2831_v46 = vpop.f32.mrb[55].mxu1 }
 0x167   : > { %v2832_v13 = vadd.f32 %v2831_v46, %v2830_v25  ;;  %v1883_v47 = vadd.f32 %v2768_v21, %v3747_v0  ;;  %v3793_v19 = vadd.f32 %v2829_v48, %v1880_v54 }
 0x169   : > { %v2769_v62 = vpop.f32.mrb[56].mxu0  ;;  %v3795_v20 = vadd.f32 %v2832_v13, %v1883_v47 }
 0x16a   : > { %v2770_v22 = vpop.f32.mrb[57].mxu0 }
 0x16b   : > { %v2833_v1 = vpop.f32.mrb[56].mxu1  ;;  %v2771_v11 = vadd.f32 %v2770_v22, %v2769_v62  ;;  %v2772_v27 = vpop.f32.mrb[58].mxu0 }
 0x16c   : > { %v2834_v15 = vpop.f32.mrb[57].mxu1  ;;  %v2773_v63 = vpop.f32.mrb[59].mxu0 }
 0x16d   : > { %v2835_v33 = vadd.f32 %v2834_v15, %v2833_v1  ;;  %v2836_v35 = vpop.f32.mrb[58].mxu1  ;;  %v1888_v57 = vadd.f32 %v2771_v11, %v3751_v10  ;;  %v2774_v36 = vadd.f32 %v2773_v63, %v2772_v27 }
 0x16e   : > { %v2837_v38 = vpop.f32.mrb[59].mxu1 }
 0x16f   : > { %v2838_v42 = vadd.f32 %v2837_v38, %v2836_v35  ;;  %v1891_v0 = vadd.f32 %v2774_v36, %v3753_v45  ;;  %v3799_v51 = vadd.f32 %v2835_v33, %v1888_v57 }
 0x171   : > { %v2775_v61 = vpop.f32.mrb[60].mxu0  ;;  %v3801_v49 = vadd.f32 %v2838_v42, %v1891_v0 }
 0x172   : > { %v2776_v50 = vpop.f32.mrb[61].mxu0 }
 0x173   : > { %v2839_v52 = vpop.f32.mrb[60].mxu1  ;;  %v2777_v8 = vadd.f32 %v2776_v50, %v2775_v61  ;;  %v2778_v53 = vpop.f32.mrb[62].mxu0 }
 0x174   : > { %v2840_v56 = vpop.f32.mrb[61].mxu1  ;;  %v2779_v55 = vpop.f32.mrb[63].mxu0 }
 0x175   : > { %v2841_v29 = vadd.f32 %v2840_v56, %v2839_v52  ;;  %v2842_v58 = vpop.f32.mrb[62].mxu1  ;;  %v1896_v10 = vadd.f32 %v2777_v8, %v3757_v41  ;;  %v2780_v60 = vadd.f32 %v2779_v55, %v2778_v53 }
 0x176   : > { %v2843_v18 = vpop.f32.mrb[63].mxu1 }
 0x177   : > { %v2844_v44 = vadd.f32 %v2843_v18, %v2842_v58  ;;  %v1899_v45 = vadd.f32 %v2780_v60, %v3759_v34  ;;  %v1993_v40 = vadd.f32 %v2841_v29, %v1896_v10 }
 0x179   : > { %v2895_v23 = vpop.f32.mrb[64].mxu0  ;;  %v1996_v4 = vadd.f32 %v2844_v44, %v1899_v45 }
 0x17a   : > { %v2042_v39 = vadd.f32 %v2895_v23, %v3769_v37  ;;  %v2033_v5 = vpop.f32.mrb[65].mxu0 }
 0x17b   : > { %v2034_v24 = vadd.f32 %v2033_v5, %v3763_v12  ;;  %v2896_v6 = vpop.f32.mrb[66].mxu0 }
 0x17c   : > { %v2045_v26 = vadd.f32 %v2896_v6, %v3771_v31  ;;  %v2036_v3 = vpop.f32.mrb[67].mxu0  ;;  %v2098_v41 = vmax.f32 %v2042_v39, 0.0 }
 0x17d   : > { %v2037_v43 = vadd.f32 %v2036_v3, %v3765_v59  ;;  %v2096_v16 = vmax.f32 %v2034_v24, 0.0 }
 0x17e   : > { %v2099_v14 = vmax.f32 %v2045_v26, 0.0 }
 0x17f   : > { %v2097_v17 = vmax.f32 %v2037_v43, 0.0 }
 0x180   : > { %v2113_v48 = vpack.c.bf16 %v2099_v14, %v2098_v41 }
 0x181   : > { %v2112_v34 = vpack.c.bf16 %v2097_v17, %v2096_v16  ;;  %v2899_v25 = vpop.f32.mrb[68].mxu0 }
 0x182   : > { %v2058_v54 = vadd.f32 %v2899_v25, %v3781_v32  ;;  %v2049_v21 = vpop.f32.mrb[69].mxu0 }
 0x183   : > { %v2050_v37 = vadd.f32 %v2049_v21, %v3775_v30  ;;  %v2900_v46 = vpop.f32.mrb[70].mxu0  ;;  %2925 = vmatprep.mubr.bf16.mxu1 %v2112_v34 }
 0x184   : > { %v2061_v12 = vadd.f32 %v2900_v46, %v3783_v7  ;;  %v2052_v31 = vpop.f32.mrb[71].mxu0  ;;  %2926 = vmatmul.mubr.bf16.vlgmr.msra.gmra.mrb[64].mxu1 %v2113_v48  ;;  %v2102_v13 = vmax.f32 %v2058_v54, 0.0 }
 0x185   : > { %v2053_v59 = vadd.f32 %v2052_v31, %v3777_v28  ;;  %v2100_v62 = vmax.f32 %v2050_v37, 0.0 }
 0x186   : > { %v2103_v47 = vmax.f32 %v2061_v12, 0.0 }
 0x187   : > { %v2101_v22 = vmax.f32 %v2053_v59, 0.0 }
 0x188   : > { %v2115_v1 = vpack.c.bf16 %v2103_v47, %v2102_v13 }
 0x189   : > { %v2114_v11 = vpack.c.bf16 %v2101_v22, %v2100_v62  ;;  %v2903_v27 = vpop.f32.mrb[72].mxu0 }
 0x18a   : > { %v2074_v32 = vadd.f32 %v2903_v27, %v3793_v19  ;;  %v2065_v15 = vpop.f32.mrb[73].mxu0 }
 0x18b   : > { %v2066_v30 = vadd.f32 %v2065_v15, %v3787_v2  ;;  %v2904_v63 = vpop.f32.mrb[74].mxu0  ;;  %2929 = vmatprep.mubr.bf16.mxu1 %v2114_v11 }
 0x18c   : > { %v2077_v7 = vadd.f32 %v2904_v63, %v3795_v20  ;;  %v2068_v33 = vpop.f32.mrb[75].mxu0  ;;  %2930 = vmatmul.mubr.bf16.gmra.mrb[68].mxu1 %v2115_v1  ;;  %v2106_v35 = vmax.f32 %v2074_v32, 0.0 }
 0x18d   : > { %v2069_v28 = vadd.f32 %v2068_v33, %v3789_v9  ;;  %v2104_v36 = vmax.f32 %v2066_v30, 0.0 }
 0x18e   : > { %v2107_v57 = vmax.f32 %v2077_v7, 0.0 }
 0x18f   : > { %v2105_v38 = vmax.f32 %v2069_v28, 0.0 }
 0x190   : > { %v2117_v42 = vpack.c.bf16 %v2107_v57, %v2106_v35 }
 0x191   : > { %v2116_v0 = vpack.c.bf16 %v2105_v38, %v2104_v36  ;;  %v2907_v61 = vpop.f32.mrb[76].mxu0 }
 0x192   : > { %v2090_v50 = vadd.f32 %v2907_v61, %v1993_v40  ;;  %v2081_v19 = vpop.f32.mrb[77].mxu0 }
 0x193   : > { %v2082_v2 = vadd.f32 %v2081_v19, %v3799_v51  ;;  %v2908_v52 = vpop.f32.mrb[78].mxu0  ;;  %2933 = vmatprep.mubr.bf16.mxu1 %v2116_v0  ;;  %v2578_v51 = vld [vmem:[%s3852_s4] ss:$0 sm:$0xff] }
 0x194   : > { %v2093_v8 = vadd.f32 %v2908_v52, %v1996_v4  ;;  %v2084_v20 = vpop.f32.mrb[79].mxu0  ;;  %2934 = vmatmul.mubr.bf16.gmra.mrb[72].mxu1 %v2117_v42  ;;  %v2110_v9 = vmax.f32 %v2090_v50, 0.0 }
 0x195   : > { %v2085_v53 = vadd.f32 %v2084_v20, %v3801_v49  ;;  %v2108_v55 = vmax.f32 %v2082_v2, 0.0 }
 0x196   : > { %v2111_v56 = vmax.f32 %v2093_v8, 0.0 }
 0x197   : > { %v2109_v29 = vmax.f32 %v2085_v53, 0.0 }
 0x198   : > { %v2119_v58 = vpack.c.bf16 %v2111_v56, %v2110_v9 }
 0x199   : > { %v2118_v10 = vpack.c.bf16 %v2109_v29, %v2108_v55 }
 0x19b   : > { %2937 = vmatprep.mubr.bf16.mxu1 %v2118_v10 }
 0x19c   : > { %2938 = vmatmul.mubr.bf16.gmra.mrb[76].mxu1 %v2119_v58 }
 0x257   : > { %v2927_v49 = vpop.f32.mrb[64].mxu1 }
 0x258   : > { %v2234_v60 = vadd.f32 %v2927_v49, %v2578_v51  ;;  %v2225_v18 = vpop.f32.mrb[65].mxu1 }
 0x259   : > { %v2226_v44 = vadd.f32 %v2578_v51, %v2225_v18  ;;  %v2928_v45 = vpop.f32.mrb[66].mxu1 }
 0x25a   : > { %2290 = vst [vmem:[%s3827_s10 + $0x10] sm:$0xff] %v2234_v60  ;;  %v2237_v40 = vadd.f32 %v2928_v45, %v2578_v51  ;;  %v2228_v23 = vpop.f32.mrb[67].mxu1 }
 0x25b   : > { %2288 = vst [vmem:[%s3827_s10] sm:$0xff] %v2226_v44  ;;  %v2229_v4 = vadd.f32 %v2578_v51, %v2228_v23 }
 0x25c   : > { %2291 = vst [vmem:[%s3827_s10 + $0x18] sm:$0xff] %v2237_v40 }
 0x25d   : > { %2289 = vst [vmem:[%s3827_s10 + $0x8] sm:$0xff] %v2229_v4 }
 0x25f   : > { %v2931_v39 = vpop.f32.mrb[68].mxu1 }
 0x260   : > { %v2250_v5 = vadd.f32 %v2931_v39, %v2578_v51  ;;  %v2241_v24 = vpop.f32.mrb[69].mxu1 }
 0x261   : > { %v2242_v6 = vadd.f32 %v2578_v51, %v2241_v24  ;;  %v2932_v26 = vpop.f32.mrb[70].mxu1 }
 0x262   : > { %2294 = vst [vmem:[%s3827_s10 + $0x30] sm:$0xff] %v2250_v5  ;;  %v2253_v3 = vadd.f32 %v2932_v26, %v2578_v51  ;;  %v2244_v43 = vpop.f32.mrb[71].mxu1 }
 0x263   : > { %2292 = vst [vmem:[%s3827_s10 + $0x20] sm:$0xff] %v2242_v6  ;;  %v2245_v41 = vadd.f32 %v2578_v51, %v2244_v43 }
 0x264   : > { %2295 = vst [vmem:[%s3827_s10 + $0x38] sm:$0xff] %v2253_v3 }
 0x265   : > { %2293 = vst [vmem:[%s3827_s10 + $0x28] sm:$0xff] %v2245_v41 }
 0x267   : > { %v2935_v14 = vpop.f32.mrb[72].mxu1 }
 0x268   : > { %v2266_v16 = vadd.f32 %v2935_v14, %v2578_v51  ;;  %v2257_v17 = vpop.f32.mrb[73].mxu1 }
 0x269   : > { %v2258_v48 = vadd.f32 %v2578_v51, %v2257_v17  ;;  %v2936_v34 = vpop.f32.mrb[74].mxu1 }
 0x26a   : > { %2298 = vst [vmem:[%s3827_s10 + $0x50] sm:$0xff] %v2266_v16  ;;  %v2269_v25 = vadd.f32 %v2936_v34, %v2578_v51  ;;  %v2260_v54 = vpop.f32.mrb[75].mxu1 }
 0x26b   : > { %2296 = vst [vmem:[%s3827_s10 + $0x40] sm:$0xff] %v2258_v48  ;;  %v2261_v21 = vadd.f32 %v2578_v51, %v2260_v54 }
 0x26c   : > { %2299 = vst [vmem:[%s3827_s10 + $0x58] sm:$0xff] %v2269_v25 }
 0x26d   : > { %2297 = vst [vmem:[%s3827_s10 + $0x48] sm:$0xff] %v2261_v21 }
 0x26f   : > { %v2939_v37 = vpop.f32.mrb[76].mxu1 }
 0x270   : > { %v2282_v46 = vadd.f32 %v2939_v37, %v2578_v51  ;;  %v2273_v12 = vpop.f32.mrb[77].mxu1 }
 0x271   : > { %v2274_v31 = vadd.f32 %v2578_v51, %v2273_v12  ;;  %v2940_v59 = vpop.f32.mrb[78].mxu1 }
 0x272   : > { %2302 = vst [vmem:[%s3827_s10 + $0x70] sm:$0xff] %v2282_v46  ;;  %v2285_v13 = vadd.f32 %v2940_v59, %v2578_v51  ;;  %v2276_v47 = vpop.f32.mrb[79].mxu1 }
 0x273   : > { %2300 = vst [vmem:[%s3827_s10 + $0x60] sm:$0xff] %v2274_v31  ;;  %v2277_v62 = vadd.f32 %v2578_v51, %v2276_v47 }
 0x274   : > { %2303 = vst [vmem:[%s3827_s10 + $0x78] sm:$0xff] %v2285_v13 }
 0x275   : > { %2301 = vst [vmem:[%s3827_s10 + $0x68] sm:$0xff] %v2277_v62 }
 0x276 PF: > { %s15_s18 = sadd.s32 1, %s3108_s18  }
 0x277   : > { %p12_p5 = scmp.ge.s32.totalorder %s15_s18, 5  }
 0x279   :  { %14 = sbr.rel (!%p12_p5) target bundleno = 1 (0x1), region = 72 }

</bundles_post_ra>
